<compile_context>
chip_gen: v6e
topology: v6e:2x2x1
jax: 0.10.0
libtpu: 0.0.40
codegen_flags: <defaults>
</compile_context>

<pallas_src>
import math

import jax
import jax.numpy as jnp
from jax.experimental import pallas as pl
from jax.experimental.pallas import tpu as pltpu

# Model dimensions (small, consistent with a tiny sentence transformer).
S = 8            # sequence length
H = 32           # hidden size
NH = 4           # number of attention heads
DH = H // NH     # head dim
FF = 4 * H       # FFN inner dim
C = 16           # number of output classes (head output)
C_PAD = 128      # head output padded to a full lane tile (lane-dense store)
LN_EPS = 1e-5


def _layernorm(x, g, b):
    mu = jnp.mean(x, axis=-1, keepdims=True)
    var = jnp.mean((x - mu) ** 2, axis=-1, keepdims=True)
    return (x - mu) * jax.lax.rsqrt(var + LN_EPS) * g + b


def transformer_head_kernel(
    x_ref,
    wqkv_ref, bqkv_ref, wo_ref, vecs_ref,
    w1_ref, b1_ref, w2_ref,
    wh_ref, bh_ref,
    out_ref,
):
    tb = x_ref.shape[0]          # sentences in this block
    rows = tb * S

    x = x_ref[...].reshape(rows, H)            # (TB*S, H) f32
    x_bf = x.astype(jnp.bfloat16)

    vec = vecs_ref[...]                        # (6, H) packed bias / LN params
    bo, ln1g, ln1b = vec[0:1], vec[1:2], vec[2:3]
    b2, ln2g, ln2b = vec[3:4], vec[4:5], vec[5:6]

    # --- fused QKV projection (one MXU matmul, N = 3H) ----------------------
    qkv = jnp.dot(x_bf, wqkv_ref[...], preferred_element_type=jnp.float32)
    qkv = qkv + bqkv_ref[...]                  # (TB*S, 3H)
    q = qkv[:, 0 * H:1 * H].reshape(tb, S, H)
    k = qkv[:, 1 * H:2 * H].reshape(tb, S, H)
    v = qkv[:, 2 * H:3 * H].reshape(tb, S, H)

    # --- multi-head self-attention, batched over the sentence block ---------
    scale = 1.0 / math.sqrt(DH)
    ctx_heads = []
    for h in range(NH):                        # static unroll over heads
        lo, hi = h * DH, (h + 1) * DH
        qh, kh, vh = q[:, :, lo:hi], k[:, :, lo:hi], v[:, :, lo:hi]   # (TB,S,DH)
        s = jnp.einsum("bqd,bkd->bqk", qh, kh,
                       preferred_element_type=jnp.float32) * scale    # (TB,S,S)
        m = jnp.max(s, axis=-1, keepdims=True)
        e = jnp.exp(s - m)
        p = e * pl.reciprocal(jnp.sum(e, axis=-1, keepdims=True), approx=True)
        ctx_heads.append(jnp.einsum("bqk,bkd->bqd", p, vh,
                                    preferred_element_type=jnp.float32))
    ctx = jnp.concatenate(ctx_heads, axis=-1).reshape(rows, H)         # (TB*S, H)

    # Single Wo matmul over the concatenated heads.
    attn_out = jnp.dot(ctx.astype(jnp.bfloat16), wo_ref[...],
                       preferred_element_type=jnp.float32) + bo
    h1 = _layernorm(x + attn_out, ln1g, ln1b)

    # --- feed-forward --------------------------------------------------------
    ff = jnp.dot(h1.astype(jnp.bfloat16), w1_ref[...],
                 preferred_element_type=jnp.float32) + b1_ref[...]
    ff = jax.nn.gelu(ff, approximate=True)
    ff = jnp.dot(ff.astype(jnp.bfloat16), w2_ref[...],
                 preferred_element_type=jnp.float32) + b2
    h2 = _layernorm(h1 + ff, ln2g, ln2b)

    # --- sentence pooling + classification head ------------------------------
    # Mean pooling over the sequence (no padding mask; inputs are dense S=8).
    pooled = jnp.sum(h2.reshape(tb, S, H), axis=1) * (1.0 / S)         # (TB, H)
    logits = jnp.dot(pooled.astype(jnp.bfloat16), wh_ref[...],
                     preferred_element_type=jnp.float32) + bh_ref[...]  # (TB, 128)
    out_ref[...] = logits                       # lane-dense, unmasked store


def init_params(key):
    ks = jax.random.split(key, 16)
    wscale, bscale = 0.02, 0.01

    def w(k, shape):
        return (wscale * jax.random.normal(k, shape, dtype=jnp.float32)
                ).astype(jnp.bfloat16)

    def b(k, shape):
        return (bscale * jax.random.normal(k, shape, dtype=jnp.float32)
                ).astype(jnp.float32)

    wqkv = w(ks[0], (H, 3 * H))
    bqkv = b(ks[1], (1, 3 * H))
    wo = w(ks[2], (H, H))
    w1 = w(ks[3], (H, FF))
    b1 = b(ks[4], (1, FF))
    w2 = w(ks[5], (FF, H))

    bo = b(ks[6], (1, H))
    ln1g = 1.0 + b(ks[7], (1, H))
    ln1b = b(ks[8], (1, H))
    b2 = b(ks[9], (1, H))
    ln2g = 1.0 + b(ks[10], (1, H))
    ln2b = b(ks[11], (1, H))
    # Packed (6, H): [bo, ln1g, ln1b, b2, ln2g, ln2b]
    vecs = jnp.concatenate([bo, ln1g, ln1b, b2, ln2g, ln2b], axis=0)

    wh = w(ks[12], (H, C))
    bh = b(ks[13], (1, C))
    wh_pad = jnp.zeros((H, C_PAD), jnp.bfloat16).at[:, :C].set(wh)
    bh_pad = jnp.zeros((1, C_PAD), jnp.float32).at[:, :C].set(bh)

    return dict(wqkv=wqkv, bqkv=bqkv, wo=wo, vecs=vecs,
                w1=w1, b1=b1, w2=w2, wh_pad=wh_pad, bh_pad=bh_pad)


_PARAM_ORDER = ("wqkv", "bqkv", "wo", "vecs", "w1", "b1", "w2",
                "wh_pad", "bh_pad")


def _pick_tb(B):
    """Sentences per grid step: big blocks, but >=2 grid steps when possible
    (v7x dual-TC), and a multiple of 8 so output tiles stay (8,128)-aligned."""
    if B <= 8:
        return B
    tb = min(128, (B + 1) // 2)
    return max(8, (tb // 8) * 8)


def sentence_transformer_with_head(x, params, *, tb=None):
    """x: (B, S, H) float32 token features -> logits (B, C)."""
    B = x.shape[0]
    if tb is None:
        tb = _pick_tb(B)
    bp = pl.cdiv(B, tb) * tb
    if bp != B:
        x = jnp.pad(x, ((0, bp - B), (0, 0), (0, 0)))

    weights = [params[name] for name in _PARAM_ORDER]

    out = pl.pallas_call(
        transformer_head_kernel,
        out_shape=jax.ShapeDtypeStruct((bp, C_PAD), jnp.float32),
        grid=(bp // tb,),
        in_specs=[pl.BlockSpec((tb, S, H), lambda b: (b, 0, 0))]
        + [pl.BlockSpec(w.shape, lambda b, nd=w.ndim: (0,) * nd)
           for w in weights],
        out_specs=pl.BlockSpec((tb, C_PAD), lambda b: (b, 0)),
        compiler_params=pltpu.CompilerParams(
            dimension_semantics=("parallel",)),
    )(x, *weights)
    return out[:B, :C]


def reference_forward(x, params):
    """Pure-JAX reference with identical semantics/dtypes (for validation)."""
    B = x.shape[0]
    x2 = x.reshape(B * S, H)
    qkv = jnp.dot(x2.astype(jnp.bfloat16), params["wqkv"],
                  preferred_element_type=jnp.float32) + params["bqkv"]
    q = qkv[:, 0 * H:1 * H].reshape(B, S, H)
    k = qkv[:, 1 * H:2 * H].reshape(B, S, H)
    v = qkv[:, 2 * H:3 * H].reshape(B, S, H)

    scale = 1.0 / math.sqrt(DH)
    ctxs = []
    for h in range(NH):
        lo, hi = h * DH, (h + 1) * DH
        s = jnp.einsum("bqd,bkd->bqk", q[:, :, lo:hi], k[:, :, lo:hi],
                       preferred_element_type=jnp.float32) * scale
        p = jax.nn.softmax(s, axis=-1)
        ctxs.append(jnp.einsum("bqk,bkd->bqd", p, v[:, :, lo:hi],
                               preferred_element_type=jnp.float32))
    ctx = jnp.concatenate(ctxs, axis=-1).reshape(B * S, H)

    vec = params["vecs"]
    bo, ln1g, ln1b, b2, ln2g, ln2b = (vec[i:i + 1] for i in range(6))

    attn_out = jnp.dot(ctx.astype(jnp.bfloat16), params["wo"],
                       preferred_element_type=jnp.float32) + bo
    h1 = _layernorm(x2 + attn_out, ln1g, ln1b)

    ff = jnp.dot(h1.astype(jnp.bfloat16), params["w1"],
                 preferred_element_type=jnp.float32) + params["b1"]
    ff = jax.nn.gelu(ff, approximate=True)
    ff = jnp.dot(ff.astype(jnp.bfloat16), params["w2"],
                 preferred_element_type=jnp.float32) + b2
    h2 = _layernorm(h1 + ff, ln2g, ln2b)

    pooled = jnp.mean(h2.reshape(B, S, H), axis=1)
    logits = jnp.dot(pooled.astype(jnp.bfloat16), params["wh_pad"],
                     preferred_element_type=jnp.float32) + params["bh_pad"]
    return logits[:, :C]


if __name__ == "__main__":
    key = jax.random.PRNGKey(0)
    pkey, xkey = jax.random.split(key)
    params = init_params(pkey)

    B = 16  # small, but enough for a batched block and a 2-step grid
    x = jax.random.normal(xkey, (B, S, H), dtype=jnp.float32)

    logits = jax.block_until_ready(sentence_transformer_with_head(x, params))
    ref = jax.block_until_ready(reference_forward(x, params))

    assert logits.shape == (B, C)
    assert jnp.allclose(logits, ref, rtol=1e-2, atol=2e-3), "mismatch vs reference"

    print("KERNEL_OK")
</pallas_src>

<mosaic_0001>
module attributes {stable_mosaic.version = 11 : i64} {
  func.func @transformer_head_kernel(%arg0: i32, %arg1: memref<8x8x32xf32, #tpu.memory_space<vmem>>, %arg2: memref<32x96xbf16, #tpu.memory_space<vmem>>, %arg3: memref<1x96xf32, #tpu.memory_space<vmem>>, %arg4: memref<32x32xbf16, #tpu.memory_space<vmem>>, %arg5: memref<6x32xf32, #tpu.memory_space<vmem>>, %arg6: memref<32x128xbf16, #tpu.memory_space<vmem>>, %arg7: memref<1x128xf32, #tpu.memory_space<vmem>>, %arg8: memref<128x32xbf16, #tpu.memory_space<vmem>>, %arg9: memref<32x128xbf16, #tpu.memory_space<vmem>>, %arg10: memref<1x128xf32, #tpu.memory_space<vmem>>, %arg11: memref<8x128xf32, #tpu.memory_space<vmem>>) attributes {dimension_semantics = [#tpu.dimension_semantics<parallel>], iteration_bounds = array<i64: 2>, scalar_prefetch = 0 : i64, scratch_operands = 0 : i64, tpu.core_type = #tpu.core_type<tc>, window_params = [{transform_indices = @transform_0, window_bounds = array<i64: 8, 8, 32>}, {pipeline_mode = #tpu.pipeline_mode<synchronous>, transform_indices = @transform_1, window_bounds = array<i64: 32, 96>}, {pipeline_mode = #tpu.pipeline_mode<synchronous>, transform_indices = @transform_2, window_bounds = array<i64: 1, 96>}, {pipeline_mode = #tpu.pipeline_mode<synchronous>, transform_indices = @transform_3, window_bounds = array<i64: 32, 32>}, {pipeline_mode = #tpu.pipeline_mode<synchronous>, transform_indices = @transform_4, window_bounds = array<i64: 6, 32>}, {pipeline_mode = #tpu.pipeline_mode<synchronous>, transform_indices = @transform_5, window_bounds = array<i64: 32, 128>}, {pipeline_mode = #tpu.pipeline_mode<synchronous>, transform_indices = @transform_6, window_bounds = array<i64: 1, 128>}, {pipeline_mode = #tpu.pipeline_mode<synchronous>, transform_indices = @transform_7, window_bounds = array<i64: 128, 32>}, {pipeline_mode = #tpu.pipeline_mode<synchronous>, transform_indices = @transform_8, window_bounds = array<i64: 32, 128>}, {pipeline_mode = #tpu.pipeline_mode<synchronous>, transform_indices = @transform_9, window_bounds = array<i64: 1, 128>}, {transform_indices = @transform_10, window_bounds = array<i64: 8, 128>}]} {
    %c0 = arith.constant 0 : index
    %c0_0 = arith.constant 0 : index
    %c0_1 = arith.constant 0 : index
    %0 = vector.load %arg1[%c0, %c0_0, %c0_1] : memref<8x8x32xf32, #tpu.memory_space<vmem>>, vector<8x8x32xf32>
    %1 = vector.shape_cast %0 : vector<8x8x32xf32> to vector<64x32xf32>
    %2 = arith.truncf %1 : vector<64x32xf32> to vector<64x32xbf16>
    %c0_2 = arith.constant 0 : index
    %c0_3 = arith.constant 0 : index
    %3 = vector.load %arg5[%c0_2, %c0_3] : memref<6x32xf32, #tpu.memory_space<vmem>>, vector<6x32xf32>
    %4 = vector.extract_strided_slice %3 {offsets = [0, 0], sizes = [1, 32], strides = [1, 1]} : vector<6x32xf32> to vector<1x32xf32>
    %5 = vector.extract_strided_slice %3 {offsets = [1, 0], sizes = [1, 32], strides = [1, 1]} : vector<6x32xf32> to vector<1x32xf32>
    %6 = vector.extract_strided_slice %3 {offsets = [2, 0], sizes = [1, 32], strides = [1, 1]} : vector<6x32xf32> to vector<1x32xf32>
    %7 = vector.extract_strided_slice %3 {offsets = [3, 0], sizes = [1, 32], strides = [1, 1]} : vector<6x32xf32> to vector<1x32xf32>
    %8 = vector.extract_strided_slice %3 {offsets = [4, 0], sizes = [1, 32], strides = [1, 1]} : vector<6x32xf32> to vector<1x32xf32>
    %9 = vector.extract_strided_slice %3 {offsets = [5, 0], sizes = [1, 32], strides = [1, 1]} : vector<6x32xf32> to vector<1x32xf32>
    %c0_4 = arith.constant 0 : index
    %c0_5 = arith.constant 0 : index
    %10 = vector.load %arg2[%c0_4, %c0_5] : memref<32x96xbf16, #tpu.memory_space<vmem>>, vector<32x96xbf16>
    %cst = arith.constant dense<0.000000e+00> : vector<64x96xf32>
    %11 = tpu.matmul %2, %10, %cst {dimension_numbers = #tpu.dot_dimension_numbers<[1], [0], [0], [1], [0, 0, 1, 1], [], []>} : vector<64x32xbf16>, vector<32x96xbf16>, vector<64x96xf32> -> vector<64x96xf32>
    %c0_6 = arith.constant 0 : index
    %c0_7 = arith.constant 0 : index
    %12 = vector.load %arg3[%c0_6, %c0_7] : memref<1x96xf32, #tpu.memory_space<vmem>>, vector<1x96xf32>
    %13 = vector.broadcast %12 : vector<1x96xf32> to vector<64x96xf32>
    %14 = arith.addf %11, %13 : vector<64x96xf32>
    %15 = vector.extract_strided_slice %14 {offsets = [0, 0], sizes = [64, 32], strides = [1, 1]} : vector<64x96xf32> to vector<64x32xf32>
    %16 = vector.shape_cast %15 : vector<64x32xf32> to vector<8x8x32xf32>
    %17 = vector.extract_strided_slice %14 {offsets = [0, 32], sizes = [64, 32], strides = [1, 1]} : vector<64x96xf32> to vector<64x32xf32>
    %18 = vector.shape_cast %17 : vector<64x32xf32> to vector<8x8x32xf32>
    %19 = vector.extract_strided_slice %14 {offsets = [0, 64], sizes = [64, 32], strides = [1, 1]} : vector<64x96xf32> to vector<64x32xf32>
    %20 = vector.shape_cast %19 : vector<64x32xf32> to vector<8x8x32xf32>
    %21 = vector.extract_strided_slice %16 {offsets = [0, 0, 0], sizes = [8, 8, 8], strides = [1, 1, 1]} : vector<8x8x32xf32> to vector<8x8x8xf32>
    %22 = vector.extract_strided_slice %18 {offsets = [0, 0, 0], sizes = [8, 8, 8], strides = [1, 1, 1]} : vector<8x8x32xf32> to vector<8x8x8xf32>
    %23 = vector.extract_strided_slice %20 {offsets = [0, 0, 0], sizes = [8, 8, 8], strides = [1, 1, 1]} : vector<8x8x32xf32> to vector<8x8x8xf32>
    "tpu.trace_start"() <{level = 10 : i32, message = "bqd,bkd->bqk"}> : () -> ()
    %cst_8 = arith.constant dense<0.000000e+00> : vector<8x8x8xf32>
    %24 = tpu.matmul %21, %22, %cst_8 {dimension_numbers = #tpu.dot_dimension_numbers<[2], [2], [1], [1], [0, 0, 0, 1, 1, 1], [0], [0]>} : vector<8x8x8xf32>, vector<8x8x8xf32>, vector<8x8x8xf32> -> vector<8x8x8xf32>
    "tpu.trace_stop"() : () -> ()
    %cst_9 = arith.constant 0.353553385 : f32
    %25 = vector.broadcast %cst_9 : f32 to vector<8x8x8xf32>
    %26 = arith.mulf %24, %25 : vector<8x8x8xf32>
    %cst_10 = arith.constant dense<0xFF800000> : vector<8x8xf32>
    %27 = vector.multi_reduction <maximumf>, %26, %cst_10 [2] : vector<8x8x8xf32> to vector<8x8xf32>
    %28 = vector.shape_cast %27 : vector<8x8xf32> to vector<8x8x1xf32>
    %29 = vector.broadcast %28 : vector<8x8x1xf32> to vector<8x8x8xf32>
    %30 = arith.subf %26, %29 : vector<8x8x8xf32>
    %31 = math.exp %30 : vector<8x8x8xf32>
    %cst_11 = arith.constant dense<0.000000e+00> : vector<8x8xf32>
    %32 = vector.multi_reduction <add>, %31, %cst_11 [2] : vector<8x8x8xf32> to vector<8x8xf32>
    %33 = vector.shape_cast %32 : vector<8x8xf32> to vector<8x8x1xf32>
    %34 = tpu.reciprocal %33 {approx = true} : vector<8x8x1xf32> -> vector<8x8x1xf32>
    %35 = vector.broadcast %34 : vector<8x8x1xf32> to vector<8x8x8xf32>
    %36 = arith.mulf %31, %35 : vector<8x8x8xf32>
    "tpu.trace_start"() <{level = 10 : i32, message = "bqk,bkd->bqd"}> : () -> ()
    %cst_12 = arith.constant dense<0.000000e+00> : vector<8x8x8xf32>
    %37 = tpu.matmul %36, %23, %cst_12 {dimension_numbers = #tpu.dot_dimension_numbers<[2], [1], [1], [2], [0, 0, 0, 1, 1, 2], [0], [0]>} : vector<8x8x8xf32>, vector<8x8x8xf32>, vector<8x8x8xf32> -> vector<8x8x8xf32>
    "tpu.trace_stop"() : () -> ()
    %38 = vector.extract_strided_slice %16 {offsets = [0, 0, 8], sizes = [8, 8, 8], strides = [1, 1, 1]} : vector<8x8x32xf32> to vector<8x8x8xf32>
    %39 = vector.extract_strided_slice %18 {offsets = [0, 0, 8], sizes = [8, 8, 8], strides = [1, 1, 1]} : vector<8x8x32xf32> to vector<8x8x8xf32>
    %40 = vector.extract_strided_slice %20 {offsets = [0, 0, 8], sizes = [8, 8, 8], strides = [1, 1, 1]} : vector<8x8x32xf32> to vector<8x8x8xf32>
    "tpu.trace_start"() <{level = 10 : i32, message = "bqd,bkd->bqk"}> : () -> ()
    %cst_13 = arith.constant dense<0.000000e+00> : vector<8x8x8xf32>
    %41 = tpu.matmul %38, %39, %cst_13 {dimension_numbers = #tpu.dot_dimension_numbers<[2], [2], [1], [1], [0, 0, 0, 1, 1, 1], [0], [0]>} : vector<8x8x8xf32>, vector<8x8x8xf32>, vector<8x8x8xf32> -> vector<8x8x8xf32>
    "tpu.trace_stop"() : () -> ()
    %cst_14 = arith.constant 0.353553385 : f32
    %42 = vector.broadcast %cst_14 : f32 to vector<8x8x8xf32>
    %43 = arith.mulf %41, %42 : vector<8x8x8xf32>
    %cst_15 = arith.constant dense<0xFF800000> : vector<8x8xf32>
    %44 = vector.multi_reduction <maximumf>, %43, %cst_15 [2] : vector<8x8x8xf32> to vector<8x8xf32>
    %45 = vector.shape_cast %44 : vector<8x8xf32> to vector<8x8x1xf32>
    %46 = vector.broadcast %45 : vector<8x8x1xf32> to vector<8x8x8xf32>
    %47 = arith.subf %43, %46 : vector<8x8x8xf32>
    %48 = math.exp %47 : vector<8x8x8xf32>
    %cst_16 = arith.constant dense<0.000000e+00> : vector<8x8xf32>
    %49 = vector.multi_reduction <add>, %48, %cst_16 [2] : vector<8x8x8xf32> to vector<8x8xf32>
    %50 = vector.shape_cast %49 : vector<8x8xf32> to vector<8x8x1xf32>
    %51 = tpu.reciprocal %50 {approx = true} : vector<8x8x1xf32> -> vector<8x8x1xf32>
    %52 = vector.broadcast %51 : vector<8x8x1xf32> to vector<8x8x8xf32>
    %53 = arith.mulf %48, %52 : vector<8x8x8xf32>
    "tpu.trace_start"() <{level = 10 : i32, message = "bqk,bkd->bqd"}> : () -> ()
    %cst_17 = arith.constant dense<0.000000e+00> : vector<8x8x8xf32>
    %54 = tpu.matmul %53, %40, %cst_17 {dimension_numbers = #tpu.dot_dimension_numbers<[2], [1], [1], [2], [0, 0, 0, 1, 1, 2], [0], [0]>} : vector<8x8x8xf32>, vector<8x8x8xf32>, vector<8x8x8xf32> -> vector<8x8x8xf32>
    "tpu.trace_stop"() : () -> ()
    %55 = vector.extract_strided_slice %16 {offsets = [0, 0, 16], sizes = [8, 8, 8], strides = [1, 1, 1]} : vector<8x8x32xf32> to vector<8x8x8xf32>
    %56 = vector.extract_strided_slice %18 {offsets = [0, 0, 16], sizes = [8, 8, 8], strides = [1, 1, 1]} : vector<8x8x32xf32> to vector<8x8x8xf32>
    %57 = vector.extract_strided_slice %20 {offsets = [0, 0, 16], sizes = [8, 8, 8], strides = [1, 1, 1]} : vector<8x8x32xf32> to vector<8x8x8xf32>
    "tpu.trace_start"() <{level = 10 : i32, message = "bqd,bkd->bqk"}> : () -> ()
    %cst_18 = arith.constant dense<0.000000e+00> : vector<8x8x8xf32>
    %58 = tpu.matmul %55, %56, %cst_18 {dimension_numbers = #tpu.dot_dimension_numbers<[2], [2], [1], [1], [0, 0, 0, 1, 1, 1], [0], [0]>} : vector<8x8x8xf32>, vector<8x8x8xf32>, vector<8x8x8xf32> -> vector<8x8x8xf32>
    "tpu.trace_stop"() : () -> ()
    %cst_19 = arith.constant 0.353553385 : f32
    %59 = vector.broadcast %cst_19 : f32 to vector<8x8x8xf32>
    %60 = arith.mulf %58, %59 : vector<8x8x8xf32>
    %cst_20 = arith.constant dense<0xFF800000> : vector<8x8xf32>
    %61 = vector.multi_reduction <maximumf>, %60, %cst_20 [2] : vector<8x8x8xf32> to vector<8x8xf32>
    %62 = vector.shape_cast %61 : vector<8x8xf32> to vector<8x8x1xf32>
    %63 = vector.broadcast %62 : vector<8x8x1xf32> to vector<8x8x8xf32>
    %64 = arith.subf %60, %63 : vector<8x8x8xf32>
    %65 = math.exp %64 : vector<8x8x8xf32>
    %cst_21 = arith.constant dense<0.000000e+00> : vector<8x8xf32>
    %66 = vector.multi_reduction <add>, %65, %cst_21 [2] : vector<8x8x8xf32> to vector<8x8xf32>
    %67 = vector.shape_cast %66 : vector<8x8xf32> to vector<8x8x1xf32>
    %68 = tpu.reciprocal %67 {approx = true} : vector<8x8x1xf32> -> vector<8x8x1xf32>
    %69 = vector.broadcast %68 : vector<8x8x1xf32> to vector<8x8x8xf32>
    %70 = arith.mulf %65, %69 : vector<8x8x8xf32>
    "tpu.trace_start"() <{level = 10 : i32, message = "bqk,bkd->bqd"}> : () -> ()
    %cst_22 = arith.constant dense<0.000000e+00> : vector<8x8x8xf32>
    %71 = tpu.matmul %70, %57, %cst_22 {dimension_numbers = #tpu.dot_dimension_numbers<[2], [1], [1], [2], [0, 0, 0, 1, 1, 2], [0], [0]>} : vector<8x8x8xf32>, vector<8x8x8xf32>, vector<8x8x8xf32> -> vector<8x8x8xf32>
    "tpu.trace_stop"() : () -> ()
    %72 = vector.extract_strided_slice %16 {offsets = [0, 0, 24], sizes = [8, 8, 8], strides = [1, 1, 1]} : vector<8x8x32xf32> to vector<8x8x8xf32>
    %73 = vector.extract_strided_slice %18 {offsets = [0, 0, 24], sizes = [8, 8, 8], strides = [1, 1, 1]} : vector<8x8x32xf32> to vector<8x8x8xf32>
    %74 = vector.extract_strided_slice %20 {offsets = [0, 0, 24], sizes = [8, 8, 8], strides = [1, 1, 1]} : vector<8x8x32xf32> to vector<8x8x8xf32>
    "tpu.trace_start"() <{level = 10 : i32, message = "bqd,bkd->bqk"}> : () -> ()
    %cst_23 = arith.constant dense<0.000000e+00> : vector<8x8x8xf32>
    %75 = tpu.matmul %72, %73, %cst_23 {dimension_numbers = #tpu.dot_dimension_numbers<[2], [2], [1], [1], [0, 0, 0, 1, 1, 1], [0], [0]>} : vector<8x8x8xf32>, vector<8x8x8xf32>, vector<8x8x8xf32> -> vector<8x8x8xf32>
    "tpu.trace_stop"() : () -> ()
    %cst_24 = arith.constant 0.353553385 : f32
    %76 = vector.broadcast %cst_24 : f32 to vector<8x8x8xf32>
    %77 = arith.mulf %75, %76 : vector<8x8x8xf32>
    %cst_25 = arith.constant dense<0xFF800000> : vector<8x8xf32>
    %78 = vector.multi_reduction <maximumf>, %77, %cst_25 [2] : vector<8x8x8xf32> to vector<8x8xf32>
    %79 = vector.shape_cast %78 : vector<8x8xf32> to vector<8x8x1xf32>
    %80 = vector.broadcast %79 : vector<8x8x1xf32> to vector<8x8x8xf32>
    %81 = arith.subf %77, %80 : vector<8x8x8xf32>
    %82 = math.exp %81 : vector<8x8x8xf32>
    %cst_26 = arith.constant dense<0.000000e+00> : vector<8x8xf32>
    %83 = vector.multi_reduction <add>, %82, %cst_26 [2] : vector<8x8x8xf32> to vector<8x8xf32>
    %84 = vector.shape_cast %83 : vector<8x8xf32> to vector<8x8x1xf32>
    %85 = tpu.reciprocal %84 {approx = true} : vector<8x8x1xf32> -> vector<8x8x1xf32>
    %86 = vector.broadcast %85 : vector<8x8x1xf32> to vector<8x8x8xf32>
    %87 = arith.mulf %82, %86 : vector<8x8x8xf32>
    "tpu.trace_start"() <{level = 10 : i32, message = "bqk,bkd->bqd"}> : () -> ()
    %cst_27 = arith.constant dense<0.000000e+00> : vector<8x8x8xf32>
    %88 = tpu.matmul %87, %74, %cst_27 {dimension_numbers = #tpu.dot_dimension_numbers<[2], [1], [1], [2], [0, 0, 0, 1, 1, 2], [0], [0]>} : vector<8x8x8xf32>, vector<8x8x8xf32>, vector<8x8x8xf32> -> vector<8x8x8xf32>
    "tpu.trace_stop"() : () -> ()
    %89 = tpu.concatenate %37, %54, %71, %88 in 2 : vector<8x8x8xf32>, vector<8x8x8xf32>, vector<8x8x8xf32>, vector<8x8x8xf32> -> vector<8x8x32xf32>
    %90 = vector.shape_cast %89 : vector<8x8x32xf32> to vector<64x32xf32>
    %91 = arith.truncf %90 : vector<64x32xf32> to vector<64x32xbf16>
    %c0_28 = arith.constant 0 : index
    %c0_29 = arith.constant 0 : index
    %92 = vector.load %arg4[%c0_28, %c0_29] : memref<32x32xbf16, #tpu.memory_space<vmem>>, vector<32x32xbf16>
    %cst_30 = arith.constant dense<0.000000e+00> : vector<64x32xf32>
    %93 = tpu.matmul %91, %92, %cst_30 {dimension_numbers = #tpu.dot_dimension_numbers<[1], [0], [0], [1], [0, 0, 1, 1], [], []>} : vector<64x32xbf16>, vector<32x32xbf16>, vector<64x32xf32> -> vector<64x32xf32>
    %94 = vector.broadcast %4 : vector<1x32xf32> to vector<64x32xf32>
    %95 = arith.addf %93, %94 : vector<64x32xf32>
    %96 = arith.addf %1, %95 : vector<64x32xf32>
    %cst_31 = arith.constant dense<0.000000e+00> : vector<64xf32>
    %97 = vector.multi_reduction <add>, %96, %cst_31 [1] : vector<64x32xf32> to vector<64xf32>
    %98 = vector.shape_cast %97 : vector<64xf32> to vector<64x1xf32>
    %cst_32 = arith.constant 3.200000e+01 : f32
    %99 = vector.broadcast %cst_32 : f32 to vector<64x1xf32>
    %100 = arith.divf %98, %99 : vector<64x1xf32>
    %101 = vector.broadcast %100 : vector<64x1xf32> to vector<64x32xf32>
    %102 = arith.subf %96, %101 : vector<64x32xf32>
    %103 = arith.mulf %102, %102 : vector<64x32xf32>
    %cst_33 = arith.constant dense<0.000000e+00> : vector<64xf32>
    %104 = vector.multi_reduction <add>, %103, %cst_33 [1] : vector<64x32xf32> to vector<64xf32>
    %105 = vector.shape_cast %104 : vector<64xf32> to vector<64x1xf32>
    %cst_34 = arith.constant 3.200000e+01 : f32
    %106 = vector.broadcast %cst_34 : f32 to vector<64x1xf32>
    %107 = arith.divf %105, %106 : vector<64x1xf32>
    %108 = vector.broadcast %100 : vector<64x1xf32> to vector<64x32xf32>
    %109 = arith.subf %96, %108 : vector<64x32xf32>
    %cst_35 = arith.constant 9.99999974E-6 : f32
    %110 = vector.broadcast %cst_35 : f32 to vector<64x1xf32>
    %111 = arith.addf %107, %110 : vector<64x1xf32>
    %112 = math.rsqrt %111 : vector<64x1xf32>
    %113 = vector.broadcast %112 : vector<64x1xf32> to vector<64x32xf32>
    %114 = arith.mulf %109, %113 : vector<64x32xf32>
    %115 = vector.broadcast %5 : vector<1x32xf32> to vector<64x32xf32>
    %116 = arith.mulf %114, %115 : vector<64x32xf32>
    %117 = vector.broadcast %6 : vector<1x32xf32> to vector<64x32xf32>
    %118 = arith.addf %116, %117 : vector<64x32xf32>
    %119 = arith.truncf %118 : vector<64x32xf32> to vector<64x32xbf16>
    %c0_36 = arith.constant 0 : index
    %c0_37 = arith.constant 0 : index
    %120 = vector.load %arg6[%c0_36, %c0_37] : memref<32x128xbf16, #tpu.memory_space<vmem>>, vector<32x128xbf16>
    %cst_38 = arith.constant dense<0.000000e+00> : vector<64x128xf32>
    %121 = tpu.matmul %119, %120, %cst_38 {dimension_numbers = #tpu.dot_dimension_numbers<[1], [0], [0], [1], [0, 0, 1, 1], [], []>} : vector<64x32xbf16>, vector<32x128xbf16>, vector<64x128xf32> -> vector<64x128xf32>
    %c0_39 = arith.constant 0 : index
    %c0_40 = arith.constant 0 : index
    %122 = vector.load %arg7[%c0_39, %c0_40] : memref<1x128xf32, #tpu.memory_space<vmem>>, vector<1x128xf32>
    %123 = vector.broadcast %122 : vector<1x128xf32> to vector<64x128xf32>
    %124 = arith.addf %121, %123 : vector<64x128xf32>
    %125 = arith.mulf %124, %124 : vector<64x128xf32>
    %126 = arith.mulf %124, %125 : vector<64x128xf32>
    %cst_41 = arith.constant 4.471500e-02 : f32
    %127 = vector.broadcast %cst_41 : f32 to vector<64x128xf32>
    %128 = arith.mulf %127, %126 : vector<64x128xf32>
    %129 = arith.addf %124, %128 : vector<64x128xf32>
    %cst_42 = arith.constant 0.797884583 : f32
    %130 = vector.broadcast %cst_42 : f32 to vector<64x128xf32>
    %131 = arith.mulf %130, %129 : vector<64x128xf32>
    %132 = math.tanh %131 : vector<64x128xf32>
    %cst_43 = arith.constant 1.000000e+00 : f32
    %133 = vector.broadcast %cst_43 : f32 to vector<64x128xf32>
    %134 = arith.addf %133, %132 : vector<64x128xf32>
    %cst_44 = arith.constant 5.000000e-01 : f32
    %135 = vector.broadcast %cst_44 : f32 to vector<64x128xf32>
    %136 = arith.mulf %135, %134 : vector<64x128xf32>
    %137 = arith.mulf %124, %136 : vector<64x128xf32>
    %138 = arith.truncf %137 : vector<64x128xf32> to vector<64x128xbf16>
    %c0_45 = arith.constant 0 : index
    %c0_46 = arith.constant 0 : index
    %139 = vector.load %arg8[%c0_45, %c0_46] : memref<128x32xbf16, #tpu.memory_space<vmem>>, vector<128x32xbf16>
    %cst_47 = arith.constant dense<0.000000e+00> : vector<64x32xf32>
    %140 = tpu.matmul %138, %139, %cst_47 {dimension_numbers = #tpu.dot_dimension_numbers<[1], [0], [0], [1], [0, 0, 1, 1], [], []>} : vector<64x128xbf16>, vector<128x32xbf16>, vector<64x32xf32> -> vector<64x32xf32>
    %141 = vector.broadcast %7 : vector<1x32xf32> to vector<64x32xf32>
    %142 = arith.addf %140, %141 : vector<64x32xf32>
    %143 = arith.addf %118, %142 : vector<64x32xf32>
    %cst_48 = arith.constant dense<0.000000e+00> : vector<64xf32>
    %144 = vector.multi_reduction <add>, %143, %cst_48 [1] : vector<64x32xf32> to vector<64xf32>
    %145 = vector.shape_cast %144 : vector<64xf32> to vector<64x1xf32>
    %cst_49 = arith.constant 3.200000e+01 : f32
    %146 = vector.broadcast %cst_49 : f32 to vector<64x1xf32>
    %147 = arith.divf %145, %146 : vector<64x1xf32>
    %148 = vector.broadcast %147 : vector<64x1xf32> to vector<64x32xf32>
    %149 = arith.subf %143, %148 : vector<64x32xf32>
    %150 = arith.mulf %149, %149 : vector<64x32xf32>
    %cst_50 = arith.constant dense<0.000000e+00> : vector<64xf32>
    %151 = vector.multi_reduction <add>, %150, %cst_50 [1] : vector<64x32xf32> to vector<64xf32>
    %152 = vector.shape_cast %151 : vector<64xf32> to vector<64x1xf32>
    %cst_51 = arith.constant 3.200000e+01 : f32
    %153 = vector.broadcast %cst_51 : f32 to vector<64x1xf32>
    %154 = arith.divf %152, %153 : vector<64x1xf32>
    %155 = vector.broadcast %147 : vector<64x1xf32> to vector<64x32xf32>
    %156 = arith.subf %143, %155 : vector<64x32xf32>
    %cst_52 = arith.constant 9.99999974E-6 : f32
    %157 = vector.broadcast %cst_52 : f32 to vector<64x1xf32>
    %158 = arith.addf %154, %157 : vector<64x1xf32>
    %159 = math.rsqrt %158 : vector<64x1xf32>
    %160 = vector.broadcast %159 : vector<64x1xf32> to vector<64x32xf32>
    %161 = arith.mulf %156, %160 : vector<64x32xf32>
    %162 = vector.broadcast %8 : vector<1x32xf32> to vector<64x32xf32>
    %163 = arith.mulf %161, %162 : vector<64x32xf32>
    %164 = vector.broadcast %9 : vector<1x32xf32> to vector<64x32xf32>
    %165 = arith.addf %163, %164 : vector<64x32xf32>
    %166 = vector.shape_cast %165 : vector<64x32xf32> to vector<8x8x32xf32>
    %cst_53 = arith.constant dense<0.000000e+00> : vector<8x32xf32>
    %167 = vector.multi_reduction <add>, %166, %cst_53 [1] : vector<8x8x32xf32> to vector<8x32xf32>
    %cst_54 = arith.constant 1.250000e-01 : f32
    %168 = vector.broadcast %cst_54 : f32 to vector<8x32xf32>
    %169 = arith.mulf %167, %168 : vector<8x32xf32>
    %170 = arith.truncf %169 : vector<8x32xf32> to vector<8x32xbf16>
    %c0_55 = arith.constant 0 : index
    %c0_56 = arith.constant 0 : index
    %171 = vector.load %arg9[%c0_55, %c0_56] : memref<32x128xbf16, #tpu.memory_space<vmem>>, vector<32x128xbf16>
    %cst_57 = arith.constant dense<0.000000e+00> : vector<8x128xf32>
    %172 = tpu.matmul %170, %171, %cst_57 {dimension_numbers = #tpu.dot_dimension_numbers<[1], [0], [0], [1], [0, 0, 1, 1], [], []>} : vector<8x32xbf16>, vector<32x128xbf16>, vector<8x128xf32> -> vector<8x128xf32>
    %c0_58 = arith.constant 0 : index
    %c0_59 = arith.constant 0 : index
    %173 = vector.load %arg10[%c0_58, %c0_59] : memref<1x128xf32, #tpu.memory_space<vmem>>, vector<1x128xf32>
    %174 = vector.broadcast %173 : vector<1x128xf32> to vector<8x128xf32>
    %175 = arith.addf %172, %174 : vector<8x128xf32>
    %c0_60 = arith.constant 0 : index
    %c0_61 = arith.constant 0 : index
    %176 = vector.load %arg11[%c0_60, %c0_61] : memref<8x128xf32, #tpu.memory_space<vmem>>, vector<8x128xf32>
    tpu.vector_store %arg11[%c0_60, %c0_61], %175 {strides = array<i32>} : memref<8x128xf32, #tpu.memory_space<vmem>>, vector<8x128xf32>,
    return
  }
  func.func @transform_0(%arg0: i32) -> (i32, i32, i32) {
    %c0_i32 = arith.constant 0 : i32
    %c0_i32_0 = arith.constant 0 : i32
    %c0_i32_1 = arith.constant 0 : i32
    return %arg0, %c0_i32, %c0_i32_0 : i32, i32, i32
  }
  func.func @transform_1(%arg0: i32) -> (i32, i32) {
    %c0_i32 = arith.constant 0 : i32
    %c0_i32_0 = arith.constant 0 : i32
    %c0_i32_1 = arith.constant 0 : i32
    return %c0_i32, %c0_i32_0 : i32, i32
  }
  func.func @transform_2(%arg0: i32) -> (i32, i32) {
    %c0_i32 = arith.constant 0 : i32
    %c0_i32_0 = arith.constant 0 : i32
    %c0_i32_1 = arith.constant 0 : i32
    return %c0_i32, %c0_i32_0 : i32, i32
  }
  func.func @transform_3(%arg0: i32) -> (i32, i32) {
    %c0_i32 = arith.constant 0 : i32
    %c0_i32_0 = arith.constant 0 : i32
    %c0_i32_1 = arith.constant 0 : i32
    return %c0_i32, %c0_i32_0 : i32, i32
  }
  func.func @transform_4(%arg0: i32) -> (i32, i32) {
    %c0_i32 = arith.constant 0 : i32
    %c0_i32_0 = arith.constant 0 : i32
    %c0_i32_1 = arith.constant 0 : i32
    return %c0_i32, %c0_i32_0 : i32, i32
  }
  func.func @transform_5(%arg0: i32) -> (i32, i32) {
    %c0_i32 = arith.constant 0 : i32
    %c0_i32_0 = arith.constant 0 : i32
    %c0_i32_1 = arith.constant 0 : i32
    return %c0_i32, %c0_i32_0 : i32, i32
  }
  func.func @transform_6(%arg0: i32) -> (i32, i32) {
    %c0_i32 = arith.constant 0 : i32
    %c0_i32_0 = arith.constant 0 : i32
    %c0_i32_1 = arith.constant 0 : i32
    return %c0_i32, %c0_i32_0 : i32, i32
  }
  func.func @transform_7(%arg0: i32) -> (i32, i32) {
    %c0_i32 = arith.constant 0 : i32
    %c0_i32_0 = arith.constant 0 : i32
    %c0_i32_1 = arith.constant 0 : i32
    return %c0_i32, %c0_i32_0 : i32, i32
  }
  func.func @transform_8(%arg0: i32) -> (i32, i32) {
    %c0_i32 = arith.constant 0 : i32
    %c0_i32_0 = arith.constant 0 : i32
    %c0_i32_1 = arith.constant 0 : i32
    return %c0_i32, %c0_i32_0 : i32, i32
  }
  func.func @transform_9(%arg0: i32) -> (i32, i32) {
    %c0_i32 = arith.constant 0 : i32
    %c0_i32_0 = arith.constant 0 : i32
    %c0_i32_1 = arith.constant 0 : i32
    return %c0_i32, %c0_i32_0 : i32, i32
  }
  func.func @transform_10(%arg0: i32) -> (i32, i32) {
    %c0_i32 = arith.constant 0 : i32
    %c0_i32_0 = arith.constant 0 : i32
    return %arg0, %c0_i32 : i32, i32
  }
}

</mosaic_0001>

<bundles_post_ra>
// kernel: tpu_custom_call.1
= control target key start
LH: loop header
LB: loop body
LE: loop exit
PB: predicated region body
PF: predicated region fallthrough
CT: control target
= control target key end

     0   :  { %15 = vsyncpa [#allocation3], 0  ;;  %s9355_s0 = inlined_call_operand.hbm [shape: f32[16,8,32], index: 0, kind: input, shape index: {}]   ;;  %s9356_s1 = inlined_call_operand.vmem [shape: bf16[32,96], index: 1, kind: input, shape index: {}]   ;;  %s9357_s2 = inlined_call_operand.vmem [shape: f32[1,96], index: 2, kind: input, shape index: {}]   ;;  %s9358_s3 = inlined_call_operand.vmem [shape: bf16[32,32], index: 3, kind: input, shape index: {}]   ;;  %s9359_s4 = inlined_call_operand.vmem [shape: f32[6,32], index: 4, kind: input, shape index: {}]   ;;  %s9360_s5 = inlined_call_operand.vmem [shape: bf16[32,128], index: 5, kind: input, shape index: {}]   ;;  %s9361_s6 = inlined_call_operand.vmem [shape: f32[1,128], index: 6, kind: input, shape index: {}]   ;;  %s9362_s7 = inlined_call_operand.vmem [shape: bf16[128,32], index: 7, kind: input, shape index: {}]   ;;  %s9363_s8 = inlined_call_operand.vmem [shape: bf16[32,128], index: 8, kind: input, shape index: {}]   ;;  %s9364_s9 = inlined_call_operand.vmem [shape: f32[1,128], index: 9, kind: input, shape index: {}]   ;;  %s9365_s10 = inlined_call_operand.hbm [shape: f32[16,128], index: 10, kind: output, shape index: {}]  }
   0x1   :  { %17 = vsyncpa [#allocation3 + $0x1], 0 }
   0x2   :  { %18 = vsyncpa [#allocation4], 0 }
   0x3   :  { %20 = vsyncpa [#allocation4 + $0x1], 0  ;;  %s8046_s13 = smov 0   ;;  %s8048_s14 = smov 0  }
   0x4   :  { %s8050_s15 = smov 0   ;;  %s8052_s16 = smov 0  }
   0x5 LB: > { %9371 = sst [smem:[#allocation8_spill]] %s7965_s15  ;;  %s8067_s17 = sadd.s32 4294967295, %s7969_s16   ;;  %s7969_s16 = sphi %s8052_s16, %s9383_s16   ;;  %s7965_s15 = sphi %s8050_s15, %s9385_s15   ;;  %s7961_s14 = sphi %s8048_s14, %s9387_s14   ;;  %s7957_s13 = sphi %s8046_s13, %s9386_s13  }
   0x6   : > { %s6862_s18 = sadd.s32 4294967294, %s7969_s16   ;;  %s8071_s19 = sadd.s32 1, %s7969_s16  }
   0x7   : > { %9372 = sst [smem:[#allocation9_spill]] %s8071_s19  ;;  %s33_s20 = sadd.s32 1, %s7965_s15 }
   0x8   : > { %s30_s21 = ssub.s32 %s7969_s16, %s8071_s19  ;;  %p40_p0 = scmp.ne.s32.totalorder %s7965_s15, %s7961_s14 }
   0x9   : > { %p31_p1 = scmp.eq.s32.totalorder %s30_s21, 0  ;;  %p41_p2 = scmp.eq.s32.totalorder %s7969_s16, 0 }
   0xa   : > { %p46_p3 = scmp.ne.s32.totalorder %s7961_s14, %s7957_s13  ;;  %p47_p4 = scmp.eq.s32.totalorder %s8067_s17, 0 }
   0xb   : > { %s8083_s22 = scalar_select %p31_p1, %s7965_s15, %s33_s20  }
   0xc   : > { %p8085_p5 = por %p41_p2, %p40_p0  ;;  %p8089_p6 = por %p47_p4, %p46_p3 }
   0xd   : > { %9373 = sst [smem:[#allocation10_spill]] %s8083_s22  ;;  %p259_p7 = scmp.eq.s32.totalorder %s8067_s17, 1 }
   0xe   : > { %s9375_s24 = scalar_select %p8089_p6, 1, 0 }
   0xf   : > { %p265_p8 = scmp.eq.s32.totalorder %s6862_s18, 1  ;;  %p7565_p10 = scmp.lt.s32.totalorder %s7969_s16, 2 }
  0x10   : > { %p8096_p11 = por %p259_p7, %p40_p0  ;;  %s312_s27 = sand.u32 1, %s7965_s15  }
  0x11   : > { %p8100_p12 = por %p265_p8, %p46_p3  ;;  %s7003_s28 = sshll.u32 %s7969_s16, 10 }
  0x12   : > { %s9376_s25 = scalar_select %p8096_p11, 1, 0 }
  0x13   : > { %s9377_s26 = scalar_select %p8100_p12, 1, 0 }
  0x14   : > { %s6865_s29 = sshll.u32 %s312_s27, 6  ;;  %s8109_s12 = scalar_lea.hbm %s9355_s0, %s7003_s28 }
  0x15   : > { %s316_s18 = scalar_lea.vmem [#allocation2], %s6865_s29  ;;  %p8113_p13 = pnand %p7565_p10, %p8085_p5 }
  0x16   : > { %s323_s20 = sshll.u32 %s316_s18, 4  ;;  %s8119_s22 = scalar_lea.sflag [#allocation3], %s312_s27  ;;  %s8117_s20 = int_to_ptr.vmem [resolvable:$true] %s323_s20 }
  0x17   : > { %s7877_s15 = scalar_lea.hbm %s8109_s12, 1024  ;;  %p7879_p1 = pneg %p8113_p13 }
  0x18   : > { %p7878_p0 = scmp.ne.s32.totalorder %s8109_s12, %s7877_s15  ;;  %s7882_s29 = scalar_lea.hbm %s9355_s0, 2048 }
  0x19   : > { %p7883_p4 = scmp.lt.s32.totalorder %s8109_s12, %s9355_s0  ;;  %p7884_p5 = scmp.lt.s32.totalorder %s7882_s29, %s7877_s15 }
  0x1a   : > { %p7880_p2 = pnand %p7879_p1, %p7878_p0 }
  0x1b   : > { %p7885_p7 = por %p7884_p5, %p7883_p4 }
  0x1c   : > { %p7881_p3 = pneg %p7880_p2 }
  0x1e   : > { %p7886_p8 = pnand %p7885_p7, %p7881_p3 }
  0x20   : > { %7889 = shalt.err (!%p7886_p8)
}
  0x21   : > { %s7890_s27 = scalar_lea.vmem %s8117_s20, 1024  ;;  %s7971_s18 = smov [#allocation2]  }
  0x22   : > { %p7891_p10 = scmp.ne.s32.totalorder %s8117_s20, %s7890_s27  ;;  %s7895_s19 = sshll.u32 %s7971_s18, 4  ;;  %s7896_s19 = int_to_ptr.vmem [resolvable:$false] %s7895_s19 }
  0x23   : > { %s7897_s28 = scalar_lea.vmem %s7896_s19, 2048  ;;  %p7898_p2 = scmp.lt.s32.totalorder %s8117_s20, %s7896_s19 }
  0x24   : > { %p7893_p9 = pnand %p7891_p10, %p7879_p1  ;;  %p7899_p12 = scmp.lt.s32.totalorder %s7897_s28, %s7890_s27 }
  0x26   : > { %p7894_p0 = pneg %p7893_p9  ;;  %p7900_p11 = por %p7899_p12, %p7898_p2 }
  0x28   : > { %p7901_p6 = pnand %p7900_p11, %p7894_p0 }
  0x2a   : > { %7904 = shalt.err (!%p7901_p6)
}
  0x2b   : > { %s7972_s15 = smov 128   ;;  %s7973_s30 = smov 8  }
  0x2c   : > { %7560 = dma.hbm_to_vmem [thread:$0]  (!%p8113_p13), %s8109_s12, 1024, %s8117_s20, %s8119_s22, %s7972_s15, %s7972_s15, %s7973_s30  }
  0x2d   : > { %p6868_p9 = scmp.ge.s32.totalorder %s7969_s16, 1  ;;  %p331_p1 = scmp.lt.s32.totalorder %s7969_s16, 3 }
  0x2f   : > { %p332_p3 = pnand %p6868_p9, %p331_p1 }
  0x30   : > { %s8143_s19 = sand.u32 (!%p332_p3), 1, %s7961_s14   ;;  %p9379_p6 = scmp.ne.s32.totalorder (!%p332_p3), %s9375_s24, 0 }
  0x31   : > { %335 = sbr.rel (%p332_p3) target bundleno = 4339 (0x10f3), region = 60  ;;  %s6869_s29 = sshll.u32 (!%p332_p3), %s8143_s19, 6 }
  0x32   : > { %s338_s23 = scalar_lea.sflag (!%p332_p3), [#allocation3], %s8143_s19  ;;  %s8147_s11 = scalar_lea.vmem (!%p332_p3), [#allocation2], %s6869_s29 }
  0x36   : > { %7948 = dma.done.wait (%p9379_p6), %s338_s23, 1024  }
  0x37   : > { %7950 = vsyncadd (%p9379_p6), %s338_s23, 4294966272  ;;  %v7677_v0 = vld [vmem:[%s9356_s1 + $0x8] sm:$0xff]   ;;  %v7678_v1 = vld [vmem:[%s9356_s1] sm:$0xff]   ;;  %vm416_vm0 = vcmask 261120   ;;  %v7974_v14 = vmov 0.0   ;;  %vm7975_vm1 = vmmov 0  }
  0x38   : > { %7165 = vmatprep.subr.bf16.mxu0 %v7677_v0  ;;  %v380_v2 = vld [vmem:[%s8147_s11] sm:$0xff]  ;;  %v381_v3 = vld [vmem:[%s8147_s11 + $0x8] sm:$0xff]  ;;  %v382_v5 = vld [vmem:[%s8147_s11 + $0x10] sm:$0xff]  ;;  %7187 = vmatprep.subr.mxu1 %v7974_v14  ;;  %s7976_s18 = smov 96   ;;  %s7977_s28 = smov 64   ;;  %vm497_vm2 = vcmask 64512  }
  0x39   : > { %7166 = vmatpush3.bf16.msra.mxu0 %v7677_v0  ;;  %v388_v4 = vpack.c.bf16 %v381_v3, %v380_v2  ;;  %v383_v6 = vld [vmem:[%s8147_s11 + $0x18] sm:$0xff]  ;;  %v384_v7 = vld [vmem:[%s8147_s11 + $0x20] sm:$0xff]  ;;  %v385_v8 = vld [vmem:[%s8147_s11 + $0x28] sm:$0xff]  ;;  %7189 = vmatprep.mubr.msk.f32.mxu1 %vm7975_vm1, %v7974_v14  ;;  %s7978_s15 = smov 88   ;;  %s7979_s30 = smov 120   ;;  %vm5903_vm3 = vcmask 130048  }
  0x3a   : > { %7167 = vmatprep.subr.bf16.mxu0 %v7678_v1  ;;  %v389_v9 = vpack.c.bf16 %v383_v6, %v382_v5  ;;  %v390_v10 = vpack.c.bf16 %v385_v8, %v384_v7  ;;  %v386_v11 = vld [vmem:[%s8147_s11 + $0x30] sm:$0xff]  ;;  %v387_v12 = vld [vmem:[%s8147_s11 + $0x38] sm:$0xff]  ;;  %v6871_v15 = vld [vmem:[%s9357_s2] ss:$0 sm:$0xff]  ;;  %s7980_s29 = smov 56   ;;  %s7981_s23 = smov 80  }
  0x3b   : > { %7169 = vmatprep.mubr.msk.bf16.mxu0 %vm416_vm0, %v388_v4  ;;  %v391_v13 = vpack.c.bf16 %v387_v12, %v386_v11  ;;  %s7982_s22 = smov 112   ;;  %s7983_s12 = smov 48   ;;  %vm5912_vm4 = vcmask 195584   ;;  %vm6707_vm5 = vcmask 1041409   ;;  %vm6709_vm6 = vcmask 1042434  }
  0x3c   : > { %s7984_s20 = smov 72   ;;  %s7985_s21 = smov 104   ;;  %vm6711_vm7 = vcmask 1043459   ;;  %vm6713_vm8 = vcmask 1044484   ;;  %vm6715_vm9 = vcmask 1045509   ;;  %vm6717_vm10 = vcmask 1046534  }
  0x3d   : > { %7168 = vmatpush3.bf16.msra.mxu0 %v7678_v1  ;;  %s7986_s24 = smov 40   ;;  %s7987_s27 = smov 8   ;;  %vm6719_vm11 = vcmask 1047559  }
  0x3e   : > { %7177 = vmatprep.subr.mxu0 %v7974_v14  ;;  %p9380_p12 = scmp.ne.s32.totalorder %s9376_s25, 0 }
  0x40   : > { %7170 = vmatmul.mubr.msk.bf16.vlgmr.msra.gmra.mxu0 %vm416_vm0, %v389_v9 }
  0x41   : > { %7173 = vmatprep.mubr.msk.bf16.mxu0 %vm416_vm0, %v390_v10 }
  0x48   : > { %7174 = vmatmul.mubr.msk.bf16.gmra.mxu0 %vm416_vm0, %v391_v13 }
  0x49   : > { %7179 = vmatprep.mubr.msk.f32.mxu0 %vm7975_vm1, %v7974_v14 }
 0x100   : > { %v7171_v16 = vpop.f32.mrf.mxu0 }
 0x101   : > { %v8180_v17 = vadd.f32 %v7171_v16, %v6871_v15 }
 0x102   : > { %v463_v18 = vpop.f32.mrf.mxu0 }
 0x103   : > { %v8182_v19 = vadd.f32 %v6871_v15, %v463_v18  ;;  %650 = vrot.lane.b32.xlu1 %v8180_v17, %s7976_s18 }
 0x104   : > { %v7172_v20 = vpop.f32.mrf.mxu0 }
 0x105   : > { %v8185_v21 = vadd.f32 %v7172_v20, %v6871_v15  ;;  %495 = vrot.lane.b32.xlu0 %v8182_v19, %s7976_s18 }
 0x106   : > { %v466_v22 = vpop.f32.mrf.mxu0 }
 0x107   : > { %v8188_v23 = vadd.f32 %v6871_v15, %v466_v22  ;;  %727 = vrot.lane.b32.xlu1 %v8185_v21, %s7976_s18 }
 0x108   : > { %v7175_v24 = vpop.f32.mrf.mxu0 }
 0x109   : > { %573 = vrot.lane.b32.xlu0 %v8188_v23, %s7976_s18  ;;  %v8194_v28 = vadd.f32 %v7175_v24, %v6871_v15 }
 0x10a   : > { %v479_v25 = vpop.f32.mrf.mxu0 }
 0x10b   : > { %v8192_v26 = vadd.f32 %v6871_v15, %v479_v25 }
 0x10c   : > { %v7176_v27 = vpop.f32.mrf.mxu0 }
 0x10d   : > { %804 = vrot.lane.b32.xlu0 %v8192_v26, %s7976_s18  ;;  %v8199_v31 = vadd.f32 %v7176_v27, %v6871_v15 }
 0x10e   : > { %v482_v29 = vpop.f32.mrf.mxu0 }
 0x10f   : > { %v8197_v30 = vadd.f32 %v6871_v15, %v482_v29 }
 0x111   : > { %881 = vrot.lane.b32.xlu1 %v8197_v30, %s7976_s18  ;;  %958 = vrot.lane.b32.xlu0 %v8194_v28, %s7976_s18 }
 0x115   : > { %1035 = vrot.lane.b32.xlu1 %v8199_v31, %s7976_s18  ;;  %1283 = vrot.lane.b32.xlu0 %v8188_v23, %s7977_s28  ;;  %s7988_s18 = smov 16  }
 0x119   : > { %1207 = vrot.lane.b32.xlu1 %v8182_v19, %s7977_s28  ;;  %1511 = vrot.lane.b32.xlu0 %v8192_v26, %s7977_s28 }
 0x11d   : > { %1359 = vrot.lane.b32.xlu1 %v8180_v17, %s7977_s28  ;;  %1663 = vrot.lane.b32.xlu0 %v8194_v28, %s7977_s28 }
 0x121   : > { %1435 = vrot.lane.b32.xlu1 %v8185_v21, %s7977_s28  ;;  %1817 = vrot.lane.b32.xlu0 %v8182_v19, %s7978_s15 }
 0x125   : > { %1739 = vrot.lane.b32.xlu1 %v8199_v31, %s7977_s28 }
 0x129   : > { %1895 = vrot.lane.b32.xlu1 %v8188_v23, %s7978_s15 }
 0x12d   : > { %1587 = vrot.lane.b32.xlu1 %v8197_v30, %s7977_s28 }
 0x175   : > { %v651_v32 = vpop.permute.xlu1 %650 }
 0x176   : > { %7188 = vmatpush3.xpose.msk.msra.mxu1 %vm497_vm2, %v651_v32 }
 0x177   : > { %v496_v33 = vpop.permute.xlu0 %495  ;;  %7192 = vmatprep.subr.mxu1 %v7974_v14 }
 0x178   : > { %7178 = vmatpush3.xpose.msk.msra.mxu0 %vm497_vm2, %v496_v33 }
 0x179   : > { %7190 = vmatmul.mubr.msk.f32.vlgmr.msra.gmra.mxu1 %vm497_vm2, %v8180_v17  ;;  %v728_v34 = vpop.permute.xlu1 %727  ;;  %7182 = vmatprep.subr.mxu0 %v7974_v14 }
 0x17a   : > { %7193 = vmatpush3.xpose.msk.msra.mxu1 %vm497_vm2, %v728_v34  ;;  %7194 = vmatprep.mubr.msk.f32.mxu1 %vm7975_vm1, %v7974_v14 }
 0x17b   : > { %7180 = vmatmul.mubr.msk.f32.vlgmr.msra.gmra.mxu0 %vm497_vm2, %v8182_v19  ;;  %v574_v35 = vpop.permute.xlu0 %573  ;;  %7197 = vmatprep.subr.mxu1 %v7974_v14 }
 0x17c   : > { %7183 = vmatpush3.xpose.msk.msra.mxu0 %vm497_vm2, %v574_v35  ;;  %7184 = vmatprep.mubr.msk.f32.mxu0 %vm7975_vm1, %v7974_v14 }
 0x17d   : > { %7195 = vmatmul.mubr.msk.f32.vlgmr.msra.gmra.mxu1 %vm497_vm2, %v8185_v21  ;;  %7202 = vmatprep.subr.mxu0 %v7974_v14 }
 0x17e   : > { %7199 = vmatprep.mubr.msk.f32.mxu1 %vm7975_vm1, %v7974_v14 }
 0x17f   : > { %7185 = vmatmul.mubr.msk.f32.vlgmr.msra.gmra.mxu0 %vm497_vm2, %v8188_v23  ;;  %v805_v36 = vpop.permute.xlu0 %804 }
 0x180   : > { %7198 = vmatpush3.xpose.msk.msra.mxu1 %vm497_vm2, %v805_v36  ;;  %7204 = vmatprep.mubr.msk.f32.mxu0 %vm7975_vm1, %v7974_v14 }
 0x181   : > { %7207 = vmatprep.subr.mxu1 %v7974_v14 }
 0x183   : > { %v882_v37 = vpop.permute.xlu1 %881  ;;  %7200 = vmatmul.mubr.msk.f32.vlgmr.msra.gmra.mxu1 %vm497_vm2, %v8192_v26  ;;  %v959_v38 = vpop.permute.xlu0 %958 }
 0x184   : > { %7203 = vmatpush3.xpose.msk.msra.mxu0 %vm497_vm2, %v882_v37  ;;  %7208 = vmatpush3.xpose.msk.msra.mxu1 %vm497_vm2, %v959_v38 }
 0x185   : > { %7209 = vmatprep.mubr.msk.f32.mxu1 %vm7975_vm1, %v7974_v14  ;;  %7212 = vmatprep.subr.mxu0 %v7974_v14 }
 0x186   : > { %7217 = vmatprep.subr.mxu1 %v7974_v14 }
 0x187   : > { %v1036_v39 = vpop.permute.xlu1 %1035  ;;  %7205 = vmatmul.mubr.msk.f32.vlgmr.msra.gmra.mxu0 %vm497_vm2, %v8197_v30  ;;  %7210 = vmatmul.mubr.msk.f32.vlgmr.msra.gmra.mxu1 %vm497_vm2, %v8194_v28  ;;  %v1284_v40 = vpop.permute.xlu0 %1283 }
 0x188   : > { %7213 = vmatpush3.xpose.msk.msra.mxu0 %vm497_vm2, %v1036_v39  ;;  %7214 = vmatprep.mubr.msk.f32.mxu0 %vm7975_vm1, %v7974_v14 }
 0x189   : > { %7222 = vmatprep.subr.mxu0 %v7974_v14  ;;  %7219 = vmatprep.mubr.msk.f32.mxu1 %vm7975_vm1, %v7974_v14 }
 0x18b   : > { %v1208_v41 = vpop.permute.xlu1 %1207  ;;  %7215 = vmatmul.mubr.msk.f32.vlgmr.msra.gmra.mxu0 %vm497_vm2, %v8199_v31  ;;  %v8286_v11 = vpop.permute.xlu0 %1511 }
 0x18c   : > { %7218 = vmatpush3.msra.mxu1 %v1208_v41  ;;  %7223 = vmatpush3.msra.mxu0 %v1284_v40 }
 0x18d   : > { %7227 = vmatprep.subr.mxu1 %v7974_v14  ;;  %7224 = vmatprep.mubr.msk.f32.mxu0 %vm7975_vm1, %v7974_v14 }
 0x18e   : > { %7232 = vmatprep.subr.mxu0 %v7974_v14 }
 0x18f   : > { %v8284_v10 = vpop.permute.xlu1 %1359  ;;  %v8290_v13 = vpop.permute.xlu0 %1663 }
 0x193   : > { %v8288_v12 = vpop.permute.xlu1 %1435  ;;  %v8294_v16 = vpop.permute.xlu0 %1817 }
 0x197   : > { %v8292_v15 = vpop.permute.xlu1 %1739 }
 0x19b   : > { %v8296_v18 = vpop.permute.xlu1 %1895 }
 0x19f   : > { %v8298_v24 = vpop.permute.xlu1 %1587 }
 0x239   : > { %v722_v42 = vpop.f32.mrf.mxu1 }
 0x23a   : > { %v1113_v43 = vmul.f32 0.35355338, %v722_v42 }
 0x23b   : > { %v568_v44 = vpop.f32.mrf.mxu0  ;;  %v7191_v45 = vpop.f32.mrf.mxu1 }
 0x23c   : > { %v1111_v46 = vmul.f32 0.35355338, %v568_v44  ;;  %v1125_v47 = vsel %vm497_vm2, %v1113_v43, -inf }
 0x23d   : > { %v799_v48 = vpop.f32.mrf.mxu1  ;;  %1126 = vmax.xlane.f32.xlu0 %v1125_v47  ;;  %v7181_v49 = vpop.f32.mrf.mxu0 }
 0x23e   : > { %v1114_v52 = vmul.f32 0.35355338, %v799_v48  ;;  %v1119_v54 = vsel %vm497_vm2, %v1111_v46, -inf }
 0x23f   : > { %v645_v50 = vpop.f32.mrf.mxu0  ;;  %v7196_v51 = vpop.f32.mrf.mxu1 }
 0x240   : > { %v1112_v53 = vmul.f32 0.35355338, %v645_v50  ;;  %v1128_v59 = vsel %vm497_vm2, %v1114_v52, -inf }
 0x241   : > { %1120 = vmax.xlane.f32.xlu0 %v1119_v54  ;;  %v7186_v55 = vpop.f32.mrf.mxu0 }
 0x242   : > { %v1122_v56 = vsel %vm497_vm2, %v1112_v53, -inf }
 0x243   : > { %1123 = vmax.xlane.f32.xlu1 %v1122_v56  ;;  %v876_v57 = vpop.f32.mrf.mxu1 }
 0x244   : > { %v8269_v58 = vmul.f32 0.35355338, %v876_v57 }
 0x245   : > { %1129 = vmax.xlane.f32.xlu0 %v1128_v59  ;;  %v7201_v60 = vpop.f32.mrf.mxu1 }
 0x246   : > { %v1131_v61 = vsel %vm497_vm2, %v8269_v58, -inf }
 0x247   : > { %v953_v62 = vpop.f32.mrf.mxu0  ;;  %1132 = vmax.xlane.f32.xlu1 %v1131_v61  ;;  %v1030_v63 = vpop.f32.mrf.mxu1 }
 0x248   : > { %v8274_v0 = vmul.f32 0.35355338, %v953_v62  ;;  %v1117_v1 = vmul.f32 0.35355338, %v1030_v63 }
 0x249   : > { %v7206_v2 = vpop.f32.mrf.mxu0  ;;  %v7211_v3 = vpop.f32.mrf.mxu1 }
 0x24a   : > { %v1134_v4 = vsel %vm497_vm2, %v8274_v0, -inf  ;;  %v1137_v5 = vsel %vm497_vm2, %v1117_v1, -inf }
 0x24b   : > { %1135 = vmax.xlane.f32.xlu0 %v1134_v4  ;;  %v1107_v6 = vpop.f32.mrf.mxu0  ;;  %1138 = vmax.xlane.f32.xlu1 %v1137_v5 }
 0x24c   : > { %v1118_v7 = vmul.f32 0.35355338, %v1107_v6 }
 0x24d   : > { %v7216_v8 = vpop.f32.mrf.mxu0 }
 0x24e   : > { %v1140_v9 = vsel %vm497_vm2, %v1118_v7, -inf }
 0x24f   : > { %1141 = vmax.xlane.f32.xlu0 %v1140_v9 }
 0x25c   : > { %1893 = vrot.lane.b32.xlu1 %v8188_v23, %s7979_s30 }
 0x265   : > { %1815 = vrot.lane.b32.xlu0 %v8182_v19, %s7979_s30 }
 0x2c6   : > { %v1127_v20 = vpop.xlane.xlu0 %1126 }
 0x2c7   : > { %v1145_v22 = vsub.f32 %v1113_v43, %v1127_v20 }
 0x2c9   : > { %v1155_v25 = vmul.f32 1.442695, %v1145_v22 }
 0x2ca   : > { %v1121_v27 = vpop.xlane.xlu0 %1120 }
 0x2cb   : > { %7693 = vpow2.f32 %v1155_v25  ;;  %v1143_v29 = vsub.f32 %v1111_v46, %v1121_v27 }
 0x2cc   : > { %v1124_v32 = vpop.xlane.xlu1 %1123 }
 0x2cd   : > { %v1151_v33 = vmul.f32 1.442695, %v1143_v29  ;;  %v1144_v34 = vsub.f32 %v1112_v53, %v1124_v32 }
 0x2ce   : > { %v1130_v35 = vpop.xlane.xlu0 %1129 }
 0x2cf   : > { %7695 = vpow2.f32 %v1151_v33  ;;  %v1146_v36 = vsub.f32 %v1114_v52, %v1130_v35  ;;  %v1153_v37 = vmul.f32 1.442695, %v1144_v34 }
 0x2d0   : > { %v1133_v47 = vpop.xlane.xlu1 %1132 }
 0x2d1   : > { %v1157_v38 = vmul.f32 1.442695, %v1146_v36  ;;  %v1147_v48 = vsub.f32 %v8269_v58, %v1133_v47 }
 0x2d3   : > { %7697 = vpow2.f32 %v1157_v38  ;;  %v1159_v51 = vmul.f32 1.442695, %v1147_v48 }
 0x2d4   : > { %7699 = vpow2.f32 %v1153_v37  ;;  %v1139_v49 = vpop.xlane.xlu1 %1138  ;;  %v1136_v50 = vpop.xlane.xlu0 %1135 }
 0x2d5   : > { %v1149_v52 = vsub.f32 %v1117_v1, %v1139_v49  ;;  %7701 = vpow2.f32 %v1159_v51  ;;  %v1148_v54 = vsub.f32 %v8274_v0, %v1136_v50 }
 0x2d7   : > { %v1163_v53 = vmul.f32 1.442695, %v1149_v52  ;;  %v1161_v56 = vmul.f32 1.442695, %v1148_v54 }
 0x2d8   : > { %v8300_v39 = vpop.eup %7693  ;;  %v1142_v55 = vpop.xlane.xlu0 %1141 }
 0x2d9   : > { %v1173_v40 = vsel %vm497_vm2, %v8300_v39, 0.0  ;;  %7703 = vpow2.f32 %v1163_v53  ;;  %v1150_v57 = vsub.f32 %v1118_v7, %v1142_v55  ;;  %v8355_v3 = vpop.permute.xlu1 %1893 }
 0x2da   : > { %1174 = vadd.xlane.f32.xlu1 %v1173_v40  ;;  %7705 = vpow2.f32 %v1161_v56 }
 0x2db   : > { %v1165_v59 = vmul.f32 1.442695, %v1150_v57 }
 0x2dc   : > { %v7696_v41 = vpop.eup %7695  ;;  %v1816_v5 = vpop.permute.xlu0 %1815 }
 0x2dd   : > { %v1167_v42 = vsel %vm497_vm2, %v7696_v41, 0.0  ;;  %7707 = vpow2.f32 %v1165_v59 }
 0x2de   : > { %1168 = vadd.xlane.f32.xlu1 %v1167_v42 }
 0x2e0   : > { %v8305_v43 = vpop.eup %7697 }
 0x2e1   : > { %v1176_v44 = vsel %vm497_vm2, %v8305_v43, 0.0  ;;  %v8309_v45 = vpop.eup %7699 }
 0x2e2   : > { %1177 = vadd.xlane.f32.xlu0 %v1176_v44  ;;  %v1170_v46 = vsel %vm497_vm2, %v8309_v45, 0.0  ;;  %v8319_v60 = vpop.eup %7701 }
 0x2e3   : > { %v1179_v58 = vsel %vm497_vm2, %v8319_v60, 0.0 }
 0x2e6   : > { %1171 = vadd.xlane.f32.xlu0 %v1170_v46  ;;  %v8323_v61 = vpop.eup %7703 }
 0x2e7   : > { %v1185_v62 = vsel %vm497_vm2, %v8323_v61, 0.0  ;;  %v8327_v63 = vpop.eup %7705 }
 0x2e8   : > { %v1182_v0 = vsel %vm497_vm2, %v8327_v63, 0.0 }
 0x2ea   : > { %v8331_v1 = vpop.eup %7707 }
 0x2eb   : > { %v1188_v2 = vsel %vm497_vm2, %v8331_v1, 0.0 }
 0x2ef   : > { %2051 = vrot.lane.b32.xlu1 %v8185_v21, %s7978_s15 }
 0x2fc   : > { %1973 = vrot.lane.b32.xlu0 %v8180_v17, %s7978_s15 }
 0x313   : > { %1180 = vadd.xlane.f32.xlu1 %v1179_v58 }
 0x317   : > { %1186 = vadd.xlane.f32.xlu1 %v1185_v62 }
 0x31b   : > { %1183 = vadd.xlane.f32.xlu0 %v1182_v0 }
 0x31f   : > { %1189 = vadd.xlane.f32.xlu0 %v1188_v2 }
 0x328   : > { %2049 = vrot.lane.b32.xlu1 %v8185_v21, %s7979_s30 }
 0x32c   : > { %2207 = vrot.lane.b32.xlu1 %v8197_v30, %s7978_s15 }
 0x330   : > { %2205 = vrot.lane.b32.xlu1 %v8197_v30, %s7979_s30 }
 0x334   : > { %2363 = vrot.lane.b32.xlu1 %v8199_v31, %s7978_s15 }
 0x335   : > { %1971 = vrot.lane.b32.xlu0 %v8180_v17, %s7979_s30 }
 0x338   : > { %2361 = vrot.lane.b32.xlu1 %v8199_v31, %s7979_s30 }
 0x339   : > { %2129 = vrot.lane.b32.xlu0 %v8192_v26, %s7978_s15 }
 0x33d   : > { %2127 = vrot.lane.b32.xlu0 %v8192_v26, %s7979_s30 }
 0x341   : > { %2285 = vrot.lane.b32.xlu0 %v8194_v28, %s7978_s15 }
 0x345   : > { %2283 = vrot.lane.b32.xlu0 %v8194_v28, %s7979_s30 }
 0x363   : > { %v1175_v4 = vpop.xlane.xlu1 %1174 }
 0x367   : > { %v1169_v6 = vpop.xlane.xlu1 %1168 }
 0x368   : > { %7709 = vrcp.f32 %v1169_v6 }
 0x369   : > { %7711 = vrcp.f32 %v1175_v4 }
 0x36b   : > { %v1178_v7 = vpop.xlane.xlu0 %1177 }
 0x36f   : > { %v1172_v8 = vpop.xlane.xlu0 %1171 }
 0x370   : > { %7713 = vrcp.f32 %v1172_v8 }
 0x371   : > { %7715 = vrcp.f32 %v1178_v7 }
 0x375   : > { %v7710_v9 = vpop.eup %7709 }
 0x376   : > { %v1199_v20 = vmul.f32 %v7710_v9, %v7696_v41  ;;  %v7712_v22 = vpop.eup %7711 }
 0x377   : > { %v1201_v25 = vmul.f32 %v7712_v22, %v8300_v39 }
 0x378   : > { %7220 = vmatmul.mubr.msk.f32.vlgmr.msra.gmra.mxu1 %vm497_vm2, %v1199_v20 }
 0x379   : > { %7228 = vmatpush3.msra.mxu1 %v8284_v10  ;;  %7229 = vmatprep.mubr.msk.f32.mxu1 %vm7975_vm1, %v7974_v14 }
 0x37a   : > { %7237 = vmatprep.subr.mxu1 %v7974_v14 }
 0x37c   : > { %7230 = vmatmul.mubr.msk.f32.vlgmr.msra.gmra.mxu1 %vm497_vm2, %v1201_v25 }
 0x37d   : > { %v7714_v27 = vpop.eup %7713  ;;  %7238 = vmatpush3.msra.mxu1 %v8286_v11  ;;  %7239 = vmatprep.mubr.msk.f32.mxu1 %vm7975_vm1, %v7974_v14  ;;  %v2052_v11 = vpop.permute.xlu1 %2051 }
 0x37e   : > { %v1200_v29 = vmul.f32 %v7714_v27, %v8309_v45  ;;  %7247 = vmatprep.subr.mxu1 %v7974_v14  ;;  %v7716_v10 = vpop.eup %7715 }
 0x37f   : > { %v1202_v32 = vmul.f32 %v7716_v10, %v8305_v43 }
 0x380   : > { %7225 = vmatmul.mubr.msk.f32.vlgmr.msra.gmra.mxu0 %vm497_vm2, %v1200_v29 }
 0x381   : > { %7233 = vmatpush3.msra.mxu0 %v8288_v12  ;;  %7234 = vmatprep.mubr.msk.f32.mxu0 %vm7975_vm1, %v7974_v14  ;;  %v1974_v12 = vpop.permute.xlu0 %1973 }
 0x382   : > { %7242 = vmatprep.subr.mxu0 %v7974_v14 }
 0x384   : > { %7235 = vmatmul.mubr.msk.f32.vlgmr.msra.gmra.mxu0 %vm497_vm2, %v1202_v32 }
 0x385   : > { %7243 = vmatpush3.msra.mxu0 %v8298_v24  ;;  %7244 = vmatprep.mubr.msk.f32.mxu0 %vm7975_vm1, %v7974_v14 }
 0x386   : > { %7252 = vmatprep.subr.mxu0 %v7974_v14 }
 0x39c   : > { %v1181_v33 = vpop.xlane.xlu1 %1180 }
 0x39d   : > { %7717 = vrcp.f32 %v1181_v33 }
 0x3a0   : > { %v1187_v34 = vpop.xlane.xlu1 %1186 }
 0x3a1   : > { %7719 = vrcp.f32 %v1187_v34 }
 0x3a4   : > { %v1184_v35 = vpop.xlane.xlu0 %1183  ;;  %v2050_v41 = vpop.permute.xlu1 %2049 }
 0x3a5   : > { %7721 = vrcp.f32 %v1184_v35 }
 0x3a8   : > { %v1190_v36 = vpop.xlane.xlu0 %1189  ;;  %v2208_v46 = vpop.permute.xlu1 %2207 }
 0x3a9   : > { %7723 = vrcp.f32 %v1190_v36 }
 0x3aa   : > { %v7718_v37 = vpop.eup %7717 }
 0x3ab   : > { %v1203_v38 = vmul.f32 %v7718_v37, %v8319_v60 }
 0x3ac   : > { %v1972_v39 = vpop.permute.xlu0 %1971 }
 0x3ad   : > { %7240 = vmatmul.mubr.msk.f32.vlgmr.msra.gmra.mxu1 %vm497_vm2, %v1203_v38 }
 0x3ae   : > { %v7720_v24 = vpop.eup %7719  ;;  %7248 = vmatpush3.msra.mxu1 %v8290_v13  ;;  %7249 = vmatprep.mubr.msk.f32.mxu1 %vm7975_vm1, %v7974_v14 }
 0x3af   : > { %7257 = vmatprep.subr.mxu1 %v7974_v14  ;;  %v1205_v40 = vmul.f32 %v7720_v24, %v8323_v61 }
 0x3b0   : > { %v2130_v42 = vpop.permute.xlu0 %2129 }
 0x3b1   : > { %7250 = vmatmul.mubr.msk.f32.vlgmr.msra.gmra.mxu1 %vm497_vm2, %v1205_v40 }
 0x3b2   : > { %v7722_v43 = vpop.eup %7721  ;;  %7258 = vmatpush3.xpose.msk.msra.mxu1 %vm497_vm2, %v8294_v16  ;;  %7259 = vmatprep.mubr.msk.f32.mxu1 %vm7975_vm1, %v7974_v14 }
 0x3b3   : > { %7267 = vmatprep.subr.mxu1 %v7974_v14  ;;  %v1204_v13 = vmul.f32 %v7722_v43, %v8327_v63 }
 0x3b4   : > { %v2128_v44 = vpop.permute.xlu0 %2127 }
 0x3b5   : > { %7245 = vmatmul.mubr.msk.f32.vlgmr.msra.gmra.mxu0 %vm497_vm2, %v1204_v13  ;;  %7260 = vmatmul.mubr.msk.f32.vlgmr.msra.gmra.mxu1 %vm497_vm2, %v1816_v5 }
 0x3b6   : > { %v7724_v45 = vpop.eup %7723  ;;  %7253 = vmatpush3.msra.mxu0 %v8292_v15  ;;  %7268 = vmatpush3.xpose.msk.msra.mxu1 %vm497_vm2, %v1974_v12  ;;  %v2206_v15 = vpop.permute.xlu1 %2205 }
 0x3b7   : > { %7254 = vmatprep.mubr.msk.f32.mxu0 %vm7975_vm1, %v7974_v14  ;;  %7262 = vmatprep.subr.mxu0 %v7974_v14  ;;  %v1206_v16 = vmul.f32 %v7724_v45, %v8331_v1 }
 0x3b8   : > { %7269 = vmatprep.mubr.msk.f32.mxu1 %vm7975_vm1, %v7974_v14  ;;  %7277 = vmatprep.subr.mxu1 %v7974_v14  ;;  %v2286_v47 = vpop.permute.xlu0 %2285 }
 0x3b9   : > { %7255 = vmatmul.mubr.msk.f32.vlgmr.msra.gmra.mxu0 %vm497_vm2, %v1206_v16  ;;  %7270 = vmatmul.mubr.msk.f32.vlgmr.msra.gmra.mxu1 %vm497_vm2, %v1972_v39 }
 0x3ba   : > { %7263 = vmatpush3.xpose.msk.msra.mxu0 %vm497_vm2, %v8296_v18  ;;  %7278 = vmatpush3.xpose.msk.msra.mxu1 %vm497_vm2, %v2130_v42  ;;  %v2364_v48 = vpop.permute.xlu1 %2363 }
 0x3bb   : > { %7264 = vmatprep.mubr.msk.f32.mxu0 %vm7975_vm1, %v7974_v14  ;;  %7272 = vmatprep.subr.mxu0 %v7974_v14 }
 0x3bc   : > { %7279 = vmatprep.mubr.msk.f32.mxu1 %vm7975_vm1, %v7974_v14  ;;  %7287 = vmatprep.subr.mxu1 %v7974_v14  ;;  %v2284_v18 = vpop.permute.xlu0 %2283 }
 0x3bd   : > { %7265 = vmatmul.mubr.msk.f32.vlgmr.msra.gmra.mxu0 %vm497_vm2, %v8355_v3  ;;  %7280 = vmatmul.mubr.msk.f32.vlgmr.msra.gmra.mxu1 %vm497_vm2, %v2128_v44 }
 0x3be   : > { %7273 = vmatpush3.xpose.msk.msra.mxu0 %vm497_vm2, %v2052_v11  ;;  %7288 = vmatpush3.xpose.msk.msra.mxu1 %vm497_vm2, %v2286_v47  ;;  %v2362_v49 = vpop.permute.xlu1 %2361 }
 0x3bf   : > { %7274 = vmatprep.mubr.msk.f32.mxu0 %vm7975_vm1, %v7974_v14  ;;  %7282 = vmatprep.subr.mxu0 %v7974_v14 }
 0x3c0   : > { %7289 = vmatprep.mubr.msk.f32.mxu1 %vm7975_vm1, %v7974_v14  ;;  %7297 = vmatprep.subr.mxu1 %v7974_v14 }
 0x3c1   : > { %7275 = vmatmul.mubr.msk.f32.vlgmr.msra.gmra.mxu0 %vm497_vm2, %v2050_v41  ;;  %7290 = vmatmul.mubr.msk.f32.vlgmr.msra.gmra.mxu1 %vm497_vm2, %v2284_v18 }
 0x3c2   : > { %7283 = vmatpush3.xpose.msk.msra.mxu0 %vm497_vm2, %v2208_v46  ;;  %7284 = vmatprep.mubr.msk.f32.mxu0 %vm7975_vm1, %v7974_v14 }
 0x3c3   : > { %7292 = vmatprep.subr.mxu0 %v7974_v14  ;;  %7299 = vmatprep.mubr.msk.f32.mxu1 %vm7975_vm1, %v7974_v14 }
 0x3c5   : > { %7285 = vmatmul.mubr.msk.f32.vlgmr.msra.gmra.mxu0 %vm497_vm2, %v2206_v15 }
 0x3c6   : > { %7293 = vmatpush3.xpose.msk.msra.mxu0 %vm497_vm2, %v2364_v48  ;;  %7294 = vmatprep.mubr.msk.f32.mxu0 %vm7975_vm1, %v7974_v14 }
 0x3c7   : > { %7302 = vmatprep.subr.mxu0 %v7974_v14 }
 0x3c9   : > { %7295 = vmatmul.mubr.msk.f32.vlgmr.msra.gmra.mxu0 %vm497_vm2, %v2362_v49 }
 0x3ca   : > { %7304 = vmatprep.mubr.msk.f32.mxu0 %vm7975_vm1, %v7974_v14 }
 0x438   : > { %v8443_v50 = vpop.f32.mrf.mxu1 }
 0x43a   : > { %v7221_v51 = vpop.f32.mrf.mxu1 }
 0x43c   : > { %v8445_v52 = vpop.f32.mrf.mxu1 }
 0x43e   : > { %v7231_v53 = vpop.f32.mrf.mxu1 }
 0x440   : > { %v8447_v54 = vpop.f32.mrf.mxu0 }
 0x442   : > { %v7226_v55 = vpop.f32.mrf.mxu0 }
 0x444   : > { %v8449_v56 = vpop.f32.mrf.mxu0 }
 0x446   : > { %v7236_v57 = vpop.f32.mrf.mxu0 }
 0x46d   : > { %v8451_v59 = vpop.f32.mrf.mxu1 }
 0x46f   : > { %v7241_v60 = vpop.f32.mrf.mxu1 }
 0x471   : > { %v8453_v58 = vpop.f32.mrf.mxu1 }
 0x473   : > { %v7251_v61 = vpop.f32.mrf.mxu1 }
 0x475   : > { %v8455_v62 = vpop.f32.mrf.mxu0  ;;  %v1889_v63 = vpop.f32.mrf.mxu1 }
 0x476   : > { %v2439_v0 = vmul.f32 0.35355338, %v1889_v63 }
 0x477   : > { %v7246_v1 = vpop.f32.mrf.mxu0  ;;  %v7261_v2 = vpop.f32.mrf.mxu1 }
 0x478   : > { %v2447_v3 = vsel %vm497_vm2, %v2439_v0, -inf }
 0x479   : > { %2448 = vmax.xlane.f32.xlu0 %v2447_v3  ;;  %v8458_v4 = vpop.f32.mrf.mxu0  ;;  %v2045_v5 = vpop.f32.mrf.mxu1 }
 0x47a   : > { %v2441_v6 = vmul.f32 0.35355338, %v2045_v5 }
 0x47b   : > { %v7256_v7 = vpop.f32.mrf.mxu0  ;;  %v7271_v8 = vpop.f32.mrf.mxu1 }
 0x47c   : > { %v2453_v9 = vsel %vm497_vm2, %v2441_v6, -inf }
 0x47d   : > { %v1967_v20 = vpop.f32.mrf.mxu0  ;;  %2454 = vmax.xlane.f32.xlu0 %v2453_v9  ;;  %v2201_v22 = vpop.f32.mrf.mxu1 }
 0x47e   : > { %v2440_v25 = vmul.f32 0.35355338, %v1967_v20  ;;  %v2443_v10 = vmul.f32 0.35355338, %v2201_v22 }
 0x47f   : > { %v7266_v27 = vpop.f32.mrf.mxu0  ;;  %v7281_v29 = vpop.f32.mrf.mxu1 }
 0x480   : > { %v2450_v32 = vsel %vm497_vm2, %v2440_v25, -inf  ;;  %v2459_v38 = vsel %vm497_vm2, %v2443_v10, -inf }
 0x481   : > { %2451 = vmax.xlane.f32.xlu1 %v2450_v32  ;;  %v2123_v11 = vpop.f32.mrf.mxu0  ;;  %v2357_v33 = vpop.f32.mrf.mxu1 }
 0x482   : > { %v2442_v12 = vmul.f32 0.35355338, %v2123_v11  ;;  %v2445_v36 = vmul.f32 0.35355338, %v2357_v33 }
 0x483   : > { %v7276_v34 = vpop.f32.mrf.mxu0  ;;  %v7291_v35 = vpop.f32.mrf.mxu1 }
 0x484   : > { %v2456_v37 = vsel %vm497_vm2, %v2442_v12, -inf  ;;  %v2465_v42 = vsel %vm497_vm2, %v2445_v36, -inf }
 0x485   : > { %v2279_v39 = vpop.f32.mrf.mxu0  ;;  %2457 = vmax.xlane.f32.xlu0 %v2456_v37  ;;  %2460 = vmax.xlane.f32.xlu1 %v2459_v38 }
 0x486   : > { %v2444_v24 = vmul.f32 0.35355338, %v2279_v39 }
 0x487   : > { %v7286_v40 = vpop.f32.mrf.mxu0 }
 0x488   : > { %v2462_v41 = vsel %vm497_vm2, %v2444_v24, -inf }
 0x489   : > { %v2435_v43 = vpop.f32.mrf.mxu0  ;;  %2463 = vmax.xlane.f32.xlu0 %v2462_v41  ;;  %2466 = vmax.xlane.f32.xlu1 %v2465_v42 }
 0x48a   : > { %v2446_v13 = vmul.f32 0.35355338, %v2435_v43 }
 0x48b   : > { %v7296_v44 = vpop.f32.mrf.mxu0 }
 0x48c   : > { %v2468_v45 = vsel %vm497_vm2, %v2446_v13, -inf }
 0x48d   : > { %2469 = vmax.xlane.f32.xlu0 %v2468_v45 }
 0x49a   : > { %2535 = vrot.lane.b32.xlu1 %v8182_v19, %s7980_s29 }
 0x49e   : > { %2687 = vrot.lane.b32.xlu1 %v8180_v17, %s7980_s29 }
 0x4a2   : > { %2763 = vrot.lane.b32.xlu1 %v8185_v21, %s7980_s29 }
 0x4a3   : > { %2611 = vrot.lane.b32.xlu0 %v8188_v23, %s7980_s29 }
 0x4a6   : > { %2915 = vrot.lane.b32.xlu1 %v8197_v30, %s7980_s29 }
 0x4a7   : > { %2839 = vrot.lane.b32.xlu0 %v8192_v26, %s7980_s29 }
 0x4aa   : > { %3067 = vrot.lane.b32.xlu1 %v8199_v31, %s7980_s29 }
 0x4ab   : > { %2991 = vrot.lane.b32.xlu0 %v8194_v28, %s7980_s29  ;;  %s6779_s29 = scalar_lea.sflag [#allocation4], %s8143_s19 }
 0x4ae   : > { %3223 = vrot.lane.b32.xlu1 %v8188_v23, %s7981_s23 }
 0x4af   : > { %3145 = vrot.lane.b32.xlu0 %v8182_v19, %s7981_s23 }
 0x4b2   : > { %3221 = vrot.lane.b32.xlu1 %v8188_v23, %s7982_s22 }
 0x4b3   : > { %3143 = vrot.lane.b32.xlu0 %v8182_v19, %s7982_s22 }
 0x4b6   : > { %3379 = vrot.lane.b32.xlu1 %v8185_v21, %s7981_s23 }
 0x4b7   : > { %3301 = vrot.lane.b32.xlu0 %v8180_v17, %s7981_s23 }
 0x502   : > { %v2449_v46 = vpop.xlane.xlu0 %2448 }
 0x503   : > { %v2471_v16 = vsub.f32 %v2439_v0, %v2449_v46 }
 0x505   : > { %v2479_v47 = vmul.f32 1.442695, %v2471_v16 }
 0x506   : > { %v2455_v15 = vpop.xlane.xlu0 %2454 }
 0x507   : > { %7725 = vpow2.f32 %v2479_v47  ;;  %v2473_v18 = vsub.f32 %v2441_v6, %v2455_v15 }
 0x509   : > { %v2483_v48 = vmul.f32 1.442695, %v2473_v18 }
 0x50a   : > { %v2452_v49 = vpop.xlane.xlu1 %2451 }
 0x50b   : > { %7727 = vpow2.f32 %v2483_v48  ;;  %v2472_v51 = vsub.f32 %v2440_v25, %v2452_v49 }
 0x50d   : > { %v2481_v53 = vmul.f32 1.442695, %v2472_v51 }
 0x50e   : > { %v2461_v55 = vpop.xlane.xlu1 %2460  ;;  %v2458_v57 = vpop.xlane.xlu0 %2457 }
 0x50f   : > { %7729 = vpow2.f32 %v2481_v53  ;;  %v2475_v60 = vsub.f32 %v2443_v10, %v2461_v55  ;;  %v2474_v61 = vsub.f32 %v2442_v12, %v2458_v57 }
 0x511   : > { %v2487_v63 = vmul.f32 1.442695, %v2475_v60  ;;  %v2485_v1 = vmul.f32 1.442695, %v2474_v61 }
 0x512   : > { %v2467_v2 = vpop.xlane.xlu1 %2466  ;;  %v2464_v3 = vpop.xlane.xlu0 %2463 }
 0x513   : > { %7731 = vpow2.f32 %v2487_v63  ;;  %v2477_v0 = vsub.f32 %v2445_v36, %v2467_v2  ;;  %v2476_v5 = vsub.f32 %v2444_v24, %v2464_v3 }
 0x514   : > { %v8487_v7 = vpop.eup %7725  ;;  %7733 = vpow2.f32 %v2485_v1 }
 0x515   : > { %v2491_v6 = vmul.f32 1.442695, %v2477_v0  ;;  %v2489_v8 = vmul.f32 1.442695, %v2476_v5  ;;  %v2495_v9 = vsel %vm497_vm2, %v8487_v7, 0.0 }
 0x516   : > { %v2536_v20 = vpop.permute.xlu1 %2535  ;;  %2496 = vadd.xlane.f32.xlu1 %v2495_v9  ;;  %v2470_v22 = vpop.xlane.xlu0 %2469 }
 0x517   : > { %7735 = vpow2.f32 %v2491_v6  ;;  %v2478_v25 = vsub.f32 %v2446_v13, %v2470_v22  ;;  %7298 = vmatpush3.msra.mxu1 %v2536_v20 }
 0x518   : > { %v8491_v27 = vpop.eup %7727  ;;  %7737 = vpow2.f32 %v2489_v8  ;;  %7307 = vmatprep.subr.mxu1 %v7974_v14 }
 0x519   : > { %v2493_v29 = vmul.f32 1.442695, %v2478_v25  ;;  %v2501_v10 = vsel %vm497_vm2, %v8491_v27, 0.0 }
 0x51a   : > { %2502 = vadd.xlane.f32.xlu1 %v2501_v10  ;;  %v2612_v32 = vpop.permute.xlu0 %2611  ;;  %v2688_v42 = vpop.permute.xlu1 %2687 }
 0x51b   : > { %7739 = vpow2.f32 %v2493_v29  ;;  %7303 = vmatpush3.msra.mxu0 %v2612_v32 }
 0x51c   : > { %v8496_v11 = vpop.eup %7729  ;;  %7312 = vmatprep.subr.mxu0 %v7974_v14 }
 0x51d   : > { %v2498_v33 = vsel %vm497_vm2, %v8496_v11, 0.0 }
 0x51e   : > { %2499 = vadd.xlane.f32.xlu0 %v2498_v33  ;;  %v2764_v43 = vpop.permute.xlu1 %2763  ;;  %v2840_v45 = vpop.permute.xlu0 %2839 }
 0x520   : > { %v8501_v12 = vpop.eup %7731 }
 0x521   : > { %v8503_v34 = vpop.eup %7733  ;;  %v2507_v35 = vsel %vm497_vm2, %v8501_v12, 0.0 }
 0x522   : > { %2508 = vadd.xlane.f32.xlu1 %v2507_v35  ;;  %v2504_v36 = vsel %vm497_vm2, %v8503_v34, 0.0  ;;  %v2916_v13 = vpop.permute.xlu1 %2915  ;;  %v2992_v16 = vpop.permute.xlu0 %2991 }
 0x523   : > { %2505 = vadd.xlane.f32.xlu0 %v2504_v36 }
 0x524   : > { %v8509_v37 = vpop.eup %7735 }
 0x525   : > { %v8511_v38 = vpop.eup %7737  ;;  %v2513_v39 = vsel %vm497_vm2, %v8509_v37, 0.0 }
 0x526   : > { %2514 = vadd.xlane.f32.xlu1 %v2513_v39  ;;  %v2510_v24 = vsel %vm497_vm2, %v8511_v38, 0.0  ;;  %v8541_v44 = vpop.permute.xlu1 %3067  ;;  %v3146_v15 = vpop.permute.xlu0 %3145 }
 0x527   : > { %2511 = vadd.xlane.f32.xlu0 %v2510_v24 }
 0x528   : > { %v8517_v40 = vpop.eup %7739 }
 0x529   : > { %v2516_v41 = vsel %vm497_vm2, %v8517_v40, 0.0 }
 0x52a   : > { %v8543_v46 = vpop.permute.xlu1 %3223  ;;  %v8549_v48 = vpop.permute.xlu0 %3143 }
 0x52b   : > { %2517 = vadd.xlane.f32.xlu0 %v2516_v41 }
 0x52e   : > { %v8545_v47 = vpop.permute.xlu1 %3221  ;;  %v8551_v51 = vpop.permute.xlu0 %3301 }
 0x532   : > { %v8547_v18 = vpop.permute.xlu1 %3379 }
 0x537   : > { %3377 = vrot.lane.b32.xlu1 %v8185_v21, %s7982_s22 }
 0x53b   : > { %3535 = vrot.lane.b32.xlu1 %v8197_v30, %s7981_s23 }
 0x53f   : > { %3533 = vrot.lane.b32.xlu1 %v8197_v30, %s7982_s22 }
 0x541   : > { %3299 = vrot.lane.b32.xlu0 %v8180_v17, %s7982_s22 }
 0x543   : > { %3691 = vrot.lane.b32.xlu1 %v8199_v31, %s7981_s23 }
 0x545   : > { %3457 = vrot.lane.b32.xlu0 %v8192_v26, %s7981_s23 }
 0x547   : > { %3689 = vrot.lane.b32.xlu1 %v8199_v31, %s7982_s22 }
 0x549   : > { %3455 = vrot.lane.b32.xlu0 %v8192_v26, %s7982_s22 }
 0x54d   : > { %3613 = vrot.lane.b32.xlu0 %v8194_v28, %s7981_s23  ;;  %s7989_s23 = smov 24  }
 0x551   : > { %3611 = vrot.lane.b32.xlu0 %v8194_v28, %s7982_s22 }
 0x59f   : > { %v2497_v49 = vpop.xlane.xlu1 %2496 }
 0x5a0   : > { %7741 = vrcp.f32 %v2497_v49 }
 0x5a3   : > { %v2503_v53 = vpop.xlane.xlu1 %2502 }
 0x5a4   : > { %7743 = vrcp.f32 %v2503_v53 }
 0x5a7   : > { %v2500_v55 = vpop.xlane.xlu0 %2499 }
 0x5a8   : > { %7745 = vrcp.f32 %v2500_v55 }
 0x5ab   : > { %v2509_v57 = vpop.xlane.xlu1 %2508 }
 0x5ac   : > { %7747 = vrcp.f32 %v2509_v57  ;;  %v2506_v60 = vpop.xlane.xlu0 %2505 }
 0x5ad   : > { %v7742_v61 = vpop.eup %7741  ;;  %7749 = vrcp.f32 %v2506_v60 }
 0x5ae   : > { %v2527_v63 = vmul.f32 %v7742_v61, %v8487_v7 }
 0x5af   : > { %v2515_v1 = vpop.xlane.xlu1 %2514 }
 0x5b0   : > { %7751 = vrcp.f32 %v2515_v1  ;;  %v2512_v2 = vpop.xlane.xlu0 %2511  ;;  %7300 = vmatmul.mubr.msk.f32.vlgmr.msra.gmra.mxu1 %vm497_vm2, %v2527_v63 }
 0x5b1   : > { %v7744_v3 = vpop.eup %7743  ;;  %7753 = vrcp.f32 %v2512_v2  ;;  %7308 = vmatpush3.msra.mxu1 %v2688_v42  ;;  %7309 = vmatprep.mubr.msk.f32.mxu1 %vm7975_vm1, %v7974_v14 }
 0x5b2   : > { %7317 = vmatprep.subr.mxu1 %v7974_v14  ;;  %v2529_v0 = vmul.f32 %v7744_v3, %v8491_v27 }
 0x5b3   : > { %v3378_v27 = vpop.permute.xlu1 %3377 }
 0x5b4   : > { %v2518_v5 = vpop.xlane.xlu0 %2517  ;;  %7310 = vmatmul.mubr.msk.f32.vlgmr.msra.gmra.mxu1 %vm497_vm2, %v2529_v0 }
 0x5b5   : > { %v7746_v6 = vpop.eup %7745  ;;  %7755 = vrcp.f32 %v2518_v5  ;;  %7318 = vmatpush3.msra.mxu1 %v2840_v45  ;;  %7319 = vmatprep.mubr.msk.f32.mxu1 %vm7975_vm1, %v7974_v14 }
 0x5b6   : > { %v2528_v7 = vmul.f32 %v7746_v6, %v8496_v11  ;;  %7327 = vmatprep.subr.mxu1 %v7974_v14 }
 0x5b8   : > { %v3300_v8 = vpop.permute.xlu0 %3299  ;;  %7305 = vmatmul.mubr.msk.f32.vlgmr.msra.gmra.mxu0 %vm497_vm2, %v2528_v7 }
 0x5b9   : > { %v7748_v9 = vpop.eup %7747  ;;  %7313 = vmatpush3.msra.mxu0 %v2764_v43  ;;  %7314 = vmatprep.mubr.msk.f32.mxu0 %vm7975_vm1, %v7974_v14 }
 0x5ba   : > { %v7750_v20 = vpop.eup %7749  ;;  %7322 = vmatprep.subr.mxu0 %v7974_v14  ;;  %v2531_v22 = vmul.f32 %v7748_v9, %v8501_v12 }
 0x5bb   : > { %v2530_v25 = vmul.f32 %v7750_v20, %v8503_v34  ;;  %v3536_v34 = vpop.permute.xlu1 %3535 }
 0x5bc   : > { %7320 = vmatmul.mubr.msk.f32.vlgmr.msra.gmra.mxu1 %vm497_vm2, %v2531_v22  ;;  %v3458_v10 = vpop.permute.xlu0 %3457 }
 0x5bd   : > { %v7752_v29 = vpop.eup %7751  ;;  %7315 = vmatmul.mubr.msk.f32.vlgmr.msra.gmra.mxu0 %vm497_vm2, %v2530_v25  ;;  %7328 = vmatpush3.msra.mxu1 %v2992_v16 }
 0x5be   : > { %v7754_v32 = vpop.eup %7753  ;;  %7323 = vmatpush3.msra.mxu0 %v2916_v13  ;;  %7324 = vmatprep.mubr.msk.f32.mxu0 %vm7975_vm1, %v7974_v14  ;;  %v2533_v11 = vmul.f32 %v7752_v29, %v8509_v37 }
 0x5bf   : > { %7329 = vmatprep.mubr.msk.f32.mxu1 %vm7975_vm1, %v7974_v14  ;;  %7332 = vmatprep.subr.mxu0 %v7974_v14  ;;  %v2532_v33 = vmul.f32 %v7754_v32, %v8511_v38  ;;  %v3534_v37 = vpop.permute.xlu1 %3533 }
 0x5c0   : > { %7337 = vmatprep.subr.mxu1 %v7974_v14  ;;  %7330 = vmatmul.mubr.msk.f32.vlgmr.msra.gmra.mxu1 %vm497_vm2, %v2533_v11  ;;  %v3456_v35 = vpop.permute.xlu0 %3455 }
 0x5c1   : > { %7325 = vmatmul.mubr.msk.f32.vlgmr.msra.gmra.mxu0 %vm497_vm2, %v2532_v33  ;;  %7338 = vmatpush3.xpose.msk.msra.mxu1 %vm497_vm2, %v3146_v15 }
 0x5c2   : > { %v7756_v12 = vpop.eup %7755  ;;  %7333 = vmatpush3.msra.mxu0 %v8541_v44  ;;  %7334 = vmatprep.mubr.msk.f32.mxu0 %vm7975_vm1, %v7974_v14 }
 0x5c3   : > { %7339 = vmatprep.mubr.msk.f32.mxu1 %vm7975_vm1, %v7974_v14  ;;  %7342 = vmatprep.subr.mxu0 %v7974_v14  ;;  %v2534_v36 = vmul.f32 %v7756_v12, %v8517_v40  ;;  %v3692_v39 = vpop.permute.xlu1 %3691 }
 0x5c4   : > { %7347 = vmatprep.subr.mxu1 %v7974_v14  ;;  %7340 = vmatmul.mubr.msk.f32.vlgmr.msra.gmra.mxu1 %vm497_vm2, %v8549_v48  ;;  %v3614_v38 = vpop.permute.xlu0 %3613 }
 0x5c5   : > { %7335 = vmatmul.mubr.msk.f32.vlgmr.msra.gmra.mxu0 %vm497_vm2, %v2534_v36  ;;  %7348 = vmatpush3.xpose.msk.msra.mxu1 %vm497_vm2, %v8551_v51 }
 0x5c6   : > { %7343 = vmatpush3.xpose.msk.msra.mxu0 %vm497_vm2, %v8543_v46  ;;  %7344 = vmatprep.mubr.msk.f32.mxu0 %vm7975_vm1, %v7974_v14 }
 0x5c7   : > { %7349 = vmatprep.mubr.msk.f32.mxu1 %vm7975_vm1, %v7974_v14  ;;  %7352 = vmatprep.subr.mxu0 %v7974_v14  ;;  %v3690_v40 = vpop.permute.xlu1 %3689 }
 0x5c8   : > { %7357 = vmatprep.subr.mxu1 %v7974_v14  ;;  %7350 = vmatmul.mubr.msk.f32.vlgmr.msra.gmra.mxu1 %vm497_vm2, %v3300_v8  ;;  %v3612_v24 = vpop.permute.xlu0 %3611 }
 0x5c9   : > { %7345 = vmatmul.mubr.msk.f32.vlgmr.msra.gmra.mxu0 %vm497_vm2, %v8545_v47  ;;  %7358 = vmatpush3.xpose.msk.msra.mxu1 %vm497_vm2, %v3458_v10 }
 0x5ca   : > { %7353 = vmatpush3.xpose.msk.msra.mxu0 %vm497_vm2, %v8547_v18  ;;  %7354 = vmatprep.mubr.msk.f32.mxu0 %vm7975_vm1, %v7974_v14 }
 0x5cb   : > { %7359 = vmatprep.mubr.msk.f32.mxu1 %vm7975_vm1, %v7974_v14  ;;  %7362 = vmatprep.subr.mxu0 %v7974_v14 }
 0x5cc   : > { %7367 = vmatprep.subr.mxu1 %v7974_v14  ;;  %7360 = vmatmul.mubr.msk.f32.vlgmr.msra.gmra.mxu1 %vm497_vm2, %v3456_v35 }
 0x5cd   : > { %7355 = vmatmul.mubr.msk.f32.vlgmr.msra.gmra.mxu0 %vm497_vm2, %v3378_v27  ;;  %7368 = vmatpush3.xpose.msk.msra.mxu1 %vm497_vm2, %v3614_v38 }
 0x5ce   : > { %7363 = vmatpush3.xpose.msk.msra.mxu0 %vm497_vm2, %v3536_v34  ;;  %7364 = vmatprep.mubr.msk.f32.mxu0 %vm7975_vm1, %v7974_v14 }
 0x5cf   : > { %7369 = vmatprep.mubr.msk.f32.mxu1 %vm7975_vm1, %v7974_v14  ;;  %7372 = vmatprep.subr.mxu0 %v7974_v14 }
 0x5d0   : > { %7370 = vmatmul.mubr.msk.f32.vlgmr.msra.gmra.mxu1 %vm497_vm2, %v3612_v24  ;;  %7377 = vmatprep.subr.mxu1 %v7974_v14 }
 0x5d1   : > { %7365 = vmatmul.mubr.msk.f32.vlgmr.msra.gmra.mxu0 %vm497_vm2, %v3534_v37  ;;  %7379 = vmatprep.mubr.msk.f32.mxu1 %vm7975_vm1, %v7974_v14 }
 0x5d2   : > { %7373 = vmatpush3.xpose.msk.msra.mxu0 %vm497_vm2, %v3692_v39  ;;  %7374 = vmatprep.mubr.msk.f32.mxu0 %vm7975_vm1, %v7974_v14 }
 0x5d3   : > { %7382 = vmatprep.subr.mxu0 %v7974_v14 }
 0x5d5   : > { %7375 = vmatmul.mubr.msk.f32.vlgmr.msra.gmra.mxu0 %vm497_vm2, %v3690_v40 }
 0x5d6   : > { %7384 = vmatprep.mubr.msk.f32.mxu0 %vm7975_vm1, %v7974_v14 }
 0x670   : > { %v8637_v41 = vpop.f32.mrf.mxu1 }
 0x672   : > { %v7301_v42 = vpop.f32.mrf.mxu1 }
 0x674   : > { %v8639_v43 = vpop.f32.mrf.mxu1 }
 0x676   : > { %v7311_v13 = vpop.f32.mrf.mxu1 }
 0x678   : > { %v8641_v44 = vpop.f32.mrf.mxu0 }
 0x679   : > { %v7617_v45 = vpack.i.bf16 %v8641_v44, %v8637_v41 }
 0x67a   : > { %v7306_v46 = vpop.f32.mrf.mxu0 }
 0x67c   : > { %v8645_v16 = vpop.f32.mrf.mxu1 }
 0x67d   : > { %v8647_v47 = vpop.f32.mrf.mxu0 }
 0x67e   : > { %v7622_v15 = vpack.i.bf16 %v8647_v47, %v8639_v43  ;;  %v7321_v18 = vpop.f32.mrf.mxu1 }
 0x67f   : > { %v7316_v48 = vpop.f32.mrf.mxu0 }
 0x680   : > { %v8651_v49 = vpop.f32.mrf.mxu1 }
 0x681   : > { %v8653_v51 = vpop.f32.mrf.mxu0 }
 0x682   : > { %v7637_v53 = vpack.i.bf16 %v8653_v51, %v8645_v16  ;;  %v7331_v55 = vpop.f32.mrf.mxu1 }
 0x683   : > { %v7326_v57 = vpop.f32.mrf.mxu0 }
 0x684   : > { %v3217_v60 = vpop.f32.mrf.mxu1 }
 0x685   : > { %v8657_v61 = vpop.f32.mrf.mxu0  ;;  %v3767_v63 = vmul.f32 0.35355338, %v3217_v60 }
 0x686   : > { %v7642_v1 = vpack.i.bf16 %v8657_v61, %v8651_v49  ;;  %v7341_v2 = vpop.f32.mrf.mxu1 }
 0x687   : > { %v7336_v3 = vpop.f32.mrf.mxu0  ;;  %v3775_v0 = vsel %vm497_vm2, %v3767_v63, -inf }
 0x688   : > { %3776 = vmax.xlane.f32.xlu0 %v3775_v0  ;;  %v3373_v5 = vpop.f32.mrf.mxu1 }
 0x689   : > { %v3295_v6 = vpop.f32.mrf.mxu0  ;;  %v3769_v7 = vmul.f32 0.35355338, %v3373_v5 }
 0x68a   : > { %v3768_v8 = vmul.f32 0.35355338, %v3295_v6  ;;  %v7351_v9 = vpop.f32.mrf.mxu1 }
 0x68b   : > { %v7346_v20 = vpop.f32.mrf.mxu0  ;;  %v3781_v22 = vsel %vm497_vm2, %v3769_v7, -inf }
 0x68c   : > { %v3778_v25 = vsel %vm497_vm2, %v3768_v8, -inf  ;;  %3782 = vmax.xlane.f32.xlu0 %v3781_v22  ;;  %v3529_v27 = vpop.f32.mrf.mxu1 }
 0x68d   : > { %3779 = vmax.xlane.f32.xlu1 %v3778_v25  ;;  %v3451_v29 = vpop.f32.mrf.mxu0  ;;  %v3771_v10 = vmul.f32 0.35355338, %v3529_v27 }
 0x68e   : > { %v3770_v32 = vmul.f32 0.35355338, %v3451_v29  ;;  %v7361_v11 = vpop.f32.mrf.mxu1 }
 0x68f   : > { %v7356_v33 = vpop.f32.mrf.mxu0  ;;  %v3787_v12 = vsel %vm497_vm2, %v3771_v10, -inf }
 0x690   : > { %v3784_v34 = vsel %vm497_vm2, %v3770_v32, -inf  ;;  %v3685_v35 = vpop.f32.mrf.mxu1 }
 0x691   : > { %v3607_v36 = vpop.f32.mrf.mxu0  ;;  %3785 = vmax.xlane.f32.xlu0 %v3784_v34  ;;  %3788 = vmax.xlane.f32.xlu1 %v3787_v12  ;;  %v3773_v37 = vmul.f32 0.35355338, %v3685_v35 }
 0x692   : > { %v3772_v38 = vmul.f32 0.35355338, %v3607_v36  ;;  %v7371_v39 = vpop.f32.mrf.mxu1 }
 0x693   : > { %v7366_v24 = vpop.f32.mrf.mxu0  ;;  %v3793_v40 = vsel %vm497_vm2, %v3773_v37, -inf }
 0x694   : > { %v3790_v42 = vsel %vm497_vm2, %v3772_v38, -inf }
 0x695   : > { %v3763_v13 = vpop.f32.mrf.mxu0  ;;  %3791 = vmax.xlane.f32.xlu0 %v3790_v42  ;;  %3794 = vmax.xlane.f32.xlu1 %v3793_v40 }
 0x696   : > { %v3774_v46 = vmul.f32 0.35355338, %v3763_v13 }
 0x697   : > { %v7376_v18 = vpop.f32.mrf.mxu0 }
 0x698   : > { %v3796_v48 = vsel %vm497_vm2, %v3774_v46, -inf }
 0x699   : > { %3797 = vmax.xlane.f32.xlu0 %v3796_v48 }
 0x6a6   : > { %3863 = vrot.lane.b32.xlu1 %v8182_v19, %s7983_s12 }
 0x6aa   : > { %4015 = vrot.lane.b32.xlu1 %v8180_v17, %s7983_s12 }
 0x6ae   : > { %4091 = vrot.lane.b32.xlu1 %v8185_v21, %s7983_s12 }
 0x6af   : > { %3939 = vrot.lane.b32.xlu0 %v8188_v23, %s7983_s12 }
 0x6b2   : > { %4243 = vrot.lane.b32.xlu1 %v8197_v30, %s7983_s12 }
 0x6b3   : > { %4167 = vrot.lane.b32.xlu0 %v8192_v26, %s7983_s12 }
 0x6b6   : > { %4395 = vrot.lane.b32.xlu1 %v8199_v31, %s7983_s12 }
 0x6b7   : > { %4319 = vrot.lane.b32.xlu0 %v8194_v28, %s7983_s12 }
 0x6ba   : > { %4551 = vrot.lane.b32.xlu1 %v8188_v23, %s7984_s20 }
 0x6bb   : > { %4473 = vrot.lane.b32.xlu0 %v8182_v19, %s7984_s20 }
 0x6be   : > { %4549 = vrot.lane.b32.xlu1 %v8188_v23, %s7985_s21 }
 0x6bf   : > { %4471 = vrot.lane.b32.xlu0 %v8182_v19, %s7985_s21 }
 0x6c2   : > { %4707 = vrot.lane.b32.xlu1 %v8185_v21, %s7984_s20 }
 0x6c3   : > { %4629 = vrot.lane.b32.xlu0 %v8180_v17, %s7984_s20 }
 0x711   : > { %v3777_v55 = vpop.xlane.xlu0 %3776 }
 0x712   : > { %v3799_v57 = vsub.f32 %v3767_v63, %v3777_v55 }
 0x714   : > { %v3807_v60 = vmul.f32 1.442695, %v3799_v57 }
 0x715   : > { %v3783_v2 = vpop.xlane.xlu0 %3782 }
 0x716   : > { %7757 = vpow2.f32 %v3807_v60  ;;  %v3780_v3 = vpop.xlane.xlu1 %3779  ;;  %v3801_v0 = vsub.f32 %v3769_v7, %v3783_v2 }
 0x717   : > { %v3800_v5 = vsub.f32 %v3768_v8, %v3780_v3 }
 0x718   : > { %v3811_v6 = vmul.f32 1.442695, %v3801_v0 }
 0x719   : > { %v3809_v9 = vmul.f32 1.442695, %v3800_v5 }
 0x71a   : > { %7759 = vpow2.f32 %v3811_v6  ;;  %v3789_v20 = vpop.xlane.xlu1 %3788  ;;  %v3786_v22 = vpop.xlane.xlu0 %3785 }
 0x71b   : > { %7761 = vpow2.f32 %v3809_v9  ;;  %v3803_v25 = vsub.f32 %v3771_v10, %v3789_v20  ;;  %v3802_v27 = vsub.f32 %v3770_v32, %v3786_v22 }
 0x71d   : > { %v3815_v29 = vmul.f32 1.442695, %v3803_v25  ;;  %v3813_v11 = vmul.f32 1.442695, %v3802_v27 }
 0x71e   : > { %v3795_v33 = vpop.xlane.xlu1 %3794  ;;  %v3792_v12 = vpop.xlane.xlu0 %3791 }
 0x71f   : > { %7763 = vpow2.f32 %v3815_v29  ;;  %v3805_v63 = vsub.f32 %v3773_v37, %v3795_v33  ;;  %v3804_v34 = vsub.f32 %v3772_v38, %v3792_v12 }
 0x720   : > { %7765 = vpow2.f32 %v3813_v11 }
 0x721   : > { %v3819_v35 = vmul.f32 1.442695, %v3805_v63  ;;  %v3817_v36 = vmul.f32 1.442695, %v3804_v34 }
 0x722   : > { %v3864_v7 = vpop.permute.xlu1 %3863  ;;  %v3798_v8 = vpop.xlane.xlu0 %3797 }
 0x723   : > { %v8689_v39 = vpop.eup %7757  ;;  %7767 = vpow2.f32 %v3819_v35  ;;  %v3806_v24 = vsub.f32 %v3774_v46, %v3798_v8  ;;  %7378 = vmatpush3.msra.mxu1 %v3864_v7 }
 0x724   : > { %7769 = vpow2.f32 %v3817_v36  ;;  %v3823_v10 = vsel %vm497_vm2, %v8689_v39, 0.0  ;;  %7387 = vmatprep.subr.mxu1 %v7974_v14 }
 0x725   : > { %v3821_v32 = vmul.f32 1.442695, %v3806_v24  ;;  %3824 = vadd.xlane.f32.xlu1 %v3823_v10 }
 0x726   : > { %v3940_v37 = vpop.permute.xlu0 %3939  ;;  %v4016_v6 = vpop.permute.xlu1 %4015 }
 0x727   : > { %v8694_v38 = vpop.eup %7759  ;;  %7771 = vpow2.f32 %v3821_v32  ;;  %7383 = vmatpush3.msra.mxu0 %v3940_v37 }
 0x728   : > { %v8696_v40 = vpop.eup %7761  ;;  %v3829_v42 = vsel %vm497_vm2, %v8694_v38, 0.0  ;;  %7392 = vmatprep.subr.mxu0 %v7974_v14 }
 0x729   : > { %v3826_v13 = vsel %vm497_vm2, %v8696_v40, 0.0  ;;  %3830 = vadd.xlane.f32.xlu1 %v3829_v42 }
 0x72a   : > { %3827 = vadd.xlane.f32.xlu0 %v3826_v13  ;;  %v4092_v9 = vpop.permute.xlu1 %4091  ;;  %v4168_v22 = vpop.permute.xlu0 %4167 }
 0x72c   : > { %v8703_v46 = vpop.eup %7763 }
 0x72d   : > { %v8705_v18 = vpop.eup %7765  ;;  %v3835_v48 = vsel %vm497_vm2, %v8703_v46, 0.0 }
 0x72e   : > { %3836 = vadd.xlane.f32.xlu1 %v3835_v48  ;;  %v3832_v55 = vsel %vm497_vm2, %v8705_v18, 0.0  ;;  %v4244_v20 = vpop.permute.xlu1 %4243  ;;  %v4320_v27 = vpop.permute.xlu0 %4319 }
 0x72f   : > { %3833 = vadd.xlane.f32.xlu0 %v3832_v55 }
 0x730   : > { %v8711_v57 = vpop.eup %7767 }
 0x731   : > { %v8713_v60 = vpop.eup %7769  ;;  %v3841_v2 = vsel %vm497_vm2, %v8711_v57, 0.0 }
 0x732   : > { %3842 = vadd.xlane.f32.xlu1 %v3841_v2  ;;  %v3838_v3 = vsel %vm497_vm2, %v8713_v60, 0.0  ;;  %v8743_v25 = vpop.permute.xlu1 %4395  ;;  %v4474_v11 = vpop.permute.xlu0 %4473 }
 0x733   : > { %3839 = vadd.xlane.f32.xlu0 %v3838_v3 }
 0x734   : > { %v8719_v0 = vpop.eup %7771 }
 0x735   : > { %v3844_v5 = vsel %vm497_vm2, %v8719_v0, 0.0 }
 0x736   : > { %v8745_v29 = vpop.permute.xlu1 %4551  ;;  %v8749_v12 = vpop.permute.xlu0 %4471 }
 0x737   : > { %3845 = vadd.xlane.f32.xlu0 %v3844_v5 }
 0x73a   : > { %v8747_v33 = vpop.permute.xlu1 %4549  ;;  %v8753_v35 = vpop.permute.xlu0 %4629 }
 0x73e   : > { %v8751_v63 = vpop.permute.xlu1 %4707 }
 0x743   : > { %4705 = vrot.lane.b32.xlu1 %v8185_v21, %s7985_s21 }
 0x747   : > { %4863 = vrot.lane.b32.xlu1 %v8197_v30, %s7984_s20 }
 0x74b   : > { %4861 = vrot.lane.b32.xlu1 %v8197_v30, %s7985_s21 }
 0x74d   : > { %4627 = vrot.lane.b32.xlu0 %v8180_v17, %s7985_s21 }
 0x74f   : > { %5019 = vrot.lane.b32.xlu1 %v8199_v31, %s7984_s20 }
 0x751   : > { %4785 = vrot.lane.b32.xlu0 %v8192_v26, %s7984_s20 }
 0x753   : > { %5017 = vrot.lane.b32.xlu1 %v8199_v31, %s7985_s21 }
 0x755   : > { %4783 = vrot.lane.b32.xlu0 %v8192_v26, %s7985_s21 }
 0x759   : > { %4941 = vrot.lane.b32.xlu0 %v8194_v28, %s7984_s20 }
 0x75d   : > { %4939 = vrot.lane.b32.xlu0 %v8194_v28, %s7985_s21 }
 0x7ae   : > { %v3825_v34 = vpop.xlane.xlu1 %3824 }
 0x7af   : > { %7773 = vrcp.f32 %v3825_v34 }
 0x7b2   : > { %v3831_v36 = vpop.xlane.xlu1 %3830 }
 0x7b3   : > { %7775 = vrcp.f32 %v3831_v36  ;;  %v3828_v7 = vpop.xlane.xlu0 %3827 }
 0x7b4   : > { %7777 = vrcp.f32 %v3828_v7 }
 0x7b7   : > { %v3837_v8 = vpop.xlane.xlu1 %3836 }
 0x7b8   : > { %7779 = vrcp.f32 %v3837_v8  ;;  %v3834_v24 = vpop.xlane.xlu0 %3833 }
 0x7b9   : > { %7781 = vrcp.f32 %v3834_v24 }
 0x7bb   : > { %v3843_v10 = vpop.xlane.xlu1 %3842 }
 0x7bc   : > { %v7774_v32 = vpop.eup %7773  ;;  %7783 = vrcp.f32 %v3843_v10  ;;  %v3840_v37 = vpop.xlane.xlu0 %3839 }
 0x7bd   : > { %7785 = vrcp.f32 %v3840_v37  ;;  %v3855_v42 = vmul.f32 %v7774_v32, %v8689_v39 }
 0x7bf   : > { %7380 = vmatmul.mubr.msk.f32.vlgmr.msra.gmra.mxu1 %vm497_vm2, %v3855_v42  ;;  %v4706_v34 = vpop.permute.xlu1 %4705 }
 0x7c0   : > { %v7776_v13 = vpop.eup %7775  ;;  %v3846_v48 = vpop.xlane.xlu0 %3845  ;;  %7388 = vmatpush3.msra.mxu1 %v4016_v6  ;;  %7389 = vmatprep.mubr.msk.f32.mxu1 %vm7975_vm1, %v7974_v14 }
 0x7c1   : > { %v7778_v55 = vpop.eup %7777  ;;  %7787 = vrcp.f32 %v3846_v48  ;;  %7397 = vmatprep.subr.mxu1 %v7974_v14  ;;  %v3857_v2 = vmul.f32 %v7776_v13, %v8694_v38 }
 0x7c2   : > { %v3856_v3 = vmul.f32 %v7778_v55, %v8696_v40 }
 0x7c3   : > { %7390 = vmatmul.mubr.msk.f32.vlgmr.msra.gmra.mxu1 %vm497_vm2, %v3857_v2 }
 0x7c4   : > { %v4628_v5 = vpop.permute.xlu0 %4627  ;;  %7385 = vmatmul.mubr.msk.f32.vlgmr.msra.gmra.mxu0 %vm497_vm2, %v3856_v3  ;;  %7398 = vmatpush3.msra.mxu1 %v4168_v22 }
 0x7c5   : > { %v7780_v39 = vpop.eup %7779  ;;  %7393 = vmatpush3.msra.mxu0 %v4092_v9  ;;  %7399 = vmatprep.mubr.msk.f32.mxu1 %vm7975_vm1, %v7974_v14 }
 0x7c6   : > { %v7782_v6 = vpop.eup %7781  ;;  %7394 = vmatprep.mubr.msk.f32.mxu0 %vm7975_vm1, %v7974_v14  ;;  %7402 = vmatprep.subr.mxu0 %v7974_v14  ;;  %v3859_v38 = vmul.f32 %v7780_v39, %v8703_v46 }
 0x7c7   : > { %7407 = vmatprep.subr.mxu1 %v7974_v14  ;;  %v3858_v40 = vmul.f32 %v7782_v6, %v8705_v18 }
 0x7c8   : > { %7400 = vmatmul.mubr.msk.f32.vlgmr.msra.gmra.mxu1 %vm497_vm2, %v3859_v38  ;;  %v4786_v9 = vpop.permute.xlu0 %4785 }
 0x7c9   : > { %v7784_v22 = vpop.eup %7783  ;;  %7395 = vmatmul.mubr.msk.f32.vlgmr.msra.gmra.mxu0 %vm497_vm2, %v3858_v40  ;;  %7408 = vmatpush3.msra.mxu1 %v4320_v27 }
 0x7ca   : > { %v7786_v36 = vpop.eup %7785  ;;  %7403 = vmatpush3.msra.mxu0 %v4244_v20  ;;  %7404 = vmatprep.mubr.msk.f32.mxu0 %vm7975_vm1, %v7974_v14  ;;  %v3861_v7 = vmul.f32 %v7784_v22, %v8711_v57  ;;  %v4864_v20 = vpop.permute.xlu1 %4863 }
 0x7cb   : > { %7409 = vmatprep.mubr.msk.f32.mxu1 %vm7975_vm1, %v7974_v14  ;;  %7412 = vmatprep.subr.mxu0 %v7974_v14  ;;  %v3860_v46 = vmul.f32 %v7786_v36, %v8713_v60 }
 0x7cc   : > { %7417 = vmatprep.subr.mxu1 %v7974_v14  ;;  %7410 = vmatmul.mubr.msk.f32.vlgmr.msra.gmra.mxu1 %vm497_vm2, %v3861_v7  ;;  %v4784_v57 = vpop.permute.xlu0 %4783 }
 0x7cd   : > { %7405 = vmatmul.mubr.msk.f32.vlgmr.msra.gmra.mxu0 %vm497_vm2, %v3860_v46  ;;  %7418 = vmatpush3.xpose.msk.msra.mxu1 %vm497_vm2, %v4474_v11 }
 0x7ce   : > { %v7788_v18 = vpop.eup %7787  ;;  %7413 = vmatpush3.msra.mxu0 %v8743_v25  ;;  %7414 = vmatprep.mubr.msk.f32.mxu0 %vm7975_vm1, %v7974_v14 }
 0x7cf   : > { %7419 = vmatprep.mubr.msk.f32.mxu1 %vm7975_vm1, %v7974_v14  ;;  %7422 = vmatprep.subr.mxu0 %v7974_v14  ;;  %v3862_v60 = vmul.f32 %v7788_v18, %v8719_v0  ;;  %v4862_v0 = vpop.permute.xlu1 %4861 }
 0x7d0   : > { %7427 = vmatprep.subr.mxu1 %v7974_v14  ;;  %7420 = vmatmul.mubr.msk.f32.vlgmr.msra.gmra.mxu1 %vm497_vm2, %v8749_v12  ;;  %v4942_v25 = vpop.permute.xlu0 %4941 }
 0x7d1   : > { %7415 = vmatmul.mubr.msk.f32.vlgmr.msra.gmra.mxu0 %vm497_vm2, %v3862_v60  ;;  %7428 = vmatpush3.xpose.msk.msra.mxu1 %vm497_vm2, %v8753_v35 }
 0x7d2   : > { %7423 = vmatpush3.xpose.msk.msra.mxu0 %vm497_vm2, %v8745_v29  ;;  %7424 = vmatprep.mubr.msk.f32.mxu0 %vm7975_vm1, %v7974_v14 }
 0x7d3   : > { %7429 = vmatprep.mubr.msk.f32.mxu1 %vm7975_vm1, %v7974_v14  ;;  %7432 = vmatprep.subr.mxu0 %v7974_v14  ;;  %v5020_v27 = vpop.permute.xlu1 %5019 }
 0x7d4   : > { %7437 = vmatprep.subr.mxu1 %v7974_v14  ;;  %7430 = vmatmul.mubr.msk.f32.vlgmr.msra.gmra.mxu1 %vm497_vm2, %v4628_v5  ;;  %v4940_v29 = vpop.permute.xlu0 %4939 }
 0x7d5   : > { %7425 = vmatmul.mubr.msk.f32.vlgmr.msra.gmra.mxu0 %vm497_vm2, %v8747_v33  ;;  %7438 = vmatpush3.xpose.msk.msra.mxu1 %vm497_vm2, %v4786_v9 }
 0x7d6   : > { %7433 = vmatpush3.xpose.msk.msra.mxu0 %vm497_vm2, %v8751_v63  ;;  %7434 = vmatprep.mubr.msk.f32.mxu0 %vm7975_vm1, %v7974_v14 }
 0x7d7   : > { %7439 = vmatprep.mubr.msk.f32.mxu1 %vm7975_vm1, %v7974_v14  ;;  %7442 = vmatprep.subr.mxu0 %v7974_v14  ;;  %v5018_v11 = vpop.permute.xlu1 %5017 }
 0x7d8   : > { %7447 = vmatprep.subr.mxu1 %v7974_v14  ;;  %7440 = vmatmul.mubr.msk.f32.vlgmr.msra.gmra.mxu1 %vm497_vm2, %v4784_v57 }
 0x7d9   : > { %7435 = vmatmul.mubr.msk.f32.vlgmr.msra.gmra.mxu0 %vm497_vm2, %v4706_v34  ;;  %7448 = vmatpush3.xpose.msk.msra.mxu1 %vm497_vm2, %v4942_v25 }
 0x7da   : > { %7443 = vmatpush3.xpose.msk.msra.mxu0 %vm497_vm2, %v4864_v20  ;;  %7444 = vmatprep.mubr.msk.f32.mxu0 %vm7975_vm1, %v7974_v14 }
 0x7db   : > { %7449 = vmatprep.mubr.msk.f32.mxu1 %vm7975_vm1, %v7974_v14  ;;  %7452 = vmatprep.subr.mxu0 %v7974_v14 }
 0x7dc   : > { %7450 = vmatmul.mubr.msk.f32.vlgmr.msra.gmra.mxu1 %vm497_vm2, %v4940_v29  ;;  %7457 = vmatprep.subr.mxu1 %v7974_v14 }
 0x7dd   : > { %7445 = vmatmul.mubr.msk.f32.vlgmr.msra.gmra.mxu0 %vm497_vm2, %v4862_v0  ;;  %7459 = vmatprep.mubr.msk.f32.mxu1 %vm7975_vm1, %v7974_v14 }
 0x7de   : > { %7453 = vmatpush3.xpose.msk.msra.mxu0 %vm497_vm2, %v5020_v27  ;;  %7454 = vmatprep.mubr.msk.f32.mxu0 %vm7975_vm1, %v7974_v14 }
 0x7df   : > { %7462 = vmatprep.subr.mxu0 %v7974_v14 }
 0x7e1   : > { %7455 = vmatmul.mubr.msk.f32.vlgmr.msra.gmra.mxu0 %vm497_vm2, %v5018_v11 }
 0x7e2   : > { %7464 = vmatprep.mubr.msk.f32.mxu0 %vm7975_vm1, %v7974_v14 }
 0x87f   : > { %v8839_v33 = vpop.f32.mrf.mxu1 }
 0x881   : > { %v7381_v12 = vpop.f32.mrf.mxu1 }
 0x883   : > { %v8841_v63 = vpop.f32.mrf.mxu1 }
 0x884   : > { %v8843_v35 = vpop.f32.mrf.mxu0 }
 0x885   : > { %v7627_v8 = vpack.i.bf16 %v8843_v35, %v8839_v33  ;;  %v7391_v24 = vpop.f32.mrf.mxu1 }
 0x886   : > { %v7386_v10 = vpop.f32.mrf.mxu0 }
 0x888   : > { %v8847_v32 = vpop.f32.mrf.mxu1 }
 0x889   : > { %v8849_v37 = vpop.f32.mrf.mxu0 }
 0x88a   : > { %v7632_v42 = vpack.i.bf16 %v8849_v37, %v8841_v63  ;;  %v7401_v13 = vpop.f32.mrf.mxu1 }
 0x88b   : > { %v7396_v48 = vpop.f32.mrf.mxu0 }
 0x88c   : > { %v8853_v55 = vpop.f32.mrf.mxu1 }
 0x88d   : > { %v8855_v2 = vpop.f32.mrf.mxu0 }
 0x88e   : > { %v7652_v3 = vpack.i.bf16 %v8855_v2, %v8847_v32  ;;  %v7411_v5 = vpop.f32.mrf.mxu1 }
 0x88f   : > { %v7406_v39 = vpop.f32.mrf.mxu0 }
 0x890   : > { %v4545_v6 = vpop.f32.mrf.mxu1 }
 0x891   : > { %v8859_v38 = vpop.f32.mrf.mxu0  ;;  %v5095_v40 = vmul.f32 0.35355338, %v4545_v6 }
 0x892   : > { %v7662_v34 = vpack.i.bf16 %v8859_v38, %v8853_v55  ;;  %v7421_v22 = vpop.f32.mrf.mxu1 }
 0x893   : > { %v7416_v9 = vpop.f32.mrf.mxu0  ;;  %v5103_v36 = vsel %vm497_vm2, %v5095_v40, -inf }
 0x894   : > { %5104 = vmax.xlane.f32.xlu0 %v5103_v36  ;;  %v4701_v7 = vpop.f32.mrf.mxu1 }
 0x895   : > { %v4623_v46 = vpop.f32.mrf.mxu0  ;;  %v5097_v18 = vmul.f32 0.35355338, %v4701_v7 }
 0x896   : > { %v5096_v20 = vmul.f32 0.35355338, %v4623_v46  ;;  %v7431_v57 = vpop.f32.mrf.mxu1 }
 0x897   : > { %v7426_v60 = vpop.f32.mrf.mxu0  ;;  %v5109_v0 = vsel %vm497_vm2, %v5097_v18, -inf }
 0x898   : > { %v5106_v25 = vsel %vm497_vm2, %v5096_v20, -inf  ;;  %5110 = vmax.xlane.f32.xlu0 %v5109_v0  ;;  %v4857_v27 = vpop.f32.mrf.mxu1 }
 0x899   : > { %5107 = vmax.xlane.f32.xlu1 %v5106_v25  ;;  %v4779_v29 = vpop.f32.mrf.mxu0  ;;  %v5099_v11 = vmul.f32 0.35355338, %v4857_v27 }
 0x89a   : > { %v5098_v12 = vmul.f32 0.35355338, %v4779_v29  ;;  %v7441_v24 = vpop.f32.mrf.mxu1 }
 0x89b   : > { %v7436_v10 = vpop.f32.mrf.mxu0  ;;  %v5115_v13 = vsel %vm497_vm2, %v5099_v11, -inf }
 0x89c   : > { %v5112_v48 = vsel %vm497_vm2, %v5098_v12, -inf  ;;  %v5013_v5 = vpop.f32.mrf.mxu1 }
 0x89d   : > { %v4935_v39 = vpop.f32.mrf.mxu0  ;;  %5113 = vmax.xlane.f32.xlu0 %v5112_v48  ;;  %5116 = vmax.xlane.f32.xlu1 %v5115_v13  ;;  %v5101_v6 = vmul.f32 0.35355338, %v5013_v5 }
 0x89e   : > { %v5100_v22 = vmul.f32 0.35355338, %v4935_v39  ;;  %v7451_v9 = vpop.f32.mrf.mxu1 }
 0x89f   : > { %v7446_v36 = vpop.f32.mrf.mxu0  ;;  %v5121_v7 = vsel %vm497_vm2, %v5101_v6, -inf }
 0x8a0   : > { %v5118_v46 = vsel %vm497_vm2, %v5100_v22, -inf }
 0x8a1   : > { %v5091_v57 = vpop.f32.mrf.mxu0  ;;  %5119 = vmax.xlane.f32.xlu0 %v5118_v46  ;;  %5122 = vmax.xlane.f32.xlu1 %v5121_v7 }
 0x8a2   : > { %v5102_v60 = vmul.f32 0.35355338, %v5091_v57 }
 0x8a3   : > { %v7456_v0 = vpop.f32.mrf.mxu0 }
 0x8a4   : > { %v5124_v25 = vsel %vm497_vm2, %v5102_v60, -inf }
 0x8a5   : > { %5125 = vmax.xlane.f32.xlu0 %v5124_v25 }
 0x8b2   : > { %5191 = vrot.lane.b32.xlu1 %v8182_v19, %s7986_s24 }
 0x8b6   : > { %5343 = vrot.lane.b32.xlu1 %v8180_v17, %s7986_s24 }
 0x8ba   : > { %5419 = vrot.lane.b32.xlu1 %v8185_v21, %s7986_s24 }
 0x8bb   : > { %5267 = vrot.lane.b32.xlu0 %v8188_v23, %s7986_s24 }
 0x8be   : > { %5571 = vrot.lane.b32.xlu1 %v8197_v30, %s7986_s24 }
 0x8bf   : > { %5495 = vrot.lane.b32.xlu0 %v8192_v26, %s7986_s24 }
 0x91d   : > { %v5105_v27 = vpop.xlane.xlu0 %5104 }
 0x91e   : > { %v5127_v29 = vsub.f32 %v5095_v40, %v5105_v27 }
 0x920   : > { %v5135_v24 = vmul.f32 1.442695, %v5127_v29 }
 0x921   : > { %v5111_v10 = vpop.xlane.xlu0 %5110 }
 0x922   : > { %7789 = vpow2.f32 %v5135_v24  ;;  %v5108_v19 = vpop.xlane.xlu1 %5107  ;;  %v5129_v13 = vsub.f32 %v5097_v18, %v5111_v10 }
 0x923   : > { %v5128_v17 = vsub.f32 %v5096_v20, %v5108_v19 }
 0x924   : > { %v5139_v48 = vmul.f32 1.442695, %v5129_v13 }
 0x925   : > { %v5137_v5 = vmul.f32 1.442695, %v5128_v17 }
 0x926   : > { %7791 = vpow2.f32 %v5139_v48  ;;  %v5117_v21 = vpop.xlane.xlu1 %5116  ;;  %v5114_v39 = vpop.xlane.xlu0 %5113 }
 0x927   : > { %7793 = vpow2.f32 %v5137_v5  ;;  %v5131_v23 = vsub.f32 %v5099_v11, %v5117_v21  ;;  %v5130_v9 = vsub.f32 %v5098_v12, %v5114_v39 }
 0x929   : > { %v5143_v30 = vmul.f32 1.442695, %v5131_v23  ;;  %v5141_v36 = vmul.f32 1.442695, %v5130_v9 }
 0x92a   : > { %v5123_v7 = vpop.xlane.xlu1 %5122  ;;  %v5120_v26 = vpop.xlane.xlu0 %5119 }
 0x92b   : > { %7795 = vpow2.f32 %v5143_v30  ;;  %v5133_v40 = vsub.f32 %v5101_v6, %v5123_v7  ;;  %v5132_v46 = vsub.f32 %v5100_v22, %v5120_v26 }
 0x92c   : > { %7797 = vpow2.f32 %v5141_v36 }
 0x92d   : > { %v5147_v57 = vmul.f32 1.442695, %v5133_v40  ;;  %v5145_v0 = vmul.f32 1.442695, %v5132_v46 }
 0x92e   : > { %v5192_v18 = vpop.permute.xlu1 %5191  ;;  %v5126_v20 = vpop.xlane.xlu0 %5125 }
 0x92f   : > { %v8883_v25 = vpop.eup %7789  ;;  %7799 = vpow2.f32 %v5147_v57  ;;  %v5134_v27 = vsub.f32 %v5102_v60, %v5126_v20  ;;  %7458 = vmatpush3.msra.mxu1 %v5192_v18 }
 0x930   : > { %7801 = vpow2.f32 %v5145_v0  ;;  %v5151_v11 = vsel %vm497_vm2, %v8883_v25, 0.0  ;;  %7467 = vmatprep.subr.mxu1 %v7974_v14 }
 0x931   : > { %v5149_v12 = vmul.f32 1.442695, %v5134_v27  ;;  %5152 = vadd.xlane.f32.xlu1 %v5151_v11  ;;  %v7680_v11 = vld [vmem:[%s9358_s3] sm:$0xff]  }
 0x932   : > { %v5268_v6 = vpop.permute.xlu0 %5267 }
 0x933   : > { %v7792_v22 = vpop.eup %7791  ;;  %7803 = vpow2.f32 %v5149_v12  ;;  %7463 = vmatpush3.msra.mxu0 %v5268_v6 }
 0x934   : > { %v7794_v29 = vpop.eup %7793  ;;  %v5157_v24 = vsel %vm497_vm2, %v7792_v22, 0.0  ;;  %7472 = vmatprep.subr.mxu0 %v7974_v14 }
 0x935   : > { %v5154_v60 = vsel %vm497_vm2, %v7794_v29, 0.0  ;;  %5158 = vadd.xlane.f32.xlu1 %v5157_v24 }
 0x936   : > { %5155 = vadd.xlane.f32.xlu0 %v5154_v60 }
 0x938   : > { %v8891_v10 = vpop.eup %7795 }
 0x939   : > { %v8893_v19 = vpop.eup %7797  ;;  %v5163_v13 = vsel %vm497_vm2, %v8891_v10, 0.0 }
 0x93a   : > { %5164 = vadd.xlane.f32.xlu1 %v5163_v13  ;;  %v5160_v17 = vsel %vm497_vm2, %v8893_v19, 0.0 }
 0x93b   : > { %5161 = vadd.xlane.f32.xlu0 %v5160_v17 }
 0x93c   : > { %v8899_v48 = vpop.eup %7799 }
 0x93d   : > { %v8901_v5 = vpop.eup %7801  ;;  %v5169_v21 = vsel %vm497_vm2, %v8899_v48, 0.0 }
 0x93e   : > { %5170 = vadd.xlane.f32.xlu1 %v5169_v21  ;;  %v5166_v39 = vsel %vm497_vm2, %v8901_v5, 0.0 }
 0x93f   : > { %5167 = vadd.xlane.f32.xlu0 %v5166_v39 }
 0x940   : > { %v8907_v23 = vpop.eup %7803 }
 0x941   : > { %v5172_v9 = vsel %vm497_vm2, %v8907_v23, 0.0 }
 0x943   : > { %5173 = vadd.xlane.f32.xlu0 %v5172_v9 }
 0x94f   : > { %5723 = vrot.lane.b32.xlu1 %v8199_v31, %s7986_s24  ;;  %v5344_v31 = vpop.permute.xlu1 %5343 }
 0x953   : > { %7623 = vrot.lane.b32.xlu1 %v7622_v15, %s7987_s27  ;;  %v5420_v43 = vpop.permute.xlu1 %5419  ;;  %v5496_v15 = vpop.permute.xlu0 %5495 }
 0x957   : > { %7633 = vrot.lane.b32.xlu1 %v7632_v42, %s7988_s18 }
 0x959   : > { %5647 = vrot.lane.b32.xlu0 %v8194_v28, %s7986_s24  ;;  %v5572_v28 = vpop.permute.xlu1 %5571  ;;  %s7000_s24 = sshll.u32 %s8067_s17, 7  ;;  %s7990_s17 = smov [#allocation5]  }
 0x95a   : > { %s9312_s30 = scalar_lea.hbm %s9365_s10, %s7000_s24  ;;  %s7909_s22 = sshll.u32 %s7990_s17, 4  ;;  %s7910_s22 = int_to_ptr.vmem [resolvable:$false] %s7909_s22 }
 0x95b   : > { %7643 = vrot.lane.b32.xlu1 %v7642_v1, %s7987_s27  ;;  %s7911_s12 = scalar_lea.vmem %s7910_s22, 256 }
 0x95d   : > { %7618 = vrot.lane.b32.xlu0 %v7617_v45, %s7987_s27 }
 0x961   : > { %7628 = vrot.lane.b32.xlu0 %v7627_v8, %s7988_s18 }
 0x965   : > { %7638 = vrot.lane.b32.xlu0 %v7637_v53, %s7987_s27 }
 0x9ba   : > { %v5153_v47 = vpop.xlane.xlu1 %5152 }
 0x9bb   : > { %7805 = vrcp.f32 %v5153_v47 }
 0x9be   : > { %v5159_v49 = vpop.xlane.xlu1 %5158 }
 0x9bf   : > { %7807 = vrcp.f32 %v5159_v49  ;;  %v5156_v61 = vpop.xlane.xlu0 %5155 }
 0x9c0   : > { %7809 = vrcp.f32 %v5156_v61 }
 0x9c3   : > { %v5165_v41 = vpop.xlane.xlu1 %5164 }
 0x9c4   : > { %7811 = vrcp.f32 %v5165_v41  ;;  %v5162_v44 = vpop.xlane.xlu0 %5161 }
 0x9c5   : > { %7813 = vrcp.f32 %v5162_v44 }
 0x9c7   : > { %v5171_v45 = vpop.xlane.xlu1 %5170 }
 0x9c8   : > { %v7806_v1 = vpop.eup %7805  ;;  %7815 = vrcp.f32 %v5171_v45  ;;  %v5168_v33 = vpop.xlane.xlu0 %5167 }
 0x9c9   : > { %7817 = vrcp.f32 %v5168_v33  ;;  %v5183_v16 = vmul.f32 %v7806_v1, %v8883_v25  ;;  %v7679_v25 = vld [vmem:[%s9358_s3 + $0x8] sm:$0xff]  }
 0x9cb   : > { %7460 = vmatmul.mubr.msk.f32.vlgmr.msra.gmra.mxu1 %vm497_vm2, %v5183_v16  ;;  %v5724_v0 = vpop.permute.xlu1 %5723 }
 0x9cc   : > { %v7808_v51 = vpop.eup %7807  ;;  %v5174_v53 = vpop.xlane.xlu0 %5173  ;;  %7468 = vmatpush3.msra.mxu1 %v5344_v31  ;;  %7469 = vmatprep.mubr.msk.f32.mxu1 %vm7975_vm1, %v7974_v14 }
 0x9cd   : > { %v7810_v63 = vpop.eup %7809  ;;  %7819 = vrcp.f32 %v5174_v53  ;;  %7477 = vmatprep.subr.mxu1 %v7974_v14  ;;  %v5185_v35 = vmul.f32 %v7808_v51, %v7792_v22 }
 0x9ce   : > { %v5184_v8 = vmul.f32 %v7810_v63, %v7794_v29 }
 0x9cf   : > { %7470 = vmatmul.mubr.msk.f32.vlgmr.msra.gmra.mxu1 %vm497_vm2, %v5185_v35 }
 0x9d0   : > { %7465 = vmatmul.mubr.msk.f32.vlgmr.msra.gmra.mxu0 %vm497_vm2, %v5184_v8  ;;  %7478 = vmatpush3.msra.mxu1 %v5496_v15  ;;  %v5648_v7 = vpop.permute.xlu0 %5647  ;;  %v7624_v15 = vpop.permute.xlu1 %7623 }
 0x9d1   : > { %v7812_v37 = vpop.eup %7811  ;;  %7473 = vmatpush3.msra.mxu0 %v5420_v43  ;;  %7479 = vmatprep.mubr.msk.f32.mxu1 %vm7975_vm1, %v7974_v14  ;;  %v7626_v45 = vunpack.i.h.bf16 %v7624_v15  ;;  %v7625_v1 = vunpack.i.l.bf16 %v7624_v15 }
 0x9d2   : > { %v7814_v42 = vpop.eup %7813  ;;  %7474 = vmatprep.mubr.msk.f32.mxu0 %vm7975_vm1, %v7974_v14  ;;  %7482 = vmatprep.subr.mxu0 %v7974_v14  ;;  %v5187_v30 = vmul.f32 %v7812_v37, %v8891_v10 }
 0x9d3   : > { %7487 = vmatprep.subr.mxu1 %v7974_v14  ;;  %v5186_v36 = vmul.f32 %v7814_v42, %v8893_v19 }
 0x9d4   : > { %7480 = vmatmul.mubr.msk.f32.vlgmr.msra.gmra.mxu1 %vm497_vm2, %v5187_v30  ;;  %v7619_v47 = vpop.permute.xlu0 %7618  ;;  %v7634_v2 = vpop.permute.xlu1 %7633 }
 0x9d5   : > { %v7816_v26 = vpop.eup %7815  ;;  %7475 = vmatmul.mubr.msk.f32.vlgmr.msra.gmra.mxu0 %vm497_vm2, %v5186_v36  ;;  %7488 = vmatpush3.msra.mxu1 %v5648_v7  ;;  %v7621_v49 = vunpack.i.h.bf16 %v7619_v47  ;;  %v7620_v61 = vunpack.i.l.bf16 %v7619_v47  ;;  %v7636_v35 = vunpack.i.h.bf16 %v7634_v2  ;;  %v7635_v8 = vunpack.i.l.bf16 %v7634_v2 }
 0x9d6   : > { %v7818_v40 = vpop.eup %7817  ;;  %7483 = vmatpush3.msra.mxu0 %v5572_v28  ;;  %7484 = vmatprep.mubr.msk.f32.mxu0 %vm7975_vm1, %v7974_v14  ;;  %v5189_v46 = vmul.f32 %v7816_v26, %v8899_v48 }
 0x9d7   : > { %7489 = vmatprep.mubr.msk.f32.mxu1 %vm7975_vm1, %v7974_v14  ;;  %7492 = vmatprep.subr.mxu0 %v7974_v14  ;;  %v5188_v57 = vmul.f32 %v7818_v40, %v8901_v5  ;;  %v5896_v38 = vsel %vm497_vm2, %v8447_v54, %v7621_v49  ;;  %v5898_v54 = vsel %vm497_vm2, %v8449_v56, %v7626_v45 }
 0x9d8   : > { %7490 = vmatmul.mubr.msk.f32.vlgmr.msra.gmra.mxu1 %vm497_vm2, %v5189_v46  ;;  %7497 = vmatprep.subr.bf16.mxu1 %v7679_v25  ;;  %v7629_v32 = vpop.permute.xlu0 %7628  ;;  %v7644_v33 = vpop.permute.xlu1 %7643 }
 0x9d9   : > { %7485 = vmatmul.mubr.msk.f32.vlgmr.msra.gmra.mxu0 %vm497_vm2, %v5188_v57  ;;  %7498 = vmatpush3.bf16.msra.mxu1 %v7679_v25  ;;  %v7631_v41 = vunpack.i.h.bf16 %v7629_v32  ;;  %v7630_v44 = vunpack.i.l.bf16 %v7629_v32 }
 0x9da   : > { %v7820_v18 = vpop.eup %7819  ;;  %7493 = vmatpush3.msra.mxu0 %v5724_v0  ;;  %7494 = vmatprep.mubr.msk.f32.mxu0 %vm7975_vm1, %v7974_v14 }
 0x9db   : > { %v5190_v20 = vmul.f32 %v7820_v18, %v8907_v23  ;;  %7499 = vmatprep.subr.bf16.mxu1 %v7680_v11  ;;  %v5905_v63 = vsel %vm5903_vm3, %v5896_v38, %v7631_v41  ;;  %v5907_v18 = vsel %vm5903_vm3, %v5898_v54, %v7636_v35 }
 0x9dd   : > { %7495 = vmatmul.mubr.msk.f32.vlgmr.msra.gmra.mxu0 %vm497_vm2, %v5190_v20  ;;  %7500 = vmatpush3.bf16.msra.mxu1 %v7680_v11  ;;  %v7646_v11 = vunpack.i.h.bf16 %v7644_v33 }
 0xa8b   : > { %v5263_v27 = vpop.f32.mrf.mxu1 }
 0xa8d   : > { %v7461_v12 = vpop.f32.mrf.mxu1 }
 0xa8e   : > { %v7645_v12 = vunpack.i.l.bf16 %v7644_v33 }
 0xa8f   : > { %v5415_v6 = vpop.f32.mrf.mxu1 }
 0xa90   : > { %v5339_v22 = vpop.f32.mrf.mxu0 }
 0xa91   : > { %v7647_v29 = vpack.i.bf16 %v5339_v22, %v5263_v27  ;;  %v7471_v24 = vpop.f32.mrf.mxu1 }
 0xa92   : > { %v7466_v60 = vpop.f32.mrf.mxu0 }
 0xa93   : > { %7648 = vrot.lane.b32.xlu0 %v7647_v29, %s7989_s23 }
 0xa94   : > { %v5567_v10 = vpop.f32.mrf.mxu1 }
 0xa95   : > { %v5491_v19 = vpop.f32.mrf.mxu0 }
 0xa96   : > { %v7657_v13 = vpack.i.bf16 %v5491_v19, %v5415_v6  ;;  %v7481_v17 = vpop.f32.mrf.mxu1 }
 0xa97   : > { %v7476_v48 = vpop.f32.mrf.mxu0  ;;  %7653 = vrot.lane.b32.xlu0 %v7652_v3, %s7988_s18  ;;  %v7639_v3 = vpop.permute.xlu0 %7638 }
 0xa98   : > { %7658 = vrot.lane.b32.xlu1 %v7657_v13, %s7989_s23  ;;  %v5719_v5 = vpop.f32.mrf.mxu1  ;;  %v7641_v26 = vunpack.i.h.bf16 %v7639_v3  ;;  %v7640_v40 = vunpack.i.l.bf16 %v7639_v3  ;;  %v9021_v3 = vld [vmem:[%s9359_s4] sm:$0x3f] }
 0xa99   : > { %v5643_v21 = vpop.f32.mrf.mxu0 }
 0xa9a   : > { %v7667_v39 = vpack.i.bf16 %v5643_v21, %v5567_v10  ;;  %v7491_v23 = vpop.f32.mrf.mxu1  ;;  %v5900_v29 = vsel %vm497_vm2, %v8455_v62, %v7641_v26  ;;  %v5899_v24 = vsel %vm497_vm2, %v8451_v59, %v7640_v40  ;;  %v5902_v62 = vsel %vm497_vm2, %v8458_v4, %v7646_v11 }
 0xa9b   : > { %v7486_v9 = vpop.f32.mrf.mxu0  ;;  %v5901_v59 = vsel %vm497_vm2, %v8453_v58, %v7645_v12  ;;  %v5929_v4 = vlaneseq  ;;  %v7875_v12 = vld [vmem:[%s8147_s11 + $0x28] sm:$0xff] }
 0xa9c   : > { %7663 = vrot.lane.b32.xlu1 %v7662_v34, %s7988_s18  ;;  %7668 = vrot.lane.b32.xlu0 %v7667_v39, %s7989_s23  ;;  %v5895_v34 = vsel %vm497_vm2, %v8443_v50, %v7620_v61  ;;  %v5897_v50 = vsel %vm497_vm2, %v8445_v52, %v7625_v1 }
 0xa9d   : > { %v5795_v31 = vpop.f32.mrf.mxu0  ;;  %v5904_v53 = vsel %vm5903_vm3, %v5895_v34, %v7630_v44  ;;  %v5906_v0 = vsel %vm5903_vm3, %v5897_v50, %v7635_v8  ;;  %v9015_v2 = vshrl.u32 %v5929_v4, 7  ;;  %v7871_v8 = vld [vmem:[%s8147_s11 + $0x8] sm:$0xff] }
 0xa9e   : > { %v7672_v43 = vpack.i.bf16 %v5795_v31, %v5719_v5 }
 0xa9f   : > { %v7496_v28 = vpop.f32.mrf.mxu0  ;;  %v5931_v58 = vsub.s32 0, %v9015_v2 }
 0xaa0   : > { %7673 = vrot.lane.b32.xlu1 %v7672_v43, %s7989_s23 }
 0xaa1   : > { %v5932_v49 = vrot.slane %v9021_v3, %v5931_v58 }
 0xb05   : > { %v7649_v55 = vpop.permute.xlu0 %7648 }
 0xb06   : > { %v7651_v16 = vunpack.i.h.bf16 %v7649_v55  ;;  %v7650_v51 = vunpack.i.l.bf16 %v7649_v55  ;;  %v7869_v55 = vld [vmem:[%s8147_s11] sm:$0xff] }
 0xb08   : > { %v5913_v37 = vsel %vm5912_vm4, %v5904_v53, %v7650_v51  ;;  %v5914_v42 = vsel %vm5912_vm4, %v5905_v63, %v7651_v16  ;;  %v7870_v16 = vld [vmem:[%s8147_s11 + $0x10] sm:$0xff] }
 0xb09   : > { %v5921_v30 = vpack.c.bf16 %v5914_v42, %v5913_v37  ;;  %v7654_v36 = vpop.permute.xlu0 %7653  ;;  %v7872_v42 = vld [vmem:[%s8147_s11 + $0x18] sm:$0xff] }
 0xb0a   : > { %v7659_v7 = vpop.permute.xlu1 %7658  ;;  %v7656_v20 = vunpack.i.h.bf16 %v7654_v36  ;;  %v7655_v25 = vunpack.i.l.bf16 %v7654_v36 }
 0xb0b   : > { %v7661_v46 = vunpack.i.h.bf16 %v7659_v7  ;;  %v7660_v57 = vunpack.i.l.bf16 %v7659_v7  ;;  %7501 = vmatprep.mubr.msk.bf16.mxu1 %vm416_vm0, %v5921_v30 }
 0xb0c   : > { %v5908_v19 = vsel %vm5903_vm3, %v5899_v24, %v7655_v25  ;;  %v5909_v13 = vsel %vm5903_vm3, %v5900_v29, %v7656_v20  ;;  %v7874_v20 = vld [vmem:[%s8147_s11 + $0x30] sm:$0xff] }
 0xb0d   : > { %v5916_v27 = vsel %vm5912_vm4, %v5907_v18, %v7661_v46  ;;  %v5915_v56 = vsel %vm5912_vm4, %v5906_v0, %v7660_v57  ;;  %v7873_v46 = vld [vmem:[%s8147_s11 + $0x20] sm:$0xff] }
 0xb0e   : > { %v5922_v52 = vpack.c.bf16 %v5916_v27, %v5915_v56  ;;  %v7664_v6 = vpop.permute.xlu1 %7663  ;;  %v7669_v22 = vpop.permute.xlu0 %7668 }
 0xb0f   : > { %v7671_v60 = vunpack.i.h.bf16 %v7669_v22  ;;  %v7670_v10 = vunpack.i.l.bf16 %v7669_v22  ;;  %v7666_v17 = vunpack.i.h.bf16 %v7664_v6  ;;  %v7665_v48 = vunpack.i.l.bf16 %v7664_v6  ;;  %v7876_v6 = vld [vmem:[%s8147_s11 + $0x38] sm:$0xff]  ;;  %s6870_s11 = sshll.u32 %s8143_s19, 3 }
 0xb10   : > { %7502 = vmatmul.mubr.msk.bf16.vlgmr.msra.gmra.mxu1 %vm416_vm0, %v5922_v52  ;;  %s377_s27 = scalar_lea.vmem [#allocation5], %s6870_s11 }
 0xb11   : > { %v5917_v5 = vsel %vm5912_vm4, %v5908_v19, %v7670_v10  ;;  %v5918_v21 = vsel %vm5912_vm4, %v5909_v13, %v7671_v60  ;;  %v5911_v43 = vsel %vm5903_vm3, %v5902_v62, %v7666_v17  ;;  %v5910_v28 = vsel %vm5903_vm3, %v5901_v59, %v7665_v48  ;;  %s6792_s18 = sshll.u32 %s377_s27, 4  ;;  %s9314_s18 = int_to_ptr.vmem [resolvable:$true] %s6792_s18 }
 0xb12   : > { %v5923_v39 = vpack.c.bf16 %v5918_v21, %v5917_v5  ;;  %v7674_v23 = vpop.permute.xlu1 %7673  ;;  %s7905_s23 = scalar_lea.vmem %s9314_s18, 128  ;;  %p7912_p5 = scmp.lt.s32.totalorder %s9314_s18, %s7910_s22 }
 0xb13   : > { %v7676_v9 = vunpack.i.h.bf16 %v7674_v23  ;;  %v7675_v31 = vunpack.i.l.bf16 %v7674_v23  ;;  %p7906_p11 = scmp.ne.s32.totalorder %s9314_s18, %s7905_s23  ;;  %p7913_p7 = scmp.lt.s32.totalorder %s7911_s12, %s7905_s23 }
 0xb14   : > { %7505 = vmatprep.mubr.msk.bf16.mxu1 %vm416_vm0, %v5923_v39 }
 0xb15   : > { %v5920_v47 = vsel %vm5912_vm4, %v5911_v43, %v7676_v9  ;;  %v5919_v15 = vsel %vm5912_vm4, %v5910_v28, %v7675_v31  ;;  %p7907_p13 = pnand %p7906_p11, %p9380_p12  ;;  %p7914_p8 = por %p7913_p7, %p7912_p5 }
 0xb16   : > { %v5924_v32 = vpack.c.bf16 %v5920_v47, %v5919_v15 }
 0xb17   : > { %p7908_p4 = pneg %p7907_p13 }
 0xb18   : > { %7506 = vmatmul.mubr.msk.bf16.gmra.mxu1 %vm416_vm0, %v5924_v32 }
 0xb19   : > { %p7915_p10 = pnand %p7914_p8, %p7908_p4 }
 0xbd0   : > { %v7503_v61 = vpop.f32.mrf.mxu1 }
 0xbd1   : > { %v6000_v44 = vadd.f32 %v7503_v61, %v5932_v49 }
 0xbd2   : > { %v5991_v41 = vpop.f32.mrf.mxu1 }
 0xbd3   : > { %v5992_v45 = vadd.f32 %v5991_v41, %v5932_v49  ;;  %v6024_v51 = vadd.f32 %v7870_v16, %v6000_v44 }
 0xbd4   : > { %v7504_v1 = vpop.f32.mrf.mxu1 }
 0xbd5   : > { %v6022_v38 = vadd.f32 %v7869_v55, %v5992_v45  ;;  %v6003_v34 = vadd.f32 %v7504_v1, %v5932_v49  ;;  %v6036_v26 = vsel %vm416_vm0, %v6024_v51, 0.0 }
 0xbd6   : > { %v5994_v33 = vpop.f32.mrf.mxu1 }
 0xbd7   : > { %v5995_v53 = vadd.f32 %v5994_v33, %v5932_v49  ;;  %v6030_v63 = vsel %vm416_vm0, %v6022_v38, 0.0  ;;  %v6025_v30 = vadd.f32 %v7872_v42, %v6003_v34 }
 0xbd8   : > { %v7507_v35 = vpop.f32.mrf.mxu1  ;;  %6031 = vadd.xlane.f32.xlu0 %v6030_v63 }
 0xbd9   : > { %v6023_v37 = vadd.f32 %v7871_v8, %v5995_v53  ;;  %v6016_v54 = vadd.f32 %v7507_v35, %v5932_v49  ;;  %v6039_v18 = vsel %vm416_vm0, %v6025_v30, 0.0 }
 0xbda   : > { %v6007_v36 = vpop.f32.mrf.mxu1 }
 0xbdb   : > { %v6008_v50 = vadd.f32 %v6007_v36, %v5932_v49  ;;  %v6033_v7 = vsel %vm416_vm0, %v6023_v37, 0.0  ;;  %v6028_v25 = vadd.f32 %v7874_v20, %v6016_v54  ;;  %v7681_v54 = vld [vmem:[%s9360_s5 + $0x8] sm:$0xff]  }
 0xbdc   : > { %v7508_v40 = vpop.f32.mrf.mxu1  ;;  %6034 = vadd.xlane.f32.xlu1 %v6033_v7  ;;  %6037 = vadd.xlane.f32.xlu0 %v6036_v26 }
 0xbdd   : > { %v6026_v57 = vadd.f32 %v7873_v46, %v6008_v50  ;;  %v6019_v27 = vadd.f32 %v7508_v40, %v5932_v49  ;;  %v6048_v29 = vsel %vm416_vm0, %v6028_v25, 0.0  ;;  %7509 = vmatprep.subr.bf16.mxu0 %v7681_v54  ;;  %v7682_v50 = vld [vmem:[%s9360_s5] sm:$0xff]  }
 0xbde   : > { %v6010_v0 = vpop.f32.mrf.mxu1  ;;  %7510 = vmatpush3.bf16.msra.mxu0 %v7681_v54 }
 0xbdf   : > { %v6011_v56 = vadd.f32 %v6010_v0, %v5932_v49  ;;  %v6042_v11 = vsel %vm416_vm0, %v6026_v57, 0.0  ;;  %v6029_v22 = vadd.f32 %v7876_v6, %v6019_v27  ;;  %7511 = vmatprep.subr.bf16.mxu0 %v7682_v50 }
 0xbe0   : > { %6043 = vadd.xlane.f32.xlu1 %v6042_v11  ;;  %6040 = vadd.xlane.f32.xlu0 %v6039_v18 }
 0xbe1   : > { %v6027_v52 = vadd.f32 %v7875_v12, %v6011_v56  ;;  %v6051_v60 = vsel %vm416_vm0, %v6029_v22, 0.0 }
 0xbe2   : > { %7512 = vmatpush3.bf16.msra.mxu0 %v7682_v50 }
 0xbe3   : > { %v6045_v24 = vsel %vm416_vm0, %v6027_v52, 0.0  ;;  %7545 = vmatprep.subr.bf16.mxu0 %v7974_v14 }
 0xbe4   : > { %6049 = vadd.xlane.f32.xlu1 %v6048_v29  ;;  %6046 = vadd.xlane.f32.xlu0 %v6045_v24 }
 0xbe8   : > { %6052 = vadd.xlane.f32.xlu0 %v6051_v60 }
 0xc61   : > { %v6032_v10 = vpop.xlane.xlu0 %6031 }
 0xc62   : > { %v6055_v19 = vmul.f32 0.03125, %v6032_v10 }
 0xc64   : > { %v9040_v13 = vsub.f32 %v6022_v38, %v6055_v19 }
 0xc65   : > { %v6035_v17 = vpop.xlane.xlu1 %6034  ;;  %v6038_v48 = vpop.xlane.xlu0 %6037 }
 0xc66   : > { %v6056_v5 = vmul.f32 0.03125, %v6035_v17  ;;  %v6057_v21 = vmul.f32 0.03125, %v6038_v48  ;;  %v6071_v39 = vmul.f32 %v9040_v13, %v9040_v13  ;;  %v6137_v17 = vsub.s32 1, %v9015_v2 }
 0xc68   : > { %v9044_v23 = vsub.f32 %v6023_v37, %v6056_v5  ;;  %v9046_v62 = vsub.f32 %v6024_v51, %v6057_v21  ;;  %v6079_v59 = vsel %vm416_vm0, %v6071_v39, 0.0 }
 0xc69   : > { %v6044_v9 = vpop.xlane.xlu1 %6043  ;;  %6080 = vadd.xlane.f32.xlu1 %v6079_v59  ;;  %v6041_v31 = vpop.xlane.xlu0 %6040 }
 0xc6a   : > { %v6059_v43 = vmul.f32 0.03125, %v6044_v9  ;;  %v6058_v28 = vmul.f32 0.03125, %v6041_v31  ;;  %v6072_v47 = vmul.f32 %v9044_v23, %v9044_v23  ;;  %v6073_v15 = vmul.f32 %v9046_v62, %v9046_v62 }
 0xc6b   : > { %v6138_v9 = vrot.slane %v9021_v3, %v6137_v17  ;;  %v6149_v31 = vsub.s32 2, %v9015_v2 }
 0xc6c   : > { %v9053_v32 = vsub.f32 %v6026_v57, %v6059_v43  ;;  %v9055_v4 = vsub.f32 %v6025_v30, %v6058_v28  ;;  %v6082_v58 = vsel %vm416_vm0, %v6072_v47, 0.0  ;;  %v6085_v49 = vsel %vm416_vm0, %v6073_v15, 0.0 }
 0xc6d   : > { %v6050_v61 = vpop.xlane.xlu1 %6049  ;;  %6083 = vadd.xlane.f32.xlu0 %v6082_v58  ;;  %6086 = vadd.xlane.f32.xlu1 %v6085_v49  ;;  %v6047_v41 = vpop.xlane.xlu0 %6046  ;;  %v6150_v15 = vrot.slane %v9021_v3, %v6149_v31 }
 0xc6e   : > { %v6061_v44 = vmul.f32 0.03125, %v6050_v61  ;;  %v6060_v45 = vmul.f32 0.03125, %v6047_v41  ;;  %v6075_v1 = vmul.f32 %v9053_v32, %v9053_v32  ;;  %v6074_v55 = vmul.f32 %v9055_v4, %v9055_v4 }
 0xc70   : > { %v9063_v38 = vsub.f32 %v6028_v25, %v6061_v44  ;;  %v9065_v34 = vsub.f32 %v6027_v52, %v6060_v45  ;;  %v6091_v33 = vsel %vm416_vm0, %v6075_v1, 0.0  ;;  %v6088_v16 = vsel %vm416_vm0, %v6074_v55, 0.0 }
 0xc71   : > { %6092 = vadd.xlane.f32.xlu1 %v6091_v33  ;;  %6089 = vadd.xlane.f32.xlu0 %v6088_v16  ;;  %v6053_v51 = vpop.xlane.xlu0 %6052 }
 0xc72   : > { %v6062_v53 = vmul.f32 0.03125, %v6053_v51  ;;  %v6077_v63 = vmul.f32 %v9063_v38, %v9063_v38  ;;  %v6076_v35 = vmul.f32 %v9065_v34, %v9065_v34 }
 0xc74   : > { %v9073_v8 = vsub.f32 %v6029_v22, %v6062_v53  ;;  %v6097_v37 = vsel %vm416_vm0, %v6077_v63, 0.0  ;;  %v6094_v42 = vsel %vm416_vm0, %v6076_v35, 0.0 }
 0xc75   : > { %6098 = vadd.xlane.f32.xlu1 %v6097_v37  ;;  %6095 = vadd.xlane.f32.xlu0 %v6094_v42 }
 0xc76   : > { %v6078_v30 = vmul.f32 %v9073_v8, %v9073_v8 }
 0xc78   : > { %v6100_v36 = vsel %vm416_vm0, %v6078_v30, 0.0 }
 0xc79   : > { %6101 = vadd.xlane.f32.xlu0 %v6100_v36 }
 0xcf2   : > { %v6081_v7 = vpop.xlane.xlu1 %6080 }
 0xcf3   : > { %v6103_v26 = vmul.f32 0.03125, %v6081_v7 }
 0xcf5   : > { %v6111_v40 = vadd.f32 1e-05, %v6103_v26 }
 0xcf6   : > { %v6087_v46 = vpop.xlane.xlu1 %6086  ;;  %v6084_v57 = vpop.xlane.xlu0 %6083 }
 0xcf7   : > { %7821 = vrsqrt.f32 %v6111_v40  ;;  %v6105_v0 = vmul.f32 0.03125, %v6087_v46  ;;  %v6104_v18 = vmul.f32 0.03125, %v6084_v57  ;;  %v7683_v46 = vld [vmem:[%s9362_s7 + $0x38] sm:$0xff]   ;;  %v7684_v57 = vld [vmem:[%s9362_s7 + $0x30] sm:$0xff]  }
 0xcf8   : > { %7521 = vmatprep.subr.bf16.mxu1 %v7683_v46 }
 0xcf9   : > { %v6113_v20 = vadd.f32 1e-05, %v6105_v0  ;;  %v6112_v25 = vadd.f32 1e-05, %v6104_v18  ;;  %7522 = vmatpush3.bf16.msra.mxu1 %v7683_v46  ;;  %v7685_v0 = vld [vmem:[%s9362_s7 + $0x28] sm:$0xff]   ;;  %v7686_v18 = vld [vmem:[%s9362_s7 + $0x20] sm:$0xff]  }
 0xcfa   : > { %v6093_v27 = vpop.xlane.xlu1 %6092  ;;  %v6090_v56 = vpop.xlane.xlu0 %6089  ;;  %7523 = vmatprep.subr.bf16.mxu1 %v7684_v57 }
 0xcfb   : > { %7823 = vrsqrt.f32 %v6113_v20  ;;  %v6107_v11 = vmul.f32 0.03125, %v6093_v27  ;;  %v6106_v12 = vmul.f32 0.03125, %v6090_v56  ;;  %v7687_v20 = vld [vmem:[%s9362_s7 + $0x18] sm:$0xff]   ;;  %v7689_v27 = vld [vmem:[%s9362_s7 + $0x8] sm:$0xff]   ;;  %v7690_v56 = vld [vmem:[%s9362_s7] sm:$0xff]  }
 0xcfc   : > { %7825 = vrsqrt.f32 %v6112_v25  ;;  %v7688_v25 = vld [vmem:[%s9362_s7 + $0x10] sm:$0xff]  }
 0xcfd   : > { %v6115_v52 = vadd.f32 1e-05, %v6107_v11  ;;  %v6114_v6 = vadd.f32 1e-05, %v6106_v12  ;;  %7524 = vmatpush3.bf16.msra.mxu1 %v7684_v57  ;;  %v6980_v11 = vld [vmem:[%s9361_s6] ss:$0 sm:$0xff] }
 0xcfe   : > { %v6099_v22 = vpop.xlane.xlu1 %6098  ;;  %v6096_v29 = vpop.xlane.xlu0 %6095  ;;  %7525 = vmatprep.subr.bf16.mxu1 %v7685_v0 }
 0xcff   : > { %7827 = vrsqrt.f32 %v6115_v52  ;;  %v6109_v24 = vmul.f32 0.03125, %v6099_v22  ;;  %v6108_v60 = vmul.f32 0.03125, %v6096_v29 }
 0xd00   : > { %7829 = vrsqrt.f32 %v6114_v6 }
 0xd01   : > { %v6117_v10 = vadd.f32 1e-05, %v6109_v24  ;;  %v6116_v19 = vadd.f32 1e-05, %v6108_v60  ;;  %7526 = vmatpush3.bf16.msra.mxu1 %v7685_v0 }
 0xd02   : > { %v6102_v48 = vpop.xlane.xlu0 %6101  ;;  %7527 = vmatprep.subr.bf16.mxu1 %v7686_v18 }
 0xd03   : > { %7831 = vrsqrt.f32 %v6117_v10  ;;  %v6110_v5 = vmul.f32 0.03125, %v6102_v48 }
 0xd04   : > { %v7822_v21 = vpop.eup %7821  ;;  %7833 = vrsqrt.f32 %v6116_v19 }
 0xd05   : > { %v6118_v39 = vadd.f32 1e-05, %v6110_v5  ;;  %v6127_v59 = vmul.f32 %v7822_v21, %v9040_v13  ;;  %7528 = vmatpush3.bf16.msra.mxu1 %v7686_v18 }
 0xd06   : > { %7529 = vmatprep.subr.bf16.mxu1 %v7687_v20 }
 0xd07   : > { %7835 = vrsqrt.f32 %v6118_v39  ;;  %v6139_v47 = vmul.f32 %v6138_v9, %v6127_v59 }
 0xd08   : > { %v7824_v43 = vpop.eup %7823 }
 0xd09   : > { %v7826_v28 = vpop.eup %7825  ;;  %v6129_v58 = vmul.f32 %v7824_v43, %v9046_v62  ;;  %v9094_v45 = vadd.f32 %v6150_v15, %v6139_v47  ;;  %7530 = vmatpush3.bf16.msra.mxu1 %v7687_v20 }
 0xd0a   : > { %v6128_v49 = vmul.f32 %v7826_v28, %v9044_v23  ;;  %7531 = vmatprep.subr.bf16.mxu1 %v7688_v25 }
 0xd0b   : > { %v6141_v55 = vmul.f32 %v6138_v9, %v6129_v58 }
 0xd0c   : > { %v7828_v61 = vpop.eup %7827  ;;  %v6140_v41 = vmul.f32 %v6138_v9, %v6128_v49 }
 0xd0d   : > { %v7830_v44 = vpop.eup %7829  ;;  %v6131_v33 = vmul.f32 %v7828_v61, %v9053_v32  ;;  %v9104_v63 = vadd.f32 %v6150_v15, %v6141_v55  ;;  %7532 = vmatpush3.bf16.msra.mxu1 %v7688_v25 }
 0xd0e   : > { %v6130_v13 = vmul.f32 %v7830_v44, %v9055_v4  ;;  %v9097_v1 = vadd.f32 %v6150_v15, %v6140_v41  ;;  %7533 = vmatprep.subr.bf16.mxu1 %v7689_v27 }
 0xd0f   : > { %v6143_v37 = vmul.f32 %v6138_v9, %v6131_v33 }
 0xd10   : > { %v7832_v16 = vpop.eup %7831  ;;  %v6159_v51 = vpack.c.bf16 %v9097_v1, %v9094_v45  ;;  %v6142_v53 = vmul.f32 %v6138_v9, %v6130_v13 }
 0xd11   : > { %v7834_v62 = vpop.eup %7833  ;;  %v6133_v23 = vmul.f32 %v7832_v16, %v9063_v38  ;;  %v9113_v38 = vadd.f32 %v6150_v15, %v6143_v37  ;;  %7534 = vmatpush3.bf16.msra.mxu1 %v7689_v27 }
 0xd12   : > { %7513 = vmatprep.mubr.msk.bf16.mxu0 %vm416_vm0, %v6159_v51  ;;  %v9106_v35 = vadd.f32 %v6150_v15, %v6142_v53  ;;  %v6132_v4 = vmul.f32 %v7834_v62, %v9065_v34  ;;  %7535 = vmatprep.subr.bf16.mxu1 %v7690_v56 }
 0xd13   : > { %v6145_v54 = vmul.f32 %v6138_v9, %v6133_v23 }
 0xd14   : > { %v7836_v42 = vpop.eup %7835  ;;  %v6160_v32 = vpack.c.bf16 %v9106_v35, %v9104_v63  ;;  %v6144_v30 = vmul.f32 %v6138_v9, %v6132_v4 }
 0xd15   : > { %v6134_v36 = vmul.f32 %v7836_v42, %v9073_v8  ;;  %v9119_v34 = vadd.f32 %v6150_v15, %v6145_v54  ;;  %7536 = vmatpush3.bf16.msra.mxu1 %v7690_v56 }
 0xd16   : > { %7514 = vmatmul.mubr.msk.bf16.vlgmr.msra.gmra.mxu0 %vm416_vm0, %v6160_v32  ;;  %v9115_v50 = vadd.f32 %v6150_v15, %v6144_v30 }
 0xd17   : > { %v6146_v7 = vmul.f32 %v6138_v9, %v6134_v36 }
 0xd18   : > { %v6161_v26 = vpack.c.bf16 %v9115_v50, %v9113_v38 }
 0xd19   : > { %v9121_v40 = vadd.f32 %v6150_v15, %v6146_v7 }
 0xd1a   : > { %7517 = vmatprep.mubr.msk.bf16.mxu0 %vm416_vm0, %v6161_v26 }
 0xd1b   : > { %v6162_v8 = vpack.c.bf16 %v9121_v40, %v9119_v34 }
 0xd1e   : > { %7518 = vmatmul.mubr.msk.bf16.gmra.mxu0 %vm416_vm0, %v6162_v8 }
 0xd1f   : > { %7549 = vmatprep.mubr.msk.bf16.mxu0 %vm7975_vm1, %v7974_v14 }
 0xdd6   : > { %v7515_v12 = vpop.f32.mrf.mxu0 }
 0xdd7   : > { %v9156_v52 = vadd.f32 %v7515_v12, %v6980_v11 }
 0xdd8   : > { %v6232_v6 = vpop.f32.mrf.mxu0 }
 0xdd9   : > { %v6265_v22 = vmul.f32 %v9156_v52, %v9156_v52  ;;  %v9160_v29 = vadd.f32 %v6980_v11, %v6232_v6 }
 0xdda   : > { %v7516_v24 = vpop.f32.mrf.mxu0 }
 0xddb   : > { %v6273_v60 = vmul.f32 %v6265_v22, %v9156_v52  ;;  %v6263_v10 = vmul.f32 %v9160_v29, %v9160_v29  ;;  %v9165_v19 = vadd.f32 %v7516_v24, %v6980_v11 }
 0xddc   : > { %v6235_v17 = vpop.f32.mrf.mxu0 }
 0xddd   : > { %v6281_v48 = vmul.f32 0.044715, %v6273_v60  ;;  %v6271_v5 = vmul.f32 %v6263_v10, %v9160_v29  ;;  %v6266_v21 = vmul.f32 %v9165_v19, %v9165_v19  ;;  %v9170_v39 = vadd.f32 %v6980_v11, %v6235_v17 }
 0xdde   : > { %v7519_v59 = vpop.f32.mrf.mxu0 }
 0xddf   : > { %v6289_v9 = vadd.f32 %v6281_v48, %v9156_v52  ;;  %v6279_v31 = vmul.f32 0.044715, %v6271_v5  ;;  %v6274_v43 = vmul.f32 %v6266_v21, %v9165_v19  ;;  %v6264_v28 = vmul.f32 %v9170_v39, %v9170_v39 }
 0xde0   : > { %v9176_v47 = vadd.f32 %v7519_v59, %v6980_v11  ;;  %v6248_v15 = vpop.f32.mrf.mxu0 }
 0xde1   : > { %v6297_v58 = vmul.f32 0.7978846, %v6289_v9  ;;  %v6287_v49 = vadd.f32 %v6279_v31, %v9160_v29  ;;  %v6282_v61 = vmul.f32 0.044715, %v6274_v43  ;;  %v6272_v41 = vmul.f32 %v6264_v28, %v9170_v39 }
 0xde2   : > { %v6269_v44 = vmul.f32 %v9176_v47, %v9176_v47  ;;  %v9182_v13 = vadd.f32 %v6980_v11, %v6248_v15  ;;  %v7520_v55 = vpop.f32.mrf.mxu0 }
 0xde3   : > { %v6295_v33 = vmul.f32 0.7978846, %v6287_v49  ;;  %v6290_v16 = vadd.f32 %v6282_v61, %v9165_v19  ;;  %v6280_v51 = vmul.f32 0.044715, %v6272_v41  ;;  %7837 = vtanh.f32 %v6297_v58 }
 0xde4   : > { %v6277_v53 = vmul.f32 %v6269_v44, %v9176_v47  ;;  %v6267_v62 = vmul.f32 %v9182_v13, %v9182_v13  ;;  %v6260_v23 = vadd.f32 %v7520_v55, %v6980_v11  ;;  %v6251_v4 = vpop.f32.mrf.mxu0 }
 0xde5   : > { %7839 = vtanh.f32 %v6295_v33  ;;  %v6298_v37 = vmul.f32 0.7978846, %v6290_v16  ;;  %v6288_v42 = vadd.f32 %v6280_v51, %v9170_v39  ;;  %v6252_v32 = vadd.f32 %v6980_v11, %v6251_v4 }
 0xde6   : > { %v6285_v30 = vmul.f32 0.044715, %v6277_v53  ;;  %v6275_v36 = vmul.f32 %v6267_v62, %v9182_v13  ;;  %v6270_v54 = vmul.f32 %v6260_v23, %v6260_v23 }
 0xde7   : > { %7841 = vtanh.f32 %v6298_v37  ;;  %v6296_v7 = vmul.f32 0.7978846, %v6288_v42  ;;  %v6268_v26 = vmul.f32 %v6252_v32, %v6252_v32 }
 0xde8   : > { %v6293_v8 = vadd.f32 %v6285_v30, %v9176_v47  ;;  %v6283_v46 = vmul.f32 0.044715, %v6275_v36  ;;  %v6278_v57 = vmul.f32 %v6270_v54, %v6260_v23 }
 0xde9   : > { %7843 = vtanh.f32 %v6296_v7  ;;  %v6276_v0 = vmul.f32 %v6268_v26, %v6252_v32 }
 0xdea   : > { %v6301_v18 = vmul.f32 0.7978846, %v6293_v8  ;;  %v6291_v20 = vadd.f32 %v6283_v46, %v9182_v13  ;;  %v6286_v25 = vmul.f32 0.044715, %v6278_v57  ;;  %v6357_v8 = vsub.s32 3, %v9015_v2 }
 0xdeb   : > { %v6284_v27 = vmul.f32 0.044715, %v6276_v0 }
 0xdec   : > { %7845 = vtanh.f32 %v6301_v18  ;;  %v6299_v56 = vmul.f32 0.7978846, %v6291_v20  ;;  %v6294_v11 = vadd.f32 %v6286_v25, %v6260_v23  ;;  %v6358_v46 = vrot.slane %v9021_v3, %v6357_v8 }
 0xded   : > { %v6292_v12 = vadd.f32 %v6284_v27, %v6252_v32 }
 0xdee   : > { %7847 = vtanh.f32 %v6299_v56  ;;  %v6302_v6 = vmul.f32 0.7978846, %v6294_v11 }
 0xdef   : > { %v6300_v22 = vmul.f32 0.7978846, %v6292_v12 }
 0xdf0   : > { %7849 = vtanh.f32 %v6302_v6  ;;  %v7838_v24 = vpop.eup %7837 }
 0xdf1   : > { %7851 = vtanh.f32 %v6300_v22  ;;  %v6313_v48 = vadd.f32 1.0, %v7838_v24 }
 0xdf2   : > { %v7840_v60 = vpop.eup %7839 }
 0xdf3   : > { %v6311_v10 = vadd.f32 1.0, %v7840_v60  ;;  %v6321_v43 = vmul.f32 0.5, %v6313_v48 }
 0xdf4   : > { %v7842_v17 = vpop.eup %7841 }
 0xdf5   : > { %v6314_v5 = vadd.f32 1.0, %v7842_v17  ;;  %v6319_v31 = vmul.f32 0.5, %v6311_v10  ;;  %v6329_v44 = vmul.f32 %v6321_v43, %v9156_v52 }
 0xdf6   : > { %v7844_v21 = vpop.eup %7843 }
 0xdf7   : > { %v6322_v59 = vmul.f32 0.5, %v6314_v5  ;;  %v6312_v9 = vadd.f32 1.0, %v7844_v21  ;;  %v6327_v61 = vmul.f32 %v6319_v31, %v9160_v29 }
 0xdf9   : > { %v7846_v28 = vpop.eup %7845  ;;  %v6320_v15 = vmul.f32 0.5, %v6312_v9  ;;  %v6330_v58 = vmul.f32 %v6322_v59, %v9165_v19 }
 0xdfa   : > { %v6317_v33 = vadd.f32 1.0, %v7846_v28 }
 0xdfb   : > { %v7848_v49 = vpop.eup %7847  ;;  %v6328_v41 = vmul.f32 %v6320_v15, %v9170_v39  ;;  %v6336_v62 = vpack.c.bf16 %v6330_v58, %v6329_v44 }
 0xdfc   : > { %v6315_v55 = vadd.f32 1.0, %v7848_v49  ;;  %v6325_v30 = vmul.f32 0.5, %v6317_v33 }
 0xdfd   : > { %v7850_v16 = vpop.eup %7849  ;;  %v6335_v51 = vpack.c.bf16 %v6328_v41, %v6327_v61 }
 0xdfe   : > { %v7852_v53 = vpop.eup %7851  ;;  %v6318_v4 = vadd.f32 1.0, %v7850_v16  ;;  %v6323_v42 = vmul.f32 0.5, %v6315_v55  ;;  %v6333_v52 = vmul.f32 %v6325_v30, %v9176_v47 }
 0xdff   : > { %7537 = vmatprep.mubr.bf16.mxu1 %v6335_v51  ;;  %v6316_v37 = vadd.f32 1.0, %v7852_v53 }
 0xe00   : > { %7538 = vmatmul.mubr.bf16.vlgmr.msra.gmra.mxu1 %v6336_v62  ;;  %v6326_v19 = vmul.f32 0.5, %v6318_v4  ;;  %v6331_v29 = vmul.f32 %v6323_v42, %v9182_v13 }
 0xe01   : > { %v6324_v36 = vmul.f32 0.5, %v6316_v37 }
 0xe02   : > { %v6334_v54 = vmul.f32 %v6326_v19, %v6260_v23 }
 0xe03   : > { %v6332_v39 = vmul.f32 %v6324_v36, %v6252_v32 }
 0xe04   : > { %v6338_v26 = vpack.c.bf16 %v6334_v54, %v6333_v52 }
 0xe05   : > { %v6337_v7 = vpack.c.bf16 %v6332_v39, %v6331_v29 }
 0xe07   : > { %7541 = vmatprep.mubr.bf16.mxu1 %v6337_v7 }
 0xe08   : > { %7542 = vmatmul.mubr.bf16.gmra.mxu1 %v6338_v26 }
 0xec0   : > { %v7539_v57 = vpop.f32.mrf.mxu1 }
 0xec1   : > { %v6450_v0 = vadd.f32 %v7539_v57, %v6358_v46 }
 0xec2   : > { %v6441_v18 = vpop.f32.mrf.mxu1 }
 0xec3   : > { %v6474_v20 = vadd.f32 %v6450_v0, %v9104_v63  ;;  %v6442_v25 = vadd.f32 %v6441_v18, %v6358_v46 }
 0xec4   : > { %v7540_v23 = vpop.f32.mrf.mxu1 }
 0xec5   : > { %v6472_v13 = vadd.f32 %v6442_v25, %v9094_v45  ;;  %v6453_v32 = vadd.f32 %v7540_v23, %v6358_v46  ;;  %v6486_v47 = vsel %vm416_vm0, %v6474_v20, 0.0 }
 0xec6   : > { %6487 = vadd.xlane.f32.xlu1 %v6486_v47  ;;  %v6444_v27 = vpop.f32.mrf.mxu1 }
 0xec7   : > { %v6475_v56 = vadd.f32 %v6453_v32, %v9106_v35  ;;  %v6445_v11 = vadd.f32 %v6444_v27, %v6358_v46  ;;  %v6480_v24 = vsel %vm416_vm0, %v6472_v13, 0.0 }
 0xec8   : > { %v7543_v12 = vpop.f32.mrf.mxu1 }
 0xec9   : > { %v6473_v6 = vadd.f32 %v6445_v11, %v9097_v1  ;;  %v6489_v22 = vsel %vm416_vm0, %v6475_v56, 0.0  ;;  %v6466_v60 = vadd.f32 %v7543_v12, %v6358_v46  ;;  %v7691_v11 = vld [vmem:[%s9363_s8 + $0x8] sm:$0xff]   ;;  %v7692_v12 = vld [vmem:[%s9363_s8] sm:$0xff]  }
 0xeca   : > { %6490 = vadd.xlane.f32.xlu0 %v6489_v22  ;;  %6481 = vadd.xlane.f32.xlu1 %v6480_v24  ;;  %v6457_v63 = vpop.f32.mrf.mxu1 }
 0xecb   : > { %v6458_v45 = vadd.f32 %v6457_v63, %v6358_v46  ;;  %v6483_v48 = vsel %vm416_vm0, %v6473_v6, 0.0  ;;  %v6478_v5 = vadd.f32 %v6466_v60, %v9119_v34  ;;  %7546 = vmatpush3.bf16.msra.mxu0 %v7691_v11 }
 0xecc   : > { %v7544_v10 = vpop.f32.mrf.mxu1  ;;  %7547 = vmatprep.subr.bf16.mxu0 %v7974_v14  ;;  %v6586_v14 = vsub.s32 4, %v9015_v2 }
 0xecd   : > { %v6476_v17 = vadd.f32 %v6458_v45, %v9113_v38  ;;  %v6469_v21 = vadd.f32 %v7544_v10, %v6358_v46  ;;  %v6498_v28 = vsel %vm416_vm0, %v6478_v5, 0.0 }
 0xece   : > { %6484 = vadd.xlane.f32.xlu0 %v6483_v48  ;;  %v6460_v35 = vpop.f32.mrf.mxu1 }
 0xecf   : > { %v6461_v1 = vadd.f32 %v6460_v35, %v6358_v46  ;;  %v6492_v59 = vsel %vm416_vm0, %v6476_v17, 0.0  ;;  %v6479_v31 = vadd.f32 %v6469_v21, %v9121_v40  ;;  %7548 = vmatpush3.bf16.msra.mxu0 %v7692_v12 }
 0xed0   : > { %6493 = vadd.xlane.f32.xlu1 %v6492_v59 }
 0xed1   : > { %v6477_v9 = vadd.f32 %v6461_v1, %v9115_v50  ;;  %v6501_v38 = vsel %vm416_vm0, %v6479_v31, 0.0 }
 0xed3   : > { %v6495_v43 = vsel %vm416_vm0, %v6477_v9, 0.0 }
 0xed4   : > { %6496 = vadd.xlane.f32.xlu0 %v6495_v43  ;;  %6499 = vadd.xlane.f32.xlu1 %v6498_v28  ;;  %v6598_v28 = vsub.s32 5, %v9015_v2 }
 0xed8   : > { %6502 = vadd.xlane.f32.xlu0 %v6501_v38 }
 0xf4f   : > { %v6488_v15 = vpop.xlane.xlu1 %6487 }
 0xf50   : > { %v6506_v34 = vmul.f32 0.03125, %v6488_v15 }
 0xf52   : > { %v9216_v58 = vsub.f32 %v6474_v20, %v6506_v34  ;;  %v9266_v34 = vrot.slane %v9021_v3, %v6586_v14 }
 0xf53   : > { %v6482_v49 = vpop.xlane.xlu1 %6481  ;;  %v6491_v61 = vpop.xlane.xlu0 %6490 }
 0xf54   : > { %v6504_v41 = vmul.f32 0.03125, %v6482_v49  ;;  %v6507_v44 = vmul.f32 0.03125, %v6491_v61  ;;  %v6522_v50 = vmul.f32 %v9216_v58, %v9216_v58 }
 0xf56   : > { %v9220_v40 = vsub.f32 %v6472_v13, %v6504_v41  ;;  %v9222_v55 = vsub.f32 %v6475_v56, %v6507_v44  ;;  %v6534_v33 = vsel %vm416_vm0, %v6522_v50, 0.0  ;;  %v9269_v50 = vrot.slane %v9021_v3, %v6598_v28 }
 0xf57   : > { %6535 = vadd.xlane.f32.xlu1 %v6534_v33  ;;  %v6485_v16 = vpop.xlane.xlu0 %6484 }
 0xf58   : > { %v6505_v51 = vmul.f32 0.03125, %v6485_v16  ;;  %v6520_v53 = vmul.f32 %v9220_v40, %v9220_v40  ;;  %v6523_v62 = vmul.f32 %v9222_v55, %v9222_v55 }
 0xf59   : > { %v6494_v4 = vpop.xlane.xlu1 %6493 }
 0xf5a   : > { %v9229_v37 = vsub.f32 %v6473_v6, %v6505_v51  ;;  %v6508_v42 = vmul.f32 0.03125, %v6494_v4  ;;  %v6528_v30 = vsel %vm416_vm0, %v6520_v53, 0.0  ;;  %v6537_v19 = vsel %vm416_vm0, %v6523_v62, 0.0 }
 0xf5b   : > { %6529 = vadd.xlane.f32.xlu1 %v6528_v30  ;;  %6538 = vadd.xlane.f32.xlu0 %v6537_v19 }
 0xf5c   : > { %v9233_v36 = vsub.f32 %v6476_v17, %v6508_v42  ;;  %v6521_v54 = vmul.f32 %v9229_v37, %v9229_v37 }
 0xf5d   : > { %v6500_v29 = vpop.xlane.xlu1 %6499  ;;  %v6497_v39 = vpop.xlane.xlu0 %6496 }
 0xf5e   : > { %v6510_v52 = vmul.f32 0.03125, %v6500_v29  ;;  %v6509_v7 = vmul.f32 0.03125, %v6497_v39  ;;  %v6531_v26 = vsel %vm416_vm0, %v6521_v54, 0.0  ;;  %v6524_v8 = vmul.f32 %v9233_v36, %v9233_v36 }
 0xf5f   : > { %6532 = vadd.xlane.f32.xlu0 %v6531_v26 }
 0xf60   : > { %v9240_v46 = vsub.f32 %v6478_v5, %v6510_v52  ;;  %v9242_v57 = vsub.f32 %v6477_v9, %v6509_v7  ;;  %v6540_v0 = vsel %vm416_vm0, %v6524_v8, 0.0 }
 0xf61   : > { %6541 = vadd.xlane.f32.xlu1 %v6540_v0  ;;  %v6503_v18 = vpop.xlane.xlu0 %6502 }
 0xf62   : > { %v6511_v20 = vmul.f32 0.03125, %v6503_v18  ;;  %v6526_v25 = vmul.f32 %v9240_v46, %v9240_v46  ;;  %v6525_v23 = vmul.f32 %v9242_v57, %v9242_v57 }
 0xf64   : > { %v9249_v13 = vsub.f32 %v6479_v31, %v6511_v20  ;;  %v6546_v32 = vsel %vm416_vm0, %v6526_v25, 0.0  ;;  %v6543_v47 = vsel %vm416_vm0, %v6525_v23, 0.0 }
 0xf65   : > { %6547 = vadd.xlane.f32.xlu1 %v6546_v32  ;;  %6544 = vadd.xlane.f32.xlu0 %v6543_v47 }
 0xf66   : > { %v6527_v27 = vmul.f32 %v9249_v13, %v9249_v13 }
 0xf68   : > { %v6549_v56 = vsel %vm416_vm0, %v6527_v27, 0.0 }
 0xf69   : > { %6550 = vadd.xlane.f32.xlu0 %v6549_v56 }
 0xfe0   : > { %v6536_v6 = vpop.xlane.xlu1 %6535 }
 0xfe1   : > { %v6554_v22 = vmul.f32 0.03125, %v6536_v6 }
 0xfe3   : > { %v6562_v24 = vadd.f32 1e-05, %v6554_v22 }
 0xfe4   : > { %v6530_v63 = vpop.xlane.xlu1 %6529  ;;  %v6539_v60 = vpop.xlane.xlu0 %6538 }
 0xfe5   : > { %7853 = vrsqrt.f32 %v6562_v24  ;;  %v6552_v45 = vmul.f32 0.03125, %v6530_v63  ;;  %v6555_v10 = vmul.f32 0.03125, %v6539_v60 }
 0xfe7   : > { %v6560_v17 = vadd.f32 1e-05, %v6552_v45  ;;  %v6563_v48 = vadd.f32 1e-05, %v6555_v10 }
 0xfe8   : > { %v6533_v35 = vpop.xlane.xlu0 %6532 }
 0xfe9   : > { %7855 = vrsqrt.f32 %v6560_v17  ;;  %v6553_v5 = vmul.f32 0.03125, %v6533_v35 }
 0xfea   : > { %7857 = vrsqrt.f32 %v6563_v48  ;;  %v6542_v21 = vpop.xlane.xlu1 %6541 }
 0xfeb   : > { %v6561_v1 = vadd.f32 1e-05, %v6553_v5  ;;  %v6556_v59 = vmul.f32 0.03125, %v6542_v21 }
 0xfed   : > { %7859 = vrsqrt.f32 %v6561_v1  ;;  %v6564_v9 = vadd.f32 1e-05, %v6556_v59 }
 0xfee   : > { %v6548_v31 = vpop.xlane.xlu1 %6547  ;;  %v6545_v43 = vpop.xlane.xlu0 %6544 }
 0xfef   : > { %7861 = vrsqrt.f32 %v6564_v9  ;;  %v6558_v38 = vmul.f32 0.03125, %v6548_v31  ;;  %v6557_v15 = vmul.f32 0.03125, %v6545_v43 }
 0xff1   : > { %v6566_v49 = vadd.f32 1e-05, %v6558_v38  ;;  %v6565_v61 = vadd.f32 1e-05, %v6557_v15 }
 0xff2   : > { %v7854_v41 = vpop.eup %7853  ;;  %v6551_v44 = vpop.xlane.xlu0 %6550 }
 0xff3   : > { %v6578_v33 = vmul.f32 %v7854_v41, %v9216_v58  ;;  %7863 = vrsqrt.f32 %v6566_v49  ;;  %v6559_v16 = vmul.f32 0.03125, %v6551_v44 }
 0xff4   : > { %7865 = vrsqrt.f32 %v6565_v61 }
 0xff5   : > { %v6590_v2 = vmul.f32 %v9266_v34, %v6578_v33  ;;  %v6567_v51 = vadd.f32 1e-05, %v6559_v16 }
 0xff6   : > { %v7856_v53 = vpop.eup %7855 }
 0xff7   : > { %v7858_v62 = vpop.eup %7857  ;;  %v6602_v4 = vadd.f32 %v9269_v50, %v6590_v2  ;;  %v6576_v42 = vmul.f32 %v7856_v53, %v9220_v40  ;;  %7867 = vrsqrt.f32 %v6567_v51 }
 0xff8   : > { %v6579_v30 = vmul.f32 %v7858_v62, %v9222_v55 }
 0xff9   : > { %v6622_v3 = vsel %vm416_vm0, %v6602_v4, 0.0  ;;  %v6588_v19 = vmul.f32 %v9266_v34, %v6576_v42 }
 0xffa   : > { %v7860_v58 = vpop.eup %7859  ;;  %v6623_v54 = vrot.slane %v6622_v3, 4  ;;  %v6591_v29 = vmul.f32 %v9266_v34, %v6579_v30 }
 0xffb   : > { %v6600_v39 = vadd.f32 %v9269_v50, %v6588_v19  ;;  %v6577_v52 = vmul.f32 %v7860_v58, %v9229_v37 }
 0xffc   : > { %v7862_v7 = vpop.eup %7861  ;;  %v6624_v26 = vadd.f32 %v6623_v54, %v6622_v3  ;;  %v6603_v8 = vadd.f32 %v9269_v50, %v6591_v29 }
 0xffd   : > { %v6608_v40 = vsel %vm416_vm0, %v6600_v39, 0.0  ;;  %v6589_v55 = vmul.f32 %v9266_v34, %v6577_v52  ;;  %v6580_v0 = vmul.f32 %v7862_v7, %v9233_v36 }
 0xffe   : > { %v6625_v18 = vrot.slane %v6624_v26, 2  ;;  %v6609_v20 = vrot.slane %v6608_v40, 4  ;;  %v6629_v25 = vsel %vm416_vm0, %v6603_v8, 0.0 }
 0xfff   : > { %v6630_v23 = vrot.slane %v6629_v25, 4  ;;  %v6601_v32 = vadd.f32 %v9269_v50, %v6589_v55  ;;  %v6592_v47 = vmul.f32 %v9266_v34, %v6580_v0 }
0x1000   : > { %v7864_v37 = vpop.eup %7863  ;;  %v6626_v27 = vadd.f32 %v6625_v18, %v6624_v26  ;;  %v6610_v56 = vadd.f32 %v6609_v20, %v6608_v40 }
0x1001   : > { %v7866_v11 = vpop.eup %7865  ;;  %v6631_v12 = vadd.f32 %v6630_v23, %v6629_v25  ;;  %v6615_v6 = vsel %vm416_vm0, %v6601_v32, 0.0  ;;  %v6604_v22 = vadd.f32 %v9269_v50, %v6592_v47  ;;  %v6582_v36 = vmul.f32 %v7864_v37, %v9240_v46 }
0x1002   : > { %v6611_v24 = vrot.slane %v6610_v56, 2  ;;  %v6616_v63 = vrot.slane %v6615_v6, 4  ;;  %v6581_v60 = vmul.f32 %v7866_v11, %v9242_v57  ;;  %v6627_v35 = vrot.slane %v6626_v27, 1 }
0x1003   : > { %v6632_v45 = vrot.slane %v6631_v12, 2  ;;  %v6636_v10 = vsel %vm416_vm0, %v6604_v22, 0.0  ;;  %v6594_v17 = vmul.f32 %v9266_v34, %v6582_v36 }
0x1004   : > { %v7868_v48 = vpop.eup %7867  ;;  %v6612_v5 = vadd.f32 %v6611_v24, %v6610_v56  ;;  %v6617_v21 = vadd.f32 %v6616_v63, %v6615_v6  ;;  %v6637_v1 = vrot.slane %v6636_v10, 4  ;;  %v6593_v9 = vmul.f32 %v9266_v34, %v6581_v60 }
0x1005   : > { %v6633_v59 = vadd.f32 %v6632_v45, %v6631_v12  ;;  %v6606_v14 = vadd.f32 %v9269_v50, %v6594_v17  ;;  %v6583_v46 = vmul.f32 %v7868_v48, %v9249_v13  ;;  %v6628_v61 = vadd.f32 %v6627_v35, %v6626_v27 }
0x1006   : > { %v6613_v31 = vrot.slane %v6612_v5, 1  ;;  %v6618_v43 = vrot.slane %v6617_v21, 2  ;;  %v6638_v57 = vadd.f32 %v6637_v1, %v6636_v10  ;;  %v6605_v15 = vadd.f32 %v9269_v50, %v6593_v9 }
0x1007   : > { %v6634_v28 = vrot.slane %v6633_v59, 1  ;;  %v6650_v38 = vsel %vm416_vm0, %v6606_v14, 0.0  ;;  %v6595_v49 = vmul.f32 %v9266_v34, %v6583_v46  ;;  %v6666_v19 = vmul.f32 0.125, %v6628_v61 }
0x1008   : > { %v6614_v41 = vadd.f32 %v6613_v31, %v6612_v5  ;;  %v6619_v44 = vadd.f32 %v6618_v43, %v6617_v21  ;;  %v6639_v33 = vrot.slane %v6638_v57, 2  ;;  %v6651_v16 = vrot.slane %v6650_v38, 4 }
0x1009   : > { %v6643_v2 = vsel %vm416_vm0, %v6605_v15, 0.0  ;;  %v6607_v51 = vadd.f32 %v9269_v50, %v6595_v49  ;;  %v6635_v4 = vadd.f32 %v6634_v28, %v6633_v59  ;;  %v6674_v0 = vpack.c.bf16 %v6666_v19, %v6666_v19  ;;  %v6995_v49 = vld [vmem:[%s9364_s9] ss:$0 sm:$0xff] }
0x100a   : > { %v6664_v13 = vmul.f32 0.125, %v6614_v41  ;;  %v6620_v53 = vrot.slane %v6619_v44, 1  ;;  %v6640_v62 = vadd.f32 %v6639_v33, %v6638_v57  ;;  %v6652_v42 = vadd.f32 %v6651_v16, %v6650_v38 }
0x100b   : > { %v6644_v30 = vrot.slane %v6643_v2, 4  ;;  %v6657_v3 = vsel %vm416_vm0, %v6607_v51, 0.0  ;;  %v6667_v40 = vmul.f32 0.125, %v6635_v4  ;;  %v6701_v6 = vunpack.c.l.b16 %v6674_v0 }
0x100c   : > { %v6621_v58 = vadd.f32 %v6620_v53, %v6619_v44  ;;  %v6641_v34 = vrot.slane %v6640_v62, 1  ;;  %v6658_v54 = vrot.slane %v6657_v3, 4  ;;  %v6653_v29 = vrot.slane %v6652_v42, 2 }
0x100d   : > { %v6645_v39 = vadd.f32 %v6644_v30, %v6643_v2  ;;  %v6672_v52 = vpack.c.bf16 %v6664_v13, %v6664_v13  ;;  %v6675_v56 = vpack.c.bf16 %v6667_v40, %v6667_v40 }
0x100e   : > { %v6665_v7 = vmul.f32 0.125, %v6621_v58  ;;  %v6642_v26 = vadd.f32 %v6641_v34, %v6640_v62  ;;  %v6659_v8 = vadd.f32 %v6658_v54, %v6657_v3  ;;  %v6654_v50 = vadd.f32 %v6653_v29, %v6652_v42 }
0x100f   : > { %v6646_v55 = vrot.slane %v6645_v39, 2  ;;  %v6699_v47 = vunpack.c.l.b16 %v6672_v52  ;;  %v6702_v17 = vunpack.c.l.b16 %v6675_v56 }
0x1010   : > { %v6673_v18 = vpack.c.bf16 %v6665_v7, %v6665_v7  ;;  %v6668_v20 = vmul.f32 0.125, %v6642_v26  ;;  %v6660_v25 = vrot.slane %v6659_v8, 2  ;;  %v6655_v23 = vrot.slane %v6654_v50, 1 }
0x1011   : > { %v6647_v32 = vadd.f32 %v6646_v55, %v6645_v39 }
0x1012   : > { %v6700_v37 = vunpack.c.l.b16 %v6673_v18  ;;  %v6661_v27 = vadd.f32 %v6660_v25, %v6659_v8  ;;  %v6656_v11 = vadd.f32 %v6655_v23, %v6654_v50  ;;  %v6676_v22 = vpack.c.bf16 %v6668_v20, %v6668_v20 }
0x1013   : > { %v6648_v12 = vrot.slane %v6647_v32, 1 }
0x1014   : > { %v6662_v36 = vrot.slane %v6661_v27, 1  ;;  %v6708_v24 = vsel %vm6707_vm5, %v6700_v37, %v6699_v47  ;;  %v6670_v60 = vmul.f32 0.125, %v6656_v11  ;;  %v6703_v5 = vunpack.c.l.b16 %v6676_v22 }
0x1015   : > { %v6649_v63 = vadd.f32 %v6648_v12, %v6647_v32  ;;  %v6710_v10 = vsel %vm6709_vm6, %v6701_v6, %v6708_v24 }
0x1016   : > { %v6663_v45 = vadd.f32 %v6662_v36, %v6661_v27  ;;  %v6678_v35 = vpack.c.bf16 %v6670_v60, %v6670_v60  ;;  %v6712_v59 = vsel %vm6711_vm7, %v6702_v17, %v6710_v10 }
0x1017   : > { %v6669_v48 = vmul.f32 0.125, %v6649_v63  ;;  %v6714_v43 = vsel %vm6713_vm8, %v6703_v5, %v6712_v59 }
0x1018   : > { %v6671_v21 = vmul.f32 0.125, %v6663_v45  ;;  %v6705_v9 = vunpack.c.l.b16 %v6678_v35 }
0x1019   : > { %v6677_v1 = vpack.c.bf16 %v6669_v48, %v6669_v48 }
0x101a   : > { %v6679_v14 = vpack.c.bf16 %v6671_v21, %v6671_v21 }
0x101b   : > { %v6704_v46 = vunpack.c.l.b16 %v6677_v1 }
0x101c   : > { %v6706_v31 = vunpack.c.l.b16 %v6679_v14 }
0x101d   : > { %v6716_v57 = vsel %vm6715_vm9, %v6704_v46, %v6714_v43 }
0x101e   : > { %v6718_v28 = vsel %vm6717_vm10, %v6705_v9, %v6716_v57 }
0x101f   : > { %v6720_v38 = vsel %vm6719_vm11, %v6706_v31, %v6718_v28 }
0x1020   : > { %v6721_v15 = vpack.c.b16 %v6720_v38, %v6720_v38 }
0x1022   : > { %7550 = vmatmul.mubr.msk.bf16.vlgmr.msra.gmra.mxu0 %vm416_vm0, %v6721_v15 }
0x10e2   : > { %v6771_v61 = vpop.f32.mrf.mxu0 }
0x10e3   : > { %v6772_v41 = vadd.f32 %v6995_v49, %v6771_v61 }
0x10e4   : > { %v7551_v44 = vpop.f32.mrf.mxu0 }
0x10e5   : > { %6777 = vst [vmem:[%s377_s27] sm:$0xff] %v6772_v41 }
0x10e6   : > { %v6774_v33 = vpop.f32.mrf.mxu0 }
0x10e7   : > { %7918 = shalt.err (!%p7915_p10)
}
0x10e8   : > { %s7919_s11 = scalar_lea.hbm %s9312_s30, 128  ;;  %s7923_s21 = scalar_lea.hbm %s9365_s10, 256 }
0x10e9   : > { %p7920_p0 = scmp.ne.s32.totalorder %s9312_s30, %s7919_s11  ;;  %p7924_p1 = scmp.lt.s32.totalorder %s9312_s30, %s9365_s10 }
0x10ea   : > { %p7925_p3 = scmp.lt.s32.totalorder %s7923_s21, %s7919_s11 }
0x10eb   : > { %p7921_p2 = pnand %p7920_p0, %p9380_p12 }
0x10ec   : > { %p7926_p6 = por %p7925_p3, %p7924_p1 }
0x10ed   : > { %p7922_p9 = pneg %p7921_p2 }
0x10ef   : > { %p7927_p11 = pnand %p7926_p6, %p7922_p9 }
0x10f1   : > { %7930 = shalt.err (!%p7927_p11)
}
0x10f2   : > { %7555 = dma.vmem_to_hbm [thread:$0]  (%p9380_p12), %s9314_s18, 128, %s9312_s30, %s6779_s29   ;;  %v7552_v16 = vpop.f32.mrf.mxu0 }
0x10f3 PF: > { %s6804_s28 = sand.u32 1, %s7957_s13   ;;  %p9381_p13 = scmp.ne.s32.totalorder %s9377_s26, 0 }
0x10f4   : > { %p9382_p4 = scmp.ge.s32.totalorder %s7969_s16, 2  ;;  %s6805_s15 = scalar_lea.sflag [#allocation4], %s6804_s28 }
0x10f6   : > { %p7562_p5 = pnand %p9382_p4, %p9381_p13 }
0x10f8   : > { %p7563_p7 = pneg %p7562_p5 }
0x10fa   : > { %7952 = dma.done.wait (%p7563_p7), %s6805_s15, 128  }
0x10fb   : > { %7954 = vsyncadd (%p7563_p7), %s6805_s15, 4294967168  ;;  %s9383_s16 = sld [smem:[#allocation9_spill]]  ;;  %s9386_s13 = smov %s7961_s14 }
0x10fc   : > { %s9384_s23 = sld [smem:[#allocation8_spill]] }
0x10fd   : > { %s9385_s15 = sld [smem:[#allocation10_spill]] }
0x1101   : > { %p23_p8 = scmp.ge.s32.totalorder %s9383_s16, 4  }
0x1102   : > { %s9387_s14 = smov %s9384_s23 }
0x1103   :  { %25 = sbr.rel (!%p23_p8) target bundleno = 5 (0x5), region = 105 }
0x1108   :  { %6810 = vsyncpa [#allocation3], 1 }
0x1109   :  { %6812 = vsyncpa [#allocation3 + $0x1], 1 }
0x110a   :  { %6813 = vsyncpa [#allocation4], 1 }
0x110b   :  { %6815 = vsyncpa [#allocation4 + $0x1], 1 }

</bundles_post_ra>
